<compile_context>
chip_gen: v7x
topology: tpu7x:2x2x1
jax: 0.10.0
libtpu: 0.0.40
codegen_flags: <defaults>
</compile_context>

<pallas_src>
import functools

import jax
import jax.numpy as jnp
from jax import lax
from jax.experimental import pallas as pl
from jax.experimental.pallas import tpu as pltpu  # noqa: F401  (TPU backend)

# ----- model hyper-parameters (PyTorch defaults for TransformerEncoderLayer) -----
D_MODEL = 32
NHEAD = 4
NUM_LAYERS = 2
OUTPUT_DIM = 16
DIM_FF = 2048            # nn.TransformerEncoderLayer default dim_feedforward
LN_EPS = 1e-5            # default layer_norm_eps
HEAD_DIM = D_MODEL // NHEAD
HIDDEN = D_MODEL // 2    # fc1 output


def _layer_norm(x, w, b):
    mu = jnp.mean(x, axis=-1, keepdims=True)
    xc = x - mu
    var = jnp.mean(xc * xc, axis=-1, keepdims=True)
    inv = lax.rsqrt(var + LN_EPS)
    return xc * inv * w + b


def transformer_decoder_kernel(
    x_ref,                                   # (B, S, D)
    qkvw_ref, qkvb_ref,                      # (L, H, D, 3*HD), (L, H, 1, 3*HD)
    ow_ref, ob_ref,                          # (L, H, HD, D), (L, 1, D)
    n1w_ref, n1b_ref,                        # (L, 1, D)
    l1w_ref, l1b_ref,                        # (L, D, FF) bf16, (L, 1, FF) f32
    l2w_ref, l2b_ref,                        # (L, FF, D) bf16, (L, 1, D) f32
    n2w_ref, n2b_ref,                        # (L, 1, D)
    fc1w_ref, fc1b_ref,                      # (D, D//2), (1, D//2)
    fc2w_ref, fc2b_ref,                      # (D//2, OUT), (1, OUT)
    o_ref,                                   # (B, S, OUT)
    *, B, S,
):
    BS = B * S
    G = B * NHEAD

    # All rows of the batch fused -> matmul M dimension is B*S (S must be a
    # multiple of 8 so this reshape is a pure layout no-op).
    x = x_ref[...].astype(jnp.float32).reshape(BS, D_MODEL)

    for l in range(NUM_LAYERS):              # static unroll over layers
        # -------- multi-head self-attention: all heads & batch elems batched --------
        x3 = x.reshape(B, S, D_MODEL)
        xg = jnp.broadcast_to(x3[:, None], (B, NHEAD, S, D_MODEL)).reshape(
            G, S, D_MODEL)

        def bcast_w(w):                      # (H, a, b) -> (G, a, b), g = b*H + h
            return jnp.broadcast_to(w[None], (B,) + w.shape).reshape(
                (G,) + w.shape[1:])

        qkvw = bcast_w(qkvw_ref[l])
        qkvb = bcast_w(qkvb_ref[l])
        ow = bcast_w(ow_ref[l])

        # One fused projection: (G, S, D) @ (G, D, 3*HD) -> (G, S, 3*HD).
        qkv = jnp.einsum('gsd,gde->gse', xg, qkvw,
                         preferred_element_type=jnp.float32) + qkvb
        q = qkv[..., 0 * HEAD_DIM:1 * HEAD_DIM]   # scale already folded into Wq/bq
        k = qkv[..., 1 * HEAD_DIM:2 * HEAD_DIM]
        v = qkv[..., 2 * HEAD_DIM:3 * HEAD_DIM]

        scores = jnp.einsum('gqe,gke->gqk', q, k,
                            preferred_element_type=jnp.float32)      # (G, S, S)
        m = jnp.max(scores, axis=-1, keepdims=True)
        p = jnp.exp(scores - m)
        p = p * pl.reciprocal(jnp.sum(p, axis=-1, keepdims=True), approx=True)

        ctx = jnp.einsum('gqk,gke->gqe', p, v,
                         preferred_element_type=jnp.float32)         # (G, S, HD)
        # Per-head output projection, then sum over heads (== concat @ out_w).
        proj = jnp.einsum('gse,ged->gsd', ctx, ow,
                          preferred_element_type=jnp.float32)        # (G, S, D)
        attn = proj.reshape(B, NHEAD, S, D_MODEL).sum(axis=1).reshape(BS, D_MODEL)
        attn = attn + ob_ref[l]

        x = _layer_norm(x + attn, n1w_ref[l], n1b_ref[l])

        # -------- feed-forward (bf16 weights & activations, f32 accumulation) -------
        h = jnp.dot(x.astype(jnp.bfloat16), l1w_ref[l],
                    preferred_element_type=jnp.float32) + l1b_ref[l]
        h = jnp.maximum(h, 0.0)
        ff = jnp.dot(h.astype(jnp.bfloat16), l2w_ref[l],
                     preferred_element_type=jnp.float32) + l2b_ref[l]
        x = _layer_norm(x + ff, n2w_ref[l], n2b_ref[l])

    # -------- head: fc1 -> ReLU -> fc2 --------
    h1 = jnp.dot(x, fc1w_ref[...], preferred_element_type=jnp.float32) + fc1b_ref[...]
    h1 = jnp.maximum(h1, 0.0)
    out = jnp.dot(h1, fc2w_ref[...], preferred_element_type=jnp.float32) + fc2b_ref[...]
    o_ref[...] = out.reshape(B, S, OUTPUT_DIM).astype(o_ref.dtype)


def transformer_decoder(x, packed_params):
    """x: (B, S, D) float32; packed_params: list from pack_params()."""
    B, S, D = x.shape
    assert D == D_MODEL
    kernel = functools.partial(transformer_decoder_kernel, B=B, S=S)
    # Single invocation, no grid: every operand lives fully in VMEM
    # (total footprint ~0.6 MiB, well under any scoped-VMEM default).
    return pl.pallas_call(
        kernel,
        out_shape=jax.ShapeDtypeStruct((B, S, OUTPUT_DIM), jnp.float32),
    )(x, *packed_params)


# ---------------------------------------------------------------------------
# Deterministic parameter initialization (PyTorch-like layout, (in, out) weights)
# ---------------------------------------------------------------------------
def init_params(key):
    ks = jax.random.split(key, 16)
    it = iter(ks)

    def rnd(shape, scale=0.05):
        return (scale * jax.random.normal(next(it), shape)).astype(jnp.float32)

    L, D, FF = NUM_LAYERS, D_MODEL, DIM_FF
    p = dict(
        in_w=rnd((L, D, 3 * D)),  in_b=rnd((L, 3 * D)),
        out_w=rnd((L, D, D)),     out_b=rnd((L, D)),
        n1_w=jnp.ones((L, D), jnp.float32), n1_b=jnp.zeros((L, D), jnp.float32),
        # FFN weights stored in bf16 (dominant HBM traffic -> halved).
        lin1_w=rnd((L, D, FF)).astype(jnp.bfloat16), lin1_b=rnd((L, FF)),
        lin2_w=rnd((L, FF, D)).astype(jnp.bfloat16), lin2_b=rnd((L, D)),
        n2_w=jnp.ones((L, D), jnp.float32), n2_b=jnp.zeros((L, D), jnp.float32),
        fc1_w=rnd((D, HIDDEN)),   fc1_b=rnd((HIDDEN,)),
        fc2_w=rnd((HIDDEN, OUTPUT_DIM)), fc2_b=rnd((OUTPUT_DIM,)),
    )
    return p


def pack_params(p):
    """Reorganize params into the per-head layout the kernel consumes."""
    L, D, H, HD = NUM_LAYERS, D_MODEL, NHEAD, HEAD_DIM
    scale = 1.0 / (HD ** 0.5)

    def split_head_w(w):          # (L, D, D) -> (L, H, D, HD)
        return w.reshape(L, D, H, HD).transpose(0, 2, 1, 3)

    # Fold the attention score scale into the Q projection (free, host-side).
    qw = split_head_w(p["in_w"][:, :, 0 * D:1 * D]) * scale
    kw = split_head_w(p["in_w"][:, :, 1 * D:2 * D])
    vw = split_head_w(p["in_w"][:, :, 2 * D:3 * D])
    qb = p["in_b"][:, 0 * D:1 * D].reshape(L, H, 1, HD) * scale
    kb = p["in_b"][:, 1 * D:2 * D].reshape(L, H, 1, HD)
    vb = p["in_b"][:, 2 * D:3 * D].reshape(L, H, 1, HD)

    qkvw = jnp.concatenate([qw, kw, vw], axis=-1)      # (L, H, D, 3*HD)
    qkvb = jnp.concatenate([qb, kb, vb], axis=-1)      # (L, H, 1, 3*HD)
    ow = p["out_w"].reshape(L, H, HD, D)
    ob = p["out_b"].reshape(L, 1, D)

    return [
        qkvw, qkvb, ow, ob,
        p["n1_w"].reshape(L, 1, D), p["n1_b"].reshape(L, 1, D),
        p["lin1_w"], p["lin1_b"].reshape(L, 1, DIM_FF),
        p["lin2_w"], p["lin2_b"].reshape(L, 1, D),
        p["n2_w"].reshape(L, 1, D), p["n2_b"].reshape(L, 1, D),
        p["fc1_w"], p["fc1_b"].reshape(1, HIDDEN),
        p["fc2_w"], p["fc2_b"].reshape(1, OUTPUT_DIM),
    ]


# ---------------------------------------------------------------------------
# Pure-JAX reference (same math as nn.TransformerEncoderLayer, eval mode)
# ---------------------------------------------------------------------------
def reference(x, p):
    B, S, D = x.shape

    def ln(t, w, b):
        mu = t.mean(-1, keepdims=True)
        var = ((t - mu) ** 2).mean(-1, keepdims=True)
        return (t - mu) / jnp.sqrt(var + LN_EPS) * w + b

    y = x
    for l in range(NUM_LAYERS):
        qkv = y @ p["in_w"][l] + p["in_b"][l]
        q, k, v = qkv[..., :D], qkv[..., D:2 * D], qkv[..., 2 * D:]
        qh = q.reshape(B, S, NHEAD, HEAD_DIM)
        kh = k.reshape(B, S, NHEAD, HEAD_DIM)
        vh = v.reshape(B, S, NHEAD, HEAD_DIM)
        scores = jnp.einsum("bqhd,bkhd->bhqk", qh, kh) / (HEAD_DIM ** 0.5)
        pm = jax.nn.softmax(scores, axis=-1)
        attn = jnp.einsum("bhqk,bkhd->bqhd", pm, vh).reshape(B, S, D)
        attn = attn @ p["out_w"][l] + p["out_b"][l]
        y = ln(y + attn, p["n1_w"][l], p["n1_b"][l])
        h = jax.nn.relu(y @ p["lin1_w"][l].astype(jnp.float32) + p["lin1_b"][l])
        ff = h @ p["lin2_w"][l].astype(jnp.float32) + p["lin2_b"][l]
        y = ln(y + ff, p["n2_w"][l], p["n2_b"][l])
    h1 = jax.nn.relu(y @ p["fc1_w"] + p["fc1_b"])
    return h1 @ p["fc2_w"] + p["fc2_b"]


if __name__ == "__main__":
    key = jax.random.PRNGKey(0)
    kx, kp = jax.random.split(key)

    B, S = 2, 8
    x = jax.random.normal(kx, (B, S, D_MODEL), dtype=jnp.float32)

    pdict = init_params(kp)
    plist = pack_params(pdict)

    out = transformer_decoder(x, plist)
    out = jax.block_until_ready(out)

    ref = reference(x, pdict)
    assert out.shape == (B, S, OUTPUT_DIM)
    # bf16 FFN activations/weights + approx reciprocal vs f32 reference.
    assert jnp.allclose(out, ref, atol=2e-2, rtol=2e-2), (
        f"max abs err {jnp.max(jnp.abs(out - ref))}")

    print("KERNEL_OK")
</pallas_src>

<mosaic_0001>
module attributes {stable_mosaic.version = 11 : i64} {
  func.func @transformer_decoder_kernel(%arg0: memref<2x8x32xf32, #tpu.memory_space<vmem>>, %arg1: memref<2x4x32x24xf32, #tpu.memory_space<vmem>>, %arg2: memref<2x4x1x24xf32, #tpu.memory_space<vmem>>, %arg3: memref<2x4x8x32xf32, #tpu.memory_space<vmem>>, %arg4: memref<2x1x32xf32, #tpu.memory_space<vmem>>, %arg5: memref<2x1x32xf32, #tpu.memory_space<vmem>>, %arg6: memref<2x1x32xf32, #tpu.memory_space<vmem>>, %arg7: memref<2x32x2048xbf16, #tpu.memory_space<vmem>>, %arg8: memref<2x1x2048xf32, #tpu.memory_space<vmem>>, %arg9: memref<2x2048x32xbf16, #tpu.memory_space<vmem>>, %arg10: memref<2x1x32xf32, #tpu.memory_space<vmem>>, %arg11: memref<2x1x32xf32, #tpu.memory_space<vmem>>, %arg12: memref<2x1x32xf32, #tpu.memory_space<vmem>>, %arg13: memref<32x16xf32, #tpu.memory_space<vmem>>, %arg14: memref<1x16xf32, #tpu.memory_space<vmem>>, %arg15: memref<16x16xf32, #tpu.memory_space<vmem>>, %arg16: memref<1x16xf32, #tpu.memory_space<vmem>>, %arg17: memref<2x8x16xf32, #tpu.memory_space<vmem>>) attributes {dimension_semantics = [], scalar_prefetch = 0 : i64, scratch_operands = 0 : i64, tpu.core_type = #tpu.core_type<tc>} {
    %c0 = arith.constant 0 : index
    %c0_0 = arith.constant 0 : index
    %c0_1 = arith.constant 0 : index
    %0 = vector.load %arg0[%c0, %c0_0, %c0_1] : memref<2x8x32xf32, #tpu.memory_space<vmem>>, vector<2x8x32xf32>
    %1 = vector.shape_cast %0 : vector<2x8x32xf32> to vector<16x32xf32>
    %2 = vector.shape_cast %1 : vector<16x32xf32> to vector<2x8x32xf32>
    %3 = vector.shape_cast %2 : vector<2x8x32xf32> to vector<2x1x8x32xf32>
    %4 = vector.shape_cast %3 : vector<2x1x8x32xf32> to vector<2x1x8x32xf32>
    %5 = vector.broadcast %4 : vector<2x1x8x32xf32> to vector<2x4x8x32xf32>
    %6 = vector.shape_cast %5 : vector<2x4x8x32xf32> to vector<8x8x32xf32>
    %c0_2 = arith.constant 0 : index
    %c0_3 = arith.constant 0 : index
    %c0_4 = arith.constant 0 : index
    %c0_5 = arith.constant 0 : index
    %7 = vector.load %arg1[%c0_2, %c0_3, %c0_4, %c0_5] : memref<2x4x32x24xf32, #tpu.memory_space<vmem>>, vector<1x4x32x24xf32>
    %8 = vector.shape_cast %7 : vector<1x4x32x24xf32> to vector<4x32x24xf32>
    %9 = vector.shape_cast %8 : vector<4x32x24xf32> to vector<1x4x32x24xf32>
    %10 = vector.shape_cast %9 : vector<1x4x32x24xf32> to vector<1x4x32x24xf32>
    %11 = vector.broadcast %10 : vector<1x4x32x24xf32> to vector<2x4x32x24xf32>
    %12 = vector.shape_cast %11 : vector<2x4x32x24xf32> to vector<8x32x24xf32>
    %c0_6 = arith.constant 0 : index
    %c0_7 = arith.constant 0 : index
    %c0_8 = arith.constant 0 : index
    %c0_9 = arith.constant 0 : index
    %13 = vector.load %arg2[%c0_6, %c0_7, %c0_8, %c0_9] : memref<2x4x1x24xf32, #tpu.memory_space<vmem>>, vector<1x4x1x24xf32>
    %14 = vector.shape_cast %13 : vector<1x4x1x24xf32> to vector<4x1x24xf32>
    %15 = vector.shape_cast %14 : vector<4x1x24xf32> to vector<1x4x1x24xf32>
    %16 = vector.shape_cast %15 : vector<1x4x1x24xf32> to vector<1x4x1x24xf32>
    %17 = vector.broadcast %16 : vector<1x4x1x24xf32> to vector<2x4x1x24xf32>
    %18 = vector.shape_cast %17 : vector<2x4x1x24xf32> to vector<8x1x24xf32>
    %c0_10 = arith.constant 0 : index
    %c0_11 = arith.constant 0 : index
    %c0_12 = arith.constant 0 : index
    %c0_13 = arith.constant 0 : index
    %19 = vector.load %arg3[%c0_10, %c0_11, %c0_12, %c0_13] : memref<2x4x8x32xf32, #tpu.memory_space<vmem>>, vector<1x4x8x32xf32>
    %20 = vector.shape_cast %19 : vector<1x4x8x32xf32> to vector<4x8x32xf32>
    %21 = vector.shape_cast %20 : vector<4x8x32xf32> to vector<1x4x8x32xf32>
    %22 = vector.shape_cast %21 : vector<1x4x8x32xf32> to vector<1x4x8x32xf32>
    %23 = vector.broadcast %22 : vector<1x4x8x32xf32> to vector<2x4x8x32xf32>
    %24 = vector.shape_cast %23 : vector<2x4x8x32xf32> to vector<8x8x32xf32>
    "tpu.trace_start"() <{level = 10 : i32, message = "gsd,gde->gse"}> : () -> ()
    %cst = arith.constant dense<0.000000e+00> : vector<8x8x24xf32>
    %25 = tpu.matmul %6, %12, %cst {dimension_numbers = #tpu.dot_dimension_numbers<[2], [1], [1], [2], [0, 0, 0, 1, 1, 2], [0], [0]>} : vector<8x8x32xf32>, vector<8x32x24xf32>, vector<8x8x24xf32> -> vector<8x8x24xf32>
    "tpu.trace_stop"() : () -> ()
    %26 = vector.broadcast %18 : vector<8x1x24xf32> to vector<8x8x24xf32>
    %27 = arith.addf %25, %26 : vector<8x8x24xf32>
    %28 = vector.extract_strided_slice %27 {offsets = [0, 0, 0], sizes = [8, 8, 8], strides = [1, 1, 1]} : vector<8x8x24xf32> to vector<8x8x8xf32>
    %29 = vector.extract_strided_slice %27 {offsets = [0, 0, 8], sizes = [8, 8, 8], strides = [1, 1, 1]} : vector<8x8x24xf32> to vector<8x8x8xf32>
    %30 = vector.extract_strided_slice %27 {offsets = [0, 0, 16], sizes = [8, 8, 8], strides = [1, 1, 1]} : vector<8x8x24xf32> to vector<8x8x8xf32>
    "tpu.trace_start"() <{level = 10 : i32, message = "gqe,gke->gqk"}> : () -> ()
    %cst_14 = arith.constant dense<0.000000e+00> : vector<8x8x8xf32>
    %31 = tpu.matmul %28, %29, %cst_14 {dimension_numbers = #tpu.dot_dimension_numbers<[2], [2], [1], [1], [0, 0, 0, 1, 1, 1], [0], [0]>} : vector<8x8x8xf32>, vector<8x8x8xf32>, vector<8x8x8xf32> -> vector<8x8x8xf32>
    "tpu.trace_stop"() : () -> ()
    %cst_15 = arith.constant dense<0xFF800000> : vector<8x8xf32>
    %32 = vector.multi_reduction <maximumf>, %31, %cst_15 [2] : vector<8x8x8xf32> to vector<8x8xf32>
    %33 = vector.shape_cast %32 : vector<8x8xf32> to vector<8x8x1xf32>
    %34 = vector.broadcast %33 : vector<8x8x1xf32> to vector<8x8x8xf32>
    %35 = arith.subf %31, %34 : vector<8x8x8xf32>
    %36 = math.exp %35 : vector<8x8x8xf32>
    %cst_16 = arith.constant dense<0.000000e+00> : vector<8x8xf32>
    %37 = vector.multi_reduction <add>, %36, %cst_16 [2] : vector<8x8x8xf32> to vector<8x8xf32>
    %38 = vector.shape_cast %37 : vector<8x8xf32> to vector<8x8x1xf32>
    %39 = tpu.reciprocal %38 {approx = true} : vector<8x8x1xf32> -> vector<8x8x1xf32>
    %40 = vector.broadcast %39 : vector<8x8x1xf32> to vector<8x8x8xf32>
    %41 = arith.mulf %36, %40 : vector<8x8x8xf32>
    "tpu.trace_start"() <{level = 10 : i32, message = "gqk,gke->gqe"}> : () -> ()
    %cst_17 = arith.constant dense<0.000000e+00> : vector<8x8x8xf32>
    %42 = tpu.matmul %41, %30, %cst_17 {dimension_numbers = #tpu.dot_dimension_numbers<[2], [1], [1], [2], [0, 0, 0, 1, 1, 2], [0], [0]>} : vector<8x8x8xf32>, vector<8x8x8xf32>, vector<8x8x8xf32> -> vector<8x8x8xf32>
    "tpu.trace_stop"() : () -> ()
    "tpu.trace_start"() <{level = 10 : i32, message = "gse,ged->gsd"}> : () -> ()
    %cst_18 = arith.constant dense<0.000000e+00> : vector<8x8x32xf32>
    %43 = tpu.matmul %42, %24, %cst_18 {dimension_numbers = #tpu.dot_dimension_numbers<[2], [1], [1], [2], [0, 0, 0, 1, 1, 2], [0], [0]>} : vector<8x8x8xf32>, vector<8x8x32xf32>, vector<8x8x32xf32> -> vector<8x8x32xf32>
    "tpu.trace_stop"() : () -> ()
    %44 = vector.shape_cast %43 : vector<8x8x32xf32> to vector<2x4x8x32xf32>
    %cst_19 = arith.constant dense<0.000000e+00> : vector<2x8x32xf32>
    %45 = vector.multi_reduction <add>, %44, %cst_19 [1] : vector<2x4x8x32xf32> to vector<2x8x32xf32>
    %46 = vector.shape_cast %45 : vector<2x8x32xf32> to vector<16x32xf32>
    %c0_20 = arith.constant 0 : index
    %c0_21 = arith.constant 0 : index
    %c0_22 = arith.constant 0 : index
    %47 = vector.load %arg4[%c0_20, %c0_21, %c0_22] : memref<2x1x32xf32, #tpu.memory_space<vmem>>, vector<1x1x32xf32>
    %48 = vector.shape_cast %47 : vector<1x1x32xf32> to vector<1x32xf32>
    %49 = vector.broadcast %48 : vector<1x32xf32> to vector<16x32xf32>
    %50 = arith.addf %46, %49 : vector<16x32xf32>
    %51 = arith.addf %1, %50 : vector<16x32xf32>
    %c0_23 = arith.constant 0 : index
    %c0_24 = arith.constant 0 : index
    %c0_25 = arith.constant 0 : index
    %52 = vector.load %arg5[%c0_23, %c0_24, %c0_25] : memref<2x1x32xf32, #tpu.memory_space<vmem>>, vector<1x1x32xf32>
    %53 = vector.shape_cast %52 : vector<1x1x32xf32> to vector<1x32xf32>
    %c0_26 = arith.constant 0 : index
    %c0_27 = arith.constant 0 : index
    %c0_28 = arith.constant 0 : index
    %54 = vector.load %arg6[%c0_26, %c0_27, %c0_28] : memref<2x1x32xf32, #tpu.memory_space<vmem>>, vector<1x1x32xf32>
    %55 = vector.shape_cast %54 : vector<1x1x32xf32> to vector<1x32xf32>
    %cst_29 = arith.constant dense<0.000000e+00> : vector<16xf32>
    %56 = vector.multi_reduction <add>, %51, %cst_29 [1] : vector<16x32xf32> to vector<16xf32>
    %57 = vector.shape_cast %56 : vector<16xf32> to vector<16x1xf32>
    %cst_30 = arith.constant 3.200000e+01 : f32
    %58 = vector.broadcast %cst_30 : f32 to vector<16x1xf32>
    %59 = arith.divf %57, %58 : vector<16x1xf32>
    %60 = vector.broadcast %59 : vector<16x1xf32> to vector<16x32xf32>
    %61 = arith.subf %51, %60 : vector<16x32xf32>
    %62 = arith.mulf %61, %61 : vector<16x32xf32>
    %cst_31 = arith.constant dense<0.000000e+00> : vector<16xf32>
    %63 = vector.multi_reduction <add>, %62, %cst_31 [1] : vector<16x32xf32> to vector<16xf32>
    %64 = vector.shape_cast %63 : vector<16xf32> to vector<16x1xf32>
    %cst_32 = arith.constant 3.200000e+01 : f32
    %65 = vector.broadcast %cst_32 : f32 to vector<16x1xf32>
    %66 = arith.divf %64, %65 : vector<16x1xf32>
    %cst_33 = arith.constant 9.99999974E-6 : f32
    %67 = vector.broadcast %cst_33 : f32 to vector<16x1xf32>
    %68 = arith.addf %66, %67 : vector<16x1xf32>
    %69 = math.rsqrt %68 : vector<16x1xf32>
    %70 = vector.broadcast %69 : vector<16x1xf32> to vector<16x32xf32>
    %71 = arith.mulf %61, %70 : vector<16x32xf32>
    %72 = vector.broadcast %53 : vector<1x32xf32> to vector<16x32xf32>
    %73 = arith.mulf %71, %72 : vector<16x32xf32>
    %74 = vector.broadcast %55 : vector<1x32xf32> to vector<16x32xf32>
    %75 = arith.addf %73, %74 : vector<16x32xf32>
    %76 = arith.truncf %75 : vector<16x32xf32> to vector<16x32xbf16>
    %c0_34 = arith.constant 0 : index
    %c0_35 = arith.constant 0 : index
    %c0_36 = arith.constant 0 : index
    %77 = vector.load %arg7[%c0_34, %c0_35, %c0_36] : memref<2x32x2048xbf16, #tpu.memory_space<vmem>>, vector<1x32x2048xbf16>
    %78 = vector.shape_cast %77 : vector<1x32x2048xbf16> to vector<32x2048xbf16>
    %cst_37 = arith.constant dense<0.000000e+00> : vector<16x2048xf32>
    %79 = tpu.matmul %76, %78, %cst_37 {dimension_numbers = #tpu.dot_dimension_numbers<[1], [0], [0], [1], [0, 0, 1, 1], [], []>} : vector<16x32xbf16>, vector<32x2048xbf16>, vector<16x2048xf32> -> vector<16x2048xf32>
    %c0_38 = arith.constant 0 : index
    %c0_39 = arith.constant 0 : index
    %c0_40 = arith.constant 0 : index
    %80 = vector.load %arg8[%c0_38, %c0_39, %c0_40] : memref<2x1x2048xf32, #tpu.memory_space<vmem>>, vector<1x1x2048xf32>
    %81 = vector.shape_cast %80 : vector<1x1x2048xf32> to vector<1x2048xf32>
    %82 = vector.broadcast %81 : vector<1x2048xf32> to vector<16x2048xf32>
    %83 = arith.addf %79, %82 : vector<16x2048xf32>
    %cst_41 = arith.constant 0.000000e+00 : f32
    %84 = vector.broadcast %cst_41 : f32 to vector<16x2048xf32>
    %85 = arith.maximumf %83, %84 : vector<16x2048xf32>
    %86 = arith.truncf %85 : vector<16x2048xf32> to vector<16x2048xbf16>
    %c0_42 = arith.constant 0 : index
    %c0_43 = arith.constant 0 : index
    %c0_44 = arith.constant 0 : index
    %87 = vector.load %arg9[%c0_42, %c0_43, %c0_44] : memref<2x2048x32xbf16, #tpu.memory_space<vmem>>, vector<1x2048x32xbf16>
    %88 = vector.shape_cast %87 : vector<1x2048x32xbf16> to vector<2048x32xbf16>
    %cst_45 = arith.constant dense<0.000000e+00> : vector<16x32xf32>
    %89 = tpu.matmul %86, %88, %cst_45 {dimension_numbers = #tpu.dot_dimension_numbers<[1], [0], [0], [1], [0, 0, 1, 1], [], []>} : vector<16x2048xbf16>, vector<2048x32xbf16>, vector<16x32xf32> -> vector<16x32xf32>
    %c0_46 = arith.constant 0 : index
    %c0_47 = arith.constant 0 : index
    %c0_48 = arith.constant 0 : index
    %90 = vector.load %arg10[%c0_46, %c0_47, %c0_48] : memref<2x1x32xf32, #tpu.memory_space<vmem>>, vector<1x1x32xf32>
    %91 = vector.shape_cast %90 : vector<1x1x32xf32> to vector<1x32xf32>
    %92 = vector.broadcast %91 : vector<1x32xf32> to vector<16x32xf32>
    %93 = arith.addf %89, %92 : vector<16x32xf32>
    %94 = arith.addf %75, %93 : vector<16x32xf32>
    %c0_49 = arith.constant 0 : index
    %c0_50 = arith.constant 0 : index
    %c0_51 = arith.constant 0 : index
    %95 = vector.load %arg11[%c0_49, %c0_50, %c0_51] : memref<2x1x32xf32, #tpu.memory_space<vmem>>, vector<1x1x32xf32>
    %96 = vector.shape_cast %95 : vector<1x1x32xf32> to vector<1x32xf32>
    %c0_52 = arith.constant 0 : index
    %c0_53 = arith.constant 0 : index
    %c0_54 = arith.constant 0 : index
    %97 = vector.load %arg12[%c0_52, %c0_53, %c0_54] : memref<2x1x32xf32, #tpu.memory_space<vmem>>, vector<1x1x32xf32>
    %98 = vector.shape_cast %97 : vector<1x1x32xf32> to vector<1x32xf32>
    %cst_55 = arith.constant dense<0.000000e+00> : vector<16xf32>
    %99 = vector.multi_reduction <add>, %94, %cst_55 [1] : vector<16x32xf32> to vector<16xf32>
    %100 = vector.shape_cast %99 : vector<16xf32> to vector<16x1xf32>
    %cst_56 = arith.constant 3.200000e+01 : f32
    %101 = vector.broadcast %cst_56 : f32 to vector<16x1xf32>
    %102 = arith.divf %100, %101 : vector<16x1xf32>
    %103 = vector.broadcast %102 : vector<16x1xf32> to vector<16x32xf32>
    %104 = arith.subf %94, %103 : vector<16x32xf32>
    %105 = arith.mulf %104, %104 : vector<16x32xf32>
    %cst_57 = arith.constant dense<0.000000e+00> : vector<16xf32>
    %106 = vector.multi_reduction <add>, %105, %cst_57 [1] : vector<16x32xf32> to vector<16xf32>
    %107 = vector.shape_cast %106 : vector<16xf32> to vector<16x1xf32>
    %cst_58 = arith.constant 3.200000e+01 : f32
    %108 = vector.broadcast %cst_58 : f32 to vector<16x1xf32>
    %109 = arith.divf %107, %108 : vector<16x1xf32>
    %cst_59 = arith.constant 9.99999974E-6 : f32
    %110 = vector.broadcast %cst_59 : f32 to vector<16x1xf32>
    %111 = arith.addf %109, %110 : vector<16x1xf32>
    %112 = math.rsqrt %111 : vector<16x1xf32>
    %113 = vector.broadcast %112 : vector<16x1xf32> to vector<16x32xf32>
    %114 = arith.mulf %104, %113 : vector<16x32xf32>
    %115 = vector.broadcast %96 : vector<1x32xf32> to vector<16x32xf32>
    %116 = arith.mulf %114, %115 : vector<16x32xf32>
    %117 = vector.broadcast %98 : vector<1x32xf32> to vector<16x32xf32>
    %118 = arith.addf %116, %117 : vector<16x32xf32>
    %119 = vector.shape_cast %118 : vector<16x32xf32> to vector<2x8x32xf32>
    %120 = vector.shape_cast %119 : vector<2x8x32xf32> to vector<2x1x8x32xf32>
    %121 = vector.shape_cast %120 : vector<2x1x8x32xf32> to vector<2x1x8x32xf32>
    %122 = vector.broadcast %121 : vector<2x1x8x32xf32> to vector<2x4x8x32xf32>
    %123 = vector.shape_cast %122 : vector<2x4x8x32xf32> to vector<8x8x32xf32>
    %c1 = arith.constant 1 : index
    %c0_60 = arith.constant 0 : index
    %c0_61 = arith.constant 0 : index
    %c0_62 = arith.constant 0 : index
    %124 = vector.load %arg1[%c1, %c0_60, %c0_61, %c0_62] : memref<2x4x32x24xf32, #tpu.memory_space<vmem>>, vector<1x4x32x24xf32>
    %125 = vector.shape_cast %124 : vector<1x4x32x24xf32> to vector<4x32x24xf32>
    %126 = vector.shape_cast %125 : vector<4x32x24xf32> to vector<1x4x32x24xf32>
    %127 = vector.shape_cast %126 : vector<1x4x32x24xf32> to vector<1x4x32x24xf32>
    %128 = vector.broadcast %127 : vector<1x4x32x24xf32> to vector<2x4x32x24xf32>
    %129 = vector.shape_cast %128 : vector<2x4x32x24xf32> to vector<8x32x24xf32>
    %c1_63 = arith.constant 1 : index
    %c0_64 = arith.constant 0 : index
    %c0_65 = arith.constant 0 : index
    %c0_66 = arith.constant 0 : index
    %130 = vector.load %arg2[%c1_63, %c0_64, %c0_65, %c0_66] : memref<2x4x1x24xf32, #tpu.memory_space<vmem>>, vector<1x4x1x24xf32>
    %131 = vector.shape_cast %130 : vector<1x4x1x24xf32> to vector<4x1x24xf32>
    %132 = vector.shape_cast %131 : vector<4x1x24xf32> to vector<1x4x1x24xf32>
    %133 = vector.shape_cast %132 : vector<1x4x1x24xf32> to vector<1x4x1x24xf32>
    %134 = vector.broadcast %133 : vector<1x4x1x24xf32> to vector<2x4x1x24xf32>
    %135 = vector.shape_cast %134 : vector<2x4x1x24xf32> to vector<8x1x24xf32>
    %c1_67 = arith.constant 1 : index
    %c0_68 = arith.constant 0 : index
    %c0_69 = arith.constant 0 : index
    %c0_70 = arith.constant 0 : index
    %136 = vector.load %arg3[%c1_67, %c0_68, %c0_69, %c0_70] : memref<2x4x8x32xf32, #tpu.memory_space<vmem>>, vector<1x4x8x32xf32>
    %137 = vector.shape_cast %136 : vector<1x4x8x32xf32> to vector<4x8x32xf32>
    %138 = vector.shape_cast %137 : vector<4x8x32xf32> to vector<1x4x8x32xf32>
    %139 = vector.shape_cast %138 : vector<1x4x8x32xf32> to vector<1x4x8x32xf32>
    %140 = vector.broadcast %139 : vector<1x4x8x32xf32> to vector<2x4x8x32xf32>
    %141 = vector.shape_cast %140 : vector<2x4x8x32xf32> to vector<8x8x32xf32>
    "tpu.trace_start"() <{level = 10 : i32, message = "gsd,gde->gse"}> : () -> ()
    %cst_71 = arith.constant dense<0.000000e+00> : vector<8x8x24xf32>
    %142 = tpu.matmul %123, %129, %cst_71 {dimension_numbers = #tpu.dot_dimension_numbers<[2], [1], [1], [2], [0, 0, 0, 1, 1, 2], [0], [0]>} : vector<8x8x32xf32>, vector<8x32x24xf32>, vector<8x8x24xf32> -> vector<8x8x24xf32>
    "tpu.trace_stop"() : () -> ()
    %143 = vector.broadcast %135 : vector<8x1x24xf32> to vector<8x8x24xf32>
    %144 = arith.addf %142, %143 : vector<8x8x24xf32>
    %145 = vector.extract_strided_slice %144 {offsets = [0, 0, 0], sizes = [8, 8, 8], strides = [1, 1, 1]} : vector<8x8x24xf32> to vector<8x8x8xf32>
    %146 = vector.extract_strided_slice %144 {offsets = [0, 0, 8], sizes = [8, 8, 8], strides = [1, 1, 1]} : vector<8x8x24xf32> to vector<8x8x8xf32>
    %147 = vector.extract_strided_slice %144 {offsets = [0, 0, 16], sizes = [8, 8, 8], strides = [1, 1, 1]} : vector<8x8x24xf32> to vector<8x8x8xf32>
    "tpu.trace_start"() <{level = 10 : i32, message = "gqe,gke->gqk"}> : () -> ()
    %cst_72 = arith.constant dense<0.000000e+00> : vector<8x8x8xf32>
    %148 = tpu.matmul %145, %146, %cst_72 {dimension_numbers = #tpu.dot_dimension_numbers<[2], [2], [1], [1], [0, 0, 0, 1, 1, 1], [0], [0]>} : vector<8x8x8xf32>, vector<8x8x8xf32>, vector<8x8x8xf32> -> vector<8x8x8xf32>
    "tpu.trace_stop"() : () -> ()
    %cst_73 = arith.constant dense<0xFF800000> : vector<8x8xf32>
    %149 = vector.multi_reduction <maximumf>, %148, %cst_73 [2] : vector<8x8x8xf32> to vector<8x8xf32>
    %150 = vector.shape_cast %149 : vector<8x8xf32> to vector<8x8x1xf32>
    %151 = vector.broadcast %150 : vector<8x8x1xf32> to vector<8x8x8xf32>
    %152 = arith.subf %148, %151 : vector<8x8x8xf32>
    %153 = math.exp %152 : vector<8x8x8xf32>
    %cst_74 = arith.constant dense<0.000000e+00> : vector<8x8xf32>
    %154 = vector.multi_reduction <add>, %153, %cst_74 [2] : vector<8x8x8xf32> to vector<8x8xf32>
    %155 = vector.shape_cast %154 : vector<8x8xf32> to vector<8x8x1xf32>
    %156 = tpu.reciprocal %155 {approx = true} : vector<8x8x1xf32> -> vector<8x8x1xf32>
    %157 = vector.broadcast %156 : vector<8x8x1xf32> to vector<8x8x8xf32>
    %158 = arith.mulf %153, %157 : vector<8x8x8xf32>
    "tpu.trace_start"() <{level = 10 : i32, message = "gqk,gke->gqe"}> : () -> ()
    %cst_75 = arith.constant dense<0.000000e+00> : vector<8x8x8xf32>
    %159 = tpu.matmul %158, %147, %cst_75 {dimension_numbers = #tpu.dot_dimension_numbers<[2], [1], [1], [2], [0, 0, 0, 1, 1, 2], [0], [0]>} : vector<8x8x8xf32>, vector<8x8x8xf32>, vector<8x8x8xf32> -> vector<8x8x8xf32>
    "tpu.trace_stop"() : () -> ()
    "tpu.trace_start"() <{level = 10 : i32, message = "gse,ged->gsd"}> : () -> ()
    %cst_76 = arith.constant dense<0.000000e+00> : vector<8x8x32xf32>
    %160 = tpu.matmul %159, %141, %cst_76 {dimension_numbers = #tpu.dot_dimension_numbers<[2], [1], [1], [2], [0, 0, 0, 1, 1, 2], [0], [0]>} : vector<8x8x8xf32>, vector<8x8x32xf32>, vector<8x8x32xf32> -> vector<8x8x32xf32>
    "tpu.trace_stop"() : () -> ()
    %161 = vector.shape_cast %160 : vector<8x8x32xf32> to vector<2x4x8x32xf32>
    %cst_77 = arith.constant dense<0.000000e+00> : vector<2x8x32xf32>
    %162 = vector.multi_reduction <add>, %161, %cst_77 [1] : vector<2x4x8x32xf32> to vector<2x8x32xf32>
    %163 = vector.shape_cast %162 : vector<2x8x32xf32> to vector<16x32xf32>
    %c1_78 = arith.constant 1 : index
    %c0_79 = arith.constant 0 : index
    %c0_80 = arith.constant 0 : index
    %164 = vector.load %arg4[%c1_78, %c0_79, %c0_80] : memref<2x1x32xf32, #tpu.memory_space<vmem>>, vector<1x1x32xf32>
    %165 = vector.shape_cast %164 : vector<1x1x32xf32> to vector<1x32xf32>
    %166 = vector.broadcast %165 : vector<1x32xf32> to vector<16x32xf32>
    %167 = arith.addf %163, %166 : vector<16x32xf32>
    %168 = arith.addf %118, %167 : vector<16x32xf32>
    %c1_81 = arith.constant 1 : index
    %c0_82 = arith.constant 0 : index
    %c0_83 = arith.constant 0 : index
    %169 = vector.load %arg5[%c1_81, %c0_82, %c0_83] : memref<2x1x32xf32, #tpu.memory_space<vmem>>, vector<1x1x32xf32>
    %170 = vector.shape_cast %169 : vector<1x1x32xf32> to vector<1x32xf32>
    %c1_84 = arith.constant 1 : index
    %c0_85 = arith.constant 0 : index
    %c0_86 = arith.constant 0 : index
    %171 = vector.load %arg6[%c1_84, %c0_85, %c0_86] : memref<2x1x32xf32, #tpu.memory_space<vmem>>, vector<1x1x32xf32>
    %172 = vector.shape_cast %171 : vector<1x1x32xf32> to vector<1x32xf32>
    %cst_87 = arith.constant dense<0.000000e+00> : vector<16xf32>
    %173 = vector.multi_reduction <add>, %168, %cst_87 [1] : vector<16x32xf32> to vector<16xf32>
    %174 = vector.shape_cast %173 : vector<16xf32> to vector<16x1xf32>
    %cst_88 = arith.constant 3.200000e+01 : f32
    %175 = vector.broadcast %cst_88 : f32 to vector<16x1xf32>
    %176 = arith.divf %174, %175 : vector<16x1xf32>
    %177 = vector.broadcast %176 : vector<16x1xf32> to vector<16x32xf32>
    %178 = arith.subf %168, %177 : vector<16x32xf32>
    %179 = arith.mulf %178, %178 : vector<16x32xf32>
    %cst_89 = arith.constant dense<0.000000e+00> : vector<16xf32>
    %180 = vector.multi_reduction <add>, %179, %cst_89 [1] : vector<16x32xf32> to vector<16xf32>
    %181 = vector.shape_cast %180 : vector<16xf32> to vector<16x1xf32>
    %cst_90 = arith.constant 3.200000e+01 : f32
    %182 = vector.broadcast %cst_90 : f32 to vector<16x1xf32>
    %183 = arith.divf %181, %182 : vector<16x1xf32>
    %cst_91 = arith.constant 9.99999974E-6 : f32
    %184 = vector.broadcast %cst_91 : f32 to vector<16x1xf32>
    %185 = arith.addf %183, %184 : vector<16x1xf32>
    %186 = math.rsqrt %185 : vector<16x1xf32>
    %187 = vector.broadcast %186 : vector<16x1xf32> to vector<16x32xf32>
    %188 = arith.mulf %178, %187 : vector<16x32xf32>
    %189 = vector.broadcast %170 : vector<1x32xf32> to vector<16x32xf32>
    %190 = arith.mulf %188, %189 : vector<16x32xf32>
    %191 = vector.broadcast %172 : vector<1x32xf32> to vector<16x32xf32>
    %192 = arith.addf %190, %191 : vector<16x32xf32>
    %193 = arith.truncf %192 : vector<16x32xf32> to vector<16x32xbf16>
    %c1_92 = arith.constant 1 : index
    %c0_93 = arith.constant 0 : index
    %c0_94 = arith.constant 0 : index
    %194 = vector.load %arg7[%c1_92, %c0_93, %c0_94] : memref<2x32x2048xbf16, #tpu.memory_space<vmem>>, vector<1x32x2048xbf16>
    %195 = vector.shape_cast %194 : vector<1x32x2048xbf16> to vector<32x2048xbf16>
    %cst_95 = arith.constant dense<0.000000e+00> : vector<16x2048xf32>
    %196 = tpu.matmul %193, %195, %cst_95 {dimension_numbers = #tpu.dot_dimension_numbers<[1], [0], [0], [1], [0, 0, 1, 1], [], []>} : vector<16x32xbf16>, vector<32x2048xbf16>, vector<16x2048xf32> -> vector<16x2048xf32>
    %c1_96 = arith.constant 1 : index
    %c0_97 = arith.constant 0 : index
    %c0_98 = arith.constant 0 : index
    %197 = vector.load %arg8[%c1_96, %c0_97, %c0_98] : memref<2x1x2048xf32, #tpu.memory_space<vmem>>, vector<1x1x2048xf32>
    %198 = vector.shape_cast %197 : vector<1x1x2048xf32> to vector<1x2048xf32>
    %199 = vector.broadcast %198 : vector<1x2048xf32> to vector<16x2048xf32>
    %200 = arith.addf %196, %199 : vector<16x2048xf32>
    %cst_99 = arith.constant 0.000000e+00 : f32
    %201 = vector.broadcast %cst_99 : f32 to vector<16x2048xf32>
    %202 = arith.maximumf %200, %201 : vector<16x2048xf32>
    %203 = arith.truncf %202 : vector<16x2048xf32> to vector<16x2048xbf16>
    %c1_100 = arith.constant 1 : index
    %c0_101 = arith.constant 0 : index
    %c0_102 = arith.constant 0 : index
    %204 = vector.load %arg9[%c1_100, %c0_101, %c0_102] : memref<2x2048x32xbf16, #tpu.memory_space<vmem>>, vector<1x2048x32xbf16>
    %205 = vector.shape_cast %204 : vector<1x2048x32xbf16> to vector<2048x32xbf16>
    %cst_103 = arith.constant dense<0.000000e+00> : vector<16x32xf32>
    %206 = tpu.matmul %203, %205, %cst_103 {dimension_numbers = #tpu.dot_dimension_numbers<[1], [0], [0], [1], [0, 0, 1, 1], [], []>} : vector<16x2048xbf16>, vector<2048x32xbf16>, vector<16x32xf32> -> vector<16x32xf32>
    %c1_104 = arith.constant 1 : index
    %c0_105 = arith.constant 0 : index
    %c0_106 = arith.constant 0 : index
    %207 = vector.load %arg10[%c1_104, %c0_105, %c0_106] : memref<2x1x32xf32, #tpu.memory_space<vmem>>, vector<1x1x32xf32>
    %208 = vector.shape_cast %207 : vector<1x1x32xf32> to vector<1x32xf32>
    %209 = vector.broadcast %208 : vector<1x32xf32> to vector<16x32xf32>
    %210 = arith.addf %206, %209 : vector<16x32xf32>
    %211 = arith.addf %192, %210 : vector<16x32xf32>
    %c1_107 = arith.constant 1 : index
    %c0_108 = arith.constant 0 : index
    %c0_109 = arith.constant 0 : index
    %212 = vector.load %arg11[%c1_107, %c0_108, %c0_109] : memref<2x1x32xf32, #tpu.memory_space<vmem>>, vector<1x1x32xf32>
    %213 = vector.shape_cast %212 : vector<1x1x32xf32> to vector<1x32xf32>
    %c1_110 = arith.constant 1 : index
    %c0_111 = arith.constant 0 : index
    %c0_112 = arith.constant 0 : index
    %214 = vector.load %arg12[%c1_110, %c0_111, %c0_112] : memref<2x1x32xf32, #tpu.memory_space<vmem>>, vector<1x1x32xf32>
    %215 = vector.shape_cast %214 : vector<1x1x32xf32> to vector<1x32xf32>
    %cst_113 = arith.constant dense<0.000000e+00> : vector<16xf32>
    %216 = vector.multi_reduction <add>, %211, %cst_113 [1] : vector<16x32xf32> to vector<16xf32>
    %217 = vector.shape_cast %216 : vector<16xf32> to vector<16x1xf32>
    %cst_114 = arith.constant 3.200000e+01 : f32
    %218 = vector.broadcast %cst_114 : f32 to vector<16x1xf32>
    %219 = arith.divf %217, %218 : vector<16x1xf32>
    %220 = vector.broadcast %219 : vector<16x1xf32> to vector<16x32xf32>
    %221 = arith.subf %211, %220 : vector<16x32xf32>
    %222 = arith.mulf %221, %221 : vector<16x32xf32>
    %cst_115 = arith.constant dense<0.000000e+00> : vector<16xf32>
    %223 = vector.multi_reduction <add>, %222, %cst_115 [1] : vector<16x32xf32> to vector<16xf32>
    %224 = vector.shape_cast %223 : vector<16xf32> to vector<16x1xf32>
    %cst_116 = arith.constant 3.200000e+01 : f32
    %225 = vector.broadcast %cst_116 : f32 to vector<16x1xf32>
    %226 = arith.divf %224, %225 : vector<16x1xf32>
    %cst_117 = arith.constant 9.99999974E-6 : f32
    %227 = vector.broadcast %cst_117 : f32 to vector<16x1xf32>
    %228 = arith.addf %226, %227 : vector<16x1xf32>
    %229 = math.rsqrt %228 : vector<16x1xf32>
    %230 = vector.broadcast %229 : vector<16x1xf32> to vector<16x32xf32>
    %231 = arith.mulf %221, %230 : vector<16x32xf32>
    %232 = vector.broadcast %213 : vector<1x32xf32> to vector<16x32xf32>
    %233 = arith.mulf %231, %232 : vector<16x32xf32>
    %234 = vector.broadcast %215 : vector<1x32xf32> to vector<16x32xf32>
    %235 = arith.addf %233, %234 : vector<16x32xf32>
    %c0_118 = arith.constant 0 : index
    %c0_119 = arith.constant 0 : index
    %236 = vector.load %arg13[%c0_118, %c0_119] : memref<32x16xf32, #tpu.memory_space<vmem>>, vector<32x16xf32>
    %cst_120 = arith.constant dense<0.000000e+00> : vector<16x16xf32>
    %237 = tpu.matmul %235, %236, %cst_120 {dimension_numbers = #tpu.dot_dimension_numbers<[1], [0], [0], [1], [0, 0, 1, 1], [], []>} : vector<16x32xf32>, vector<32x16xf32>, vector<16x16xf32> -> vector<16x16xf32>
    %c0_121 = arith.constant 0 : index
    %c0_122 = arith.constant 0 : index
    %238 = vector.load %arg14[%c0_121, %c0_122] : memref<1x16xf32, #tpu.memory_space<vmem>>, vector<1x16xf32>
    %239 = vector.broadcast %238 : vector<1x16xf32> to vector<16x16xf32>
    %240 = arith.addf %237, %239 : vector<16x16xf32>
    %cst_123 = arith.constant 0.000000e+00 : f32
    %241 = vector.broadcast %cst_123 : f32 to vector<16x16xf32>
    %242 = arith.maximumf %240, %241 : vector<16x16xf32>
    %c0_124 = arith.constant 0 : index
    %c0_125 = arith.constant 0 : index
    %243 = vector.load %arg15[%c0_124, %c0_125] : memref<16x16xf32, #tpu.memory_space<vmem>>, vector<16x16xf32>
    %cst_126 = arith.constant dense<0.000000e+00> : vector<16x16xf32>
    %244 = tpu.matmul %242, %243, %cst_126 {dimension_numbers = #tpu.dot_dimension_numbers<[1], [0], [0], [1], [0, 0, 1, 1], [], []>} : vector<16x16xf32>, vector<16x16xf32>, vector<16x16xf32> -> vector<16x16xf32>
    %c0_127 = arith.constant 0 : index
    %c0_128 = arith.constant 0 : index
    %245 = vector.load %arg16[%c0_127, %c0_128] : memref<1x16xf32, #tpu.memory_space<vmem>>, vector<1x16xf32>
    %246 = vector.broadcast %245 : vector<1x16xf32> to vector<16x16xf32>
    %247 = arith.addf %244, %246 : vector<16x16xf32>
    %248 = vector.shape_cast %247 : vector<16x16xf32> to vector<2x8x16xf32>
    %c0_129 = arith.constant 0 : index
    %c0_130 = arith.constant 0 : index
    %c0_131 = arith.constant 0 : index
    %249 = vector.load %arg17[%c0_129, %c0_130, %c0_131] : memref<2x8x16xf32, #tpu.memory_space<vmem>>, vector<2x8x16xf32>
    tpu.vector_store %arg17[%c0_129, %c0_130, %c0_131], %248 {strides = array<i32>} : memref<2x8x16xf32, #tpu.memory_space<vmem>>, vector<2x8x16xf32>,
    return
  }
}

</mosaic_0001>

<bundles_post_ra>
// kernel: tpu_custom_call.1
= control target key start
LH: loop header
LB: loop body
LE: loop exit
PB: predicated region body
PF: predicated region fallthrough
CT: control target
= control target key end

     0   :  { %s13803_s0 = inlined_call_operand.vmem [shape: f32[2,8,32], index: 0, kind: input, shape index: {}]   ;;  %s13804_s1 = inlined_call_operand.vmem [shape: f32[2,4,32,24], index: 1, kind: input, shape index: {}]   ;;  %s13805_s2 = inlined_call_operand.vmem [shape: f32[2,4,1,24], index: 2, kind: input, shape index: {}]   ;;  %s13806_s3 = inlined_call_operand.vmem [shape: f32[2,4,8,32], index: 3, kind: input, shape index: {}]   ;;  %s13807_s4 = inlined_call_operand.vmem [shape: f32[2,1,32], index: 4, kind: input, shape index: {}]   ;;  %s13808_s5 = inlined_call_operand.vmem [shape: f32[2,1,32], index: 5, kind: input, shape index: {}]   ;;  %s13809_s6 = inlined_call_operand.vmem [shape: f32[2,1,32], index: 6, kind: input, shape index: {}]   ;;  %s13810_s7 = inlined_call_operand.vmem [shape: bf16[2,32,2048], index: 7, kind: input, shape index: {}]   ;;  %s13811_s8 = inlined_call_operand.vmem [shape: f32[2,1,2048], index: 8, kind: input, shape index: {}]   ;;  %s13812_s9 = inlined_call_operand.vmem [shape: bf16[2,2048,32], index: 9, kind: input, shape index: {}]   ;;  %s13813_s10 = inlined_call_operand.vmem [shape: f32[2,1,32], index: 10, kind: input, shape index: {}]   ;;  %s13814_s11 = inlined_call_operand.vmem [shape: f32[2,1,32], index: 11, kind: input, shape index: {}]   ;;  %s13815_s12 = inlined_call_operand.vmem [shape: f32[2,1,32], index: 12, kind: input, shape index: {}]   ;;  %s13816_s13 = inlined_call_operand.vmem [shape: f32[32,16], index: 13, kind: input, shape index: {}]   ;;  %s13817_s14 = inlined_call_operand.vmem [shape: f32[1,16], index: 14, kind: input, shape index: {}]   ;;  %s13818_s15 = inlined_call_operand.vmem [shape: f32[16,16], index: 15, kind: input, shape index: {}]   ;;  %s13819_s16 = inlined_call_operand.vmem [shape: f32[1,16], index: 16, kind: input, shape index: {}]   ;;  %s13820_s17 = inlined_call_operand.hbm [shape: f32[2,8,16], index: 17, kind: output, shape index: {}]  }
   0x1   :  { %13823 = sst [smem:[#allocation5_spill]] %s13803_s0 }
   0x2   :  { %13824 = sst [smem:[#allocation6_spill]] %s13804_s1 }
   0x3   :  { %s13825_s26 = sld [smem:[#allocation6_spill]]  ;;  %v11803_v3 = vmov 0.0|0.0   ;;  %vm11804_vm0 = vmmov 0   ;;  %v11805_v11 = vmov 0.0   ;;  %s13826_s19 = sld [smem:[#allocation5_spill]]  ;;  %vm108_vm1 = vcmask 261120  }
   0x4   :  { %11324 = vmatprep.subr.bf16.mxu0 %v11803_v3  ;;  %11330 = vmatprep.subr.bf16.mxu1 %v11803_v3 }
   0x5   :  { %10898 = vmatprep.mubr.msk.f32.mxu0 %vm11804_vm0, %v11805_v11  ;;  %10909 = vmatprep.mubr.msk.f32.mxu1 %vm11804_vm0, %v11805_v11 }
   0x9   :  { %v60_v0 = vld [vmem:[%s13825_s26] sm:$0xff]  ;;  %v61_v1 = vld [vmem:[%s13825_s26 + $0x8] sm:$0xff]  ;;  %v62_v6 = vld [vmem:[%s13825_s26 + $0x10] sm:$0xff] }
   0xa   :  { %v64_v2 = vld [vmem:[%s13825_s26 + $0x20] sm:$0xff]  ;;  %v11325_v4 = vpack.c.bf16 %v61_v1, %v60_v0  ;;  %v65_v5 = vld [vmem:[%s13825_s26 + $0x28] sm:$0xff]  ;;  %v63_v7 = vld [vmem:[%s13825_s26 + $0x18] sm:$0xff] }
   0xb   :  { %v11331_v8 = vpack.c.bf16 %v65_v5, %v64_v2  ;;  %v66_v9 = vld [vmem:[%s13825_s26 + $0x30] sm:$0xff]  ;;  %v67_v10 = vld [vmem:[%s13825_s26 + $0x38] sm:$0xff]  ;;  %v11328_v12 = vpack.c.bf16 %v63_v7, %v62_v6  ;;  %v68_v14 = vld [vmem:[%s13825_s26 + $0x40] sm:$0xff] }
   0xc   :  { %11326 = vmatpush3.bf16.msra.mxu0 %v11325_v4  ;;  %v11334_v13 = vpack.c.bf16 %v67_v10, %v66_v9  ;;  %v69_v15 = vld [vmem:[%s13825_s26 + $0x48] sm:$0xff]  ;;  %v58_v16 = vld [vmem:[%s13826_s19] sm:$0xff]  ;;  %v70_v19 = vld [vmem:[%s13825_s26 + $0x50] sm:$0xff] }
   0xd   :  { %11332 = vmatpush3.bf16.msra.mxu1 %v11331_v8  ;;  %11327 = vmatprep.subr.bf16.mxu0 %v11803_v3  ;;  %v72_v17 = vld [vmem:[%s13825_s26 + $0x60] sm:$0xff]  ;;  %v73_v18 = vld [vmem:[%s13825_s26 + $0x68] sm:$0xff]  ;;  %v71_v20 = vld [vmem:[%s13825_s26 + $0x58] sm:$0xff]  ;;  %v11337_v21 = vpack.c.bf16 %v69_v15, %v68_v14 }
   0xe   :  { %11333 = vmatprep.subr.bf16.mxu1 %v11803_v3  ;;  %v74_v22 = vld [vmem:[%s13825_s26 + $0x70] sm:$0xff]  ;;  %v75_v23 = vld [vmem:[%s13825_s26 + $0x78] sm:$0xff]  ;;  %v11343_v24 = vpack.c.bf16 %v73_v18, %v72_v17  ;;  %v11340_v25 = vpack.c.bf16 %v71_v20, %v70_v19  ;;  %v59_v27 = vld [vmem:[%s13826_s19 + $0x8] sm:$0xff] }
   0xf   :  { %v11346_v26 = vpack.c.bf16 %v75_v23, %v74_v22 }
  0x10   :  { %11329 = vmatpush3.bf16.msra.mxu0 %v11328_v12 }
  0x11   :  { %11335 = vmatpush3.bf16.msra.mxu1 %v11334_v13  ;;  %11336 = vmatprep.subr.bf16.mxu0 %v11803_v3 }
  0x12   :  { %11342 = vmatprep.subr.bf16.mxu1 %v11803_v3 }
  0x13   :  { %10899 = vmatmul.mubr.msk.f32.vlgmr.msra.gmra.mrb[0].mxu0 %vm108_vm1, %v58_v16 }
  0x14   :  { %10910 = vmatmul.mubr.msk.f32.vlgmr.msra.gmra.mrb[0].mxu1 %vm108_vm1, %v58_v16  ;;  %11338 = vmatpush3.bf16.msra.mxu0 %v11337_v21 }
  0x15   :  { %11344 = vmatpush3.bf16.msra.mxu1 %v11343_v24  ;;  %11339 = vmatprep.subr.bf16.mxu0 %v11803_v3 }
  0x16   :  { %11345 = vmatprep.subr.bf16.mxu1 %v11803_v3  ;;  %10920 = vmatprep.mubr.msk.f32.mxu0 %vm11804_vm0, %v11805_v11 }
  0x17   :  { %10931 = vmatprep.mubr.msk.f32.mxu1 %vm11804_vm0, %v11805_v11 }
  0x18   :  { %11341 = vmatpush3.bf16.msra.mxu0 %v11340_v25 }
  0x19   :  { %11347 = vmatpush3.bf16.msra.mxu1 %v11346_v26  ;;  %11348 = vmatprep.subr.bf16.mxu0 %v11803_v3 }
  0x1a   :  { %11354 = vmatprep.subr.bf16.mxu1 %v11803_v3 }
  0x1b   :  { %10921 = vmatmul.mubr.msk.f32.vlgmr.msra.gmra.mrb[2].mxu0 %vm108_vm1, %v58_v16 }
  0x1c   :  { %10932 = vmatmul.mubr.msk.f32.vlgmr.msra.gmra.mrb[2].mxu1 %vm108_vm1, %v58_v16  ;;  %11350 = vmatpush3.bf16.msra.mxu0 %v11325_v4 }
  0x1d   :  { %11356 = vmatpush3.bf16.msra.mxu1 %v11331_v8  ;;  %11351 = vmatprep.subr.bf16.mxu0 %v11803_v3 }
  0x1e   :  { %11357 = vmatprep.subr.bf16.mxu1 %v11803_v3  ;;  %10942 = vmatprep.mubr.msk.f32.mxu0 %vm11804_vm0, %v11805_v11 }
  0x1f   :  { %10953 = vmatprep.mubr.msk.f32.mxu1 %vm11804_vm0, %v11805_v11 }
  0x20   :  { %11353 = vmatpush3.bf16.msra.mxu0 %v11328_v12 }
  0x21   :  { %11359 = vmatpush3.bf16.msra.mxu1 %v11334_v13  ;;  %11360 = vmatprep.subr.bf16.mxu0 %v11803_v3 }
  0x22   :  { %11366 = vmatprep.subr.bf16.mxu1 %v11803_v3 }
  0x23   :  { %10943 = vmatmul.mubr.msk.f32.vlgmr.msra.gmra.mrb[4].mxu0 %vm108_vm1, %v59_v27 }
  0x24   :  { %10954 = vmatmul.mubr.msk.f32.vlgmr.msra.gmra.mrb[4].mxu1 %vm108_vm1, %v59_v27  ;;  %11362 = vmatpush3.bf16.msra.mxu0 %v11337_v21 }
  0x25   :  { %11368 = vmatpush3.bf16.msra.mxu1 %v11343_v24  ;;  %11363 = vmatprep.subr.bf16.mxu0 %v11803_v3 }
  0x26   :  { %11369 = vmatprep.subr.bf16.mxu1 %v11803_v3  ;;  %10964 = vmatprep.mubr.msk.f32.mxu0 %vm11804_vm0, %v11805_v11 }
  0x27   :  { %10975 = vmatprep.mubr.msk.f32.mxu1 %vm11804_vm0, %v11805_v11 }
  0x28   :  { %11365 = vmatpush3.bf16.msra.mxu0 %v11340_v25 }
  0x29   :  { %11371 = vmatpush3.bf16.msra.mxu1 %v11346_v26  ;;  %10978 = vmatprep.subr.mxu0 %v11805_v11 }
  0x2a   :  { %10983 = vmatprep.subr.mxu1 %v11805_v11 }
  0x2b   :  { %10965 = vmatmul.mubr.msk.f32.vlgmr.msra.gmra.mrb[6].mxu0 %vm108_vm1, %v59_v27 }
  0x2c   :  { %10976 = vmatmul.mubr.msk.f32.vlgmr.msra.gmra.mrb[6].mxu1 %vm108_vm1, %v59_v27  ;;  %10980 = vmatprep.mubr.msk.f32.mxu0 %vm11804_vm0, %v11805_v11 }
  0x2d   :  { %10985 = vmatprep.mubr.msk.f32.mxu1 %vm11804_vm0, %v11805_v11 }
  0x2e   :  { %22 = vsyncpa [#allocation3], 0  ;;  %v9590_v28 = vld [vmem:[%s13805_s2] ss:$0 sm:$0xff]  ;;  %v9591_v30 = vld [vmem:[%s13805_s2 + $0x1] ss:$0 sm:$0xff] }
  0x2f   :  { %s11806_s24 = smov 120   ;;  %v9592_v36 = vld [vmem:[%s13805_s2 + $0x2] ss:$0 sm:$0xff]  ;;  %v9593_v38 = vld [vmem:[%s13805_s2 + $0x3] ss:$0 sm:$0xff]  ;;  %vm678_vm2 = vcmask 64512  }
  0x30   :  { %s11807_s0 = smov 112   ;;  %vm9490_vm3 = vcmask 130048   ;;  %s11809_s29 = smov [#allocation2]  }
  0x31   :  { %s9579_s30 = sshll.u32 %s11809_s29, 4  ;;  %s9580_s30 = int_to_ptr.vmem [resolvable:$true] %s9579_s30 }
  0x32   :  { %p11784_p1 = scmp.lt.s32.totalorder %s9580_s30, %s9580_s30 }
  0xe6   :  { %v178_v29 = vpop.f32.mrb[0].mxu0 }
  0xe7   :  { %v12008_v31 = vadd.f32 %v9590_v28, %v178_v29  ;;  %v10900_v32 = vpop.f32.mrb[1].mxu0  ;;  %v248_v33 = vpop.f32.mrb[0].mxu1 }
  0xe8   :  { %v10911_v34 = vpop.f32.mrb[1].mxu1  ;;  %v12010_v35 = vadd.f32 %v9591_v30, %v248_v33 }
  0xe9   :  { %676 = vrot.lane.b32.xlu0 %v12008_v31, %s11806_s24 }
  0xed   :  { %754 = vrot.lane.b32.xlu0 %v12010_v35, %s11806_s24 }
  0xee   :  { %v318_v37 = vpop.f32.mrb[2].mxu0 }
  0xef   :  { %v12022_v39 = vadd.f32 %v9592_v36, %v318_v37  ;;  %v10922_v40 = vpop.f32.mrb[3].mxu0  ;;  %v388_v41 = vpop.f32.mrb[2].mxu1 }
  0xf0   :  { %v10933_v42 = vpop.f32.mrb[3].mxu1  ;;  %v12024_v43 = vadd.f32 %v9593_v38, %v388_v41 }
  0xf1   :  { %831 = vrot.lane.b32.xlu1 %v12022_v39, %s11806_s24 }
  0xf5   :  { %908 = vrot.lane.b32.xlu1 %v12024_v43, %s11806_s24 }
  0xf6   :  { %v461_v44 = vpop.f32.mrb[4].mxu0 }
  0xf7   :  { %v12030_v45 = vadd.f32 %v9590_v28, %v461_v44  ;;  %v531_v46 = vpop.f32.mrb[4].mxu1  ;;  %v10944_v47 = vpop.f32.mrb[5].mxu0 }
  0xf8   :  { %v12032_v48 = vadd.f32 %v9591_v30, %v531_v46  ;;  %v10955_v49 = vpop.f32.mrb[5].mxu1 }
  0xf9   :  { %985 = vrot.lane.b32.xlu0 %v12030_v45, %s11806_s24 }
  0xfa   :  { %1062 = vrot.lane.b32.xlu1 %v12032_v48, %s11806_s24 }
  0xfe   :  { %v601_v50 = vpop.f32.mrb[6].mxu0 }
  0xff   :  { %v12038_v51 = vadd.f32 %v9592_v36, %v601_v50  ;;  %v671_v52 = vpop.f32.mrb[6].mxu1  ;;  %v10966_v53 = vpop.f32.mrb[7].mxu0 }
 0x100   :  { %v12040_v54 = vadd.f32 %v9593_v38, %v671_v52  ;;  %v10977_v55 = vpop.f32.mrb[7].mxu1 }
 0x101   :  { %1139 = vrot.lane.b32.xlu0 %v12038_v51, %s11806_s24 }
 0x102   :  { %1216 = vrot.lane.b32.xlu1 %v12040_v54, %s11806_s24 }
 0x15b   :  { %v677_v56 = vpop.permute.xlu0 %676 }
 0x15c   :  { %10979 = vmatpush3.xpose.msk.msra.mxu0 %vm678_vm2, %v677_v56 }
 0x15d   :  { %10988 = vmatprep.subr.mxu0 %v11805_v11 }
 0x15f   :  { %10981 = vmatmul.mubr.msk.f32.vlgmr.msra.gmra.mrb[8].mxu0 %vm678_vm2, %v12008_v31  ;;  %v755_v57 = vpop.permute.xlu0 %754 }
 0x160   :  { %10984 = vmatpush3.xpose.msk.msra.mxu1 %vm678_vm2, %v755_v57  ;;  %10990 = vmatprep.mubr.msk.f32.mxu0 %vm11804_vm0, %v11805_v11 }
 0x161   :  { %10993 = vmatprep.subr.mxu1 %v11805_v11 }
 0x163   :  { %10986 = vmatmul.mubr.msk.f32.vlgmr.msra.gmra.mrb[8].mxu1 %vm678_vm2, %v12010_v35  ;;  %v832_v58 = vpop.permute.xlu1 %831 }
 0x164   :  { %10989 = vmatpush3.xpose.msk.msra.mxu0 %vm678_vm2, %v832_v58  ;;  %10995 = vmatprep.mubr.msk.f32.mxu1 %vm11804_vm0, %v11805_v11 }
 0x165   :  { %10998 = vmatprep.subr.mxu0 %v11805_v11 }
 0x167   :  { %10991 = vmatmul.mubr.msk.f32.vlgmr.msra.gmra.mrb[10].mxu0 %vm678_vm2, %v12022_v39  ;;  %v909_v59 = vpop.permute.xlu1 %908 }
 0x168   :  { %10994 = vmatpush3.xpose.msk.msra.mxu1 %vm678_vm2, %v909_v59  ;;  %11000 = vmatprep.mubr.msk.f32.mxu0 %vm11804_vm0, %v11805_v11 }
 0x169   :  { %11003 = vmatprep.subr.mxu1 %v11805_v11 }
 0x16b   :  { %10996 = vmatmul.mubr.msk.f32.vlgmr.msra.gmra.mrb[10].mxu1 %vm678_vm2, %v12024_v43  ;;  %v986_v60 = vpop.permute.xlu0 %985 }
 0x16c   :  { %v1063_v61 = vpop.permute.xlu1 %1062  ;;  %10999 = vmatpush3.xpose.msk.msra.mxu0 %vm678_vm2, %v986_v60  ;;  %11005 = vmatprep.mubr.msk.f32.mxu1 %vm11804_vm0, %v11805_v11 }
 0x16d   :  { %11004 = vmatpush3.xpose.msk.msra.mxu1 %vm678_vm2, %v1063_v61  ;;  %11008 = vmatprep.subr.mxu0 %v11805_v11 }
 0x16e   :  { %11013 = vmatprep.subr.mxu1 %v11805_v11 }
 0x16f   :  { %11001 = vmatmul.mubr.msk.f32.vlgmr.msra.gmra.mrb[12].mxu0 %vm678_vm2, %v12030_v45 }
 0x170   :  { %11006 = vmatmul.mubr.msk.f32.vlgmr.msra.gmra.mrb[12].mxu1 %vm678_vm2, %v12032_v48  ;;  %11010 = vmatprep.mubr.msk.f32.mxu0 %vm11804_vm0, %v11805_v11 }
 0x171   :  { %11015 = vmatprep.mubr.msk.f32.mxu1 %vm11804_vm0, %v11805_v11 }
 0x173   :  { %v1140_v62 = vpop.permute.xlu0 %1139 }
 0x174   :  { %v1217_v63 = vpop.permute.xlu1 %1216  ;;  %11009 = vmatpush3.xpose.msk.msra.mxu0 %vm678_vm2, %v1140_v62 }
 0x175   :  { %11014 = vmatpush3.xpose.msk.msra.mxu1 %vm678_vm2, %v1217_v63  ;;  %11018 = vmatprep.subr.mxu0 %v11805_v11 }
 0x176   :  { %11023 = vmatprep.subr.mxu1 %v11805_v11 }
 0x177   :  { %11011 = vmatmul.mubr.msk.f32.vlgmr.msra.gmra.mrb[14].mxu0 %vm678_vm2, %v12038_v51 }
 0x178   :  { %11016 = vmatmul.mubr.msk.f32.vlgmr.msra.gmra.mrb[14].mxu1 %vm678_vm2, %v12040_v54  ;;  %11020 = vmatprep.mubr.msk.f32.mxu0 %vm11804_vm0, %v11805_v11 }
 0x179   :  { %11025 = vmatprep.mubr.msk.f32.mxu1 %vm11804_vm0, %v11805_v11 }
 0x232   :  { %v749_v0 = vpop.f32.mrb[8].mxu0 }
 0x233   :  { %v10982_v1 = vpop.f32.mrb[9].mxu0  ;;  %v1292_v2 = vsel %vm678_vm2, %v749_v0, -inf }
 0x234   :  { %1293 = vmax.xlane.f32.xlu0 %v1292_v2 }
 0x236   :  { %v826_v4 = vpop.f32.mrb[8].mxu1 }
 0x237   :  { %v10987_v5 = vpop.f32.mrb[9].mxu1  ;;  %v1295_v6 = vsel %vm678_vm2, %v826_v4, -inf }
 0x238   :  { %1296 = vmax.xlane.f32.xlu1 %v1295_v6 }
 0x23a   :  { %v903_v7 = vpop.f32.mrb[10].mxu0 }
 0x23b   :  { %v10992_v8 = vpop.f32.mrb[11].mxu0  ;;  %v1298_v9 = vsel %vm678_vm2, %v903_v7, -inf }
 0x23c   :  { %1299 = vmax.xlane.f32.xlu0 %v1298_v9 }
 0x23e   :  { %v980_v10 = vpop.f32.mrb[10].mxu1 }
 0x23f   :  { %v10997_v12 = vpop.f32.mrb[11].mxu1  ;;  %v1301_v13 = vsel %vm678_vm2, %v980_v10, -inf }
 0x240   :  { %1302 = vmax.xlane.f32.xlu0 %v1301_v13 }
 0x242   :  { %v1057_v14 = vpop.f32.mrb[12].mxu0 }
 0x243   :  { %v1134_v15 = vpop.f32.mrb[12].mxu1  ;;  %v11002_v16 = vpop.f32.mrb[13].mxu0  ;;  %v1304_v17 = vsel %vm678_vm2, %v1057_v14, -inf }
 0x244   :  { %v11007_v18 = vpop.f32.mrb[13].mxu1  ;;  %v1307_v19 = vsel %vm678_vm2, %v1134_v15, -inf  ;;  %1305 = vmax.xlane.f32.xlu1 %v1304_v17 }
 0x245   :  { %1308 = vmax.xlane.f32.xlu0 %v1307_v19 }
 0x24a   :  { %v1211_v20 = vpop.f32.mrb[14].mxu0 }
 0x24b   :  { %v1288_v21 = vpop.f32.mrb[14].mxu1  ;;  %v11012_v22 = vpop.f32.mrb[15].mxu0  ;;  %v1310_v23 = vsel %vm678_vm2, %v1211_v20, -inf }
 0x24c   :  { %v11017_v24 = vpop.f32.mrb[15].mxu1  ;;  %v1313_v25 = vsel %vm678_vm2, %v1288_v21, -inf  ;;  %1311 = vmax.xlane.f32.xlu1 %v1310_v23 }
 0x24d   :  { %1314 = vmax.xlane.f32.xlu0 %v1313_v25 }
 0x25d   :  { %1380 = vrot.lane.b32.xlu1 %v12008_v31, %s11807_s0 }
 0x261   :  { %1532 = vrot.lane.b32.xlu1 %v12022_v39, %s11807_s0 }
 0x263   :  { %1456 = vrot.lane.b32.xlu0 %v12010_v35, %s11807_s0 }
 0x265   :  { %1608 = vrot.lane.b32.xlu1 %v12024_v43, %s11807_s0 }
 0x267   :  { %1684 = vrot.lane.b32.xlu0 %v12030_v45, %s11807_s0 }
 0x269   :  { %1760 = vrot.lane.b32.xlu1 %v12032_v48, %s11807_s0 }
 0x2c1   :  { %v1294_v26 = vpop.xlane.xlu0 %1293 }
 0x2c2   :  { %v1316_v27 = vsub.f32 %v749_v0, %v1294_v26 }
 0x2c4   :  { %v1324_v28 = vmul.f32 1.442695, %v1316_v27 }
 0x2c5   :  { %v1297_v29 = vpop.xlane.xlu1 %1296 }
 0x2c6   :  { %11697 = vpow2.f32 %v1324_v28  ;;  %v1317_v30 = vsub.f32 %v826_v4, %v1297_v29 }
 0x2c8   :  { %v1326_v31 = vmul.f32 1.442695, %v1317_v30 }
 0x2c9   :  { %v1300_v32 = vpop.xlane.xlu0 %1299 }
 0x2ca   :  { %11699 = vpow2.f32 %v1326_v31  ;;  %v1318_v33 = vsub.f32 %v903_v7, %v1300_v32 }
 0x2cc   :  { %v1328_v34 = vmul.f32 1.442695, %v1318_v33 }
 0x2cd   :  { %v1303_v35 = vpop.xlane.xlu0 %1302 }
 0x2ce   :  { %11701 = vpow2.f32 %v1328_v34  ;;  %v1319_v36 = vsub.f32 %v980_v10, %v1303_v35 }
 0x2d0   :  { %v11698_v37 = vpop.eup %11697  ;;  %v1330_v38 = vmul.f32 1.442695, %v1319_v36  ;;  %v80_v36 = vld [vmem:[%s13806_s3] sm:$0xff] }
 0x2d1   :  { %v1306_v39 = vpop.xlane.xlu1 %1305  ;;  %v1340_v40 = vsel %vm678_vm2, %v11698_v37, 0.0 }
 0x2d2   :  { %11703 = vpow2.f32 %v1330_v38  ;;  %v1309_v41 = vpop.xlane.xlu0 %1308  ;;  %v1320_v42 = vsub.f32 %v1057_v14, %v1306_v39  ;;  %1341 = vadd.xlane.f32.xlu1 %v1340_v40  ;;  %v82_v38 = vld [vmem:[%s13806_s3 + $0x10] sm:$0xff] }
 0x2d3   :  { %v1321_v43 = vsub.f32 %v1134_v15, %v1309_v41  ;;  %v83_v41 = vld [vmem:[%s13806_s3 + $0x18] sm:$0xff] }
 0x2d4   :  { %v11700_v44 = vpop.eup %11699  ;;  %v1332_v45 = vmul.f32 1.442695, %v1320_v42 }
 0x2d5   :  { %v1334_v46 = vmul.f32 1.442695, %v1321_v43  ;;  %v1343_v47 = vsel %vm678_vm2, %v11700_v44, 0.0 }
 0x2d6   :  { %11705 = vpow2.f32 %v1332_v45  ;;  %1344 = vadd.xlane.f32.xlu0 %v1343_v47 }
 0x2d7   :  { %11707 = vpow2.f32 %v1334_v46 }
 0x2d8   :  { %v11702_v48 = vpop.eup %11701 }
 0x2d9   :  { %v1312_v49 = vpop.xlane.xlu1 %1311  ;;  %v1346_v50 = vsel %vm678_vm2, %v11702_v48, 0.0 }
 0x2da   :  { %v1315_v52 = vpop.xlane.xlu0 %1314  ;;  %v1322_v53 = vsub.f32 %v1211_v20, %v1312_v49  ;;  %1347 = vadd.xlane.f32.xlu1 %v1346_v50 }
 0x2db   :  { %v1323_v55 = vsub.f32 %v1288_v21, %v1315_v52 }
 0x2dc   :  { %v11704_v56 = vpop.eup %11703  ;;  %v1336_v57 = vmul.f32 1.442695, %v1322_v53 }
 0x2dd   :  { %v1338_v58 = vmul.f32 1.442695, %v1323_v55  ;;  %v1381_v59 = vpop.permute.xlu1 %1380  ;;  %v1349_v60 = vsel %vm678_vm2, %v11704_v56, 0.0 }
 0x2de   :  { %11709 = vpow2.f32 %v1336_v57  ;;  %v1457_v61 = vpop.permute.xlu0 %1456  ;;  %1350 = vadd.xlane.f32.xlu0 %v1349_v60  ;;  %11019 = vmatpush3.msra.mxu0 %v1381_v59 }
 0x2df   :  { %11711 = vpow2.f32 %v1338_v58  ;;  %11024 = vmatpush3.msra.mxu1 %v1457_v61  ;;  %11028 = vmatprep.subr.mxu0 %v11805_v11 }
 0x2e0   :  { %v11706_v62 = vpop.eup %11705  ;;  %11033 = vmatprep.subr.mxu1 %v11805_v11 }
 0x2e1   :  { %v11708_v63 = vpop.eup %11707  ;;  %v1352_v0 = vsel %vm678_vm2, %v11706_v62, 0.0  ;;  %v1533_v7 = vpop.permute.xlu1 %1532 }
 0x2e2   :  { %v1355_v1 = vsel %vm678_vm2, %v11708_v63, 0.0  ;;  %1353 = vadd.xlane.f32.xlu1 %v1352_v0  ;;  %v1685_v10 = vpop.permute.xlu0 %1684 }
 0x2e3   :  { %1356 = vadd.xlane.f32.xlu0 %v1355_v1 }
 0x2e5   :  { %v1609_v8 = vpop.permute.xlu1 %1608 }
 0x2e8   :  { %v12122_v2 = vpop.eup %11709 }
 0x2e9   :  { %v12124_v4 = vpop.eup %11711  ;;  %v1358_v5 = vsel %vm678_vm2, %v12122_v2, 0.0  ;;  %v1761_v9 = vpop.permute.xlu1 %1760 }
 0x2ea   :  { %v1361_v6 = vsel %vm678_vm2, %v12124_v4, 0.0  ;;  %1359 = vadd.xlane.f32.xlu1 %v1358_v5 }
 0x2eb   :  { %1362 = vadd.xlane.f32.xlu0 %v1361_v6 }
 0x2fb   :  { %1912 = vrot.lane.b32.xlu1 %v12040_v54, %s11807_s0 }
 0x301   :  { %1836 = vrot.lane.b32.xlu0 %v12038_v51, %s11807_s0 }
 0x35f   :  { %v1342_v12 = vpop.xlane.xlu1 %1341 }
 0x360   :  { %11713 = vrcp.f32 %v1342_v12 }
 0x363   :  { %v1345_v13 = vpop.xlane.xlu0 %1344 }
 0x364   :  { %11715 = vrcp.f32 %v1345_v13 }
 0x367   :  { %v1348_v14 = vpop.xlane.xlu1 %1347 }
 0x368   :  { %11717 = vrcp.f32 %v1348_v14 }
 0x36a   :  { %v11714_v15 = vpop.eup %11713 }
 0x36b   :  { %v1372_v16 = vmul.f32 %v11714_v15, %v11698_v37  ;;  %v1351_v17 = vpop.xlane.xlu0 %1350  ;;  %v81_v37 = vld [vmem:[%s13806_s3 + $0x8] sm:$0xff] }
 0x36c   :  { %11719 = vrcp.f32 %v1351_v17 }
 0x36d   :  { %11021 = vmatmul.mubr.msk.f32.vlgmr.msra.gmra.mrb[16].mxu0 %vm678_vm2, %v1372_v16 }
 0x36e   :  { %v11716_v54 = vpop.eup %11715  ;;  %11029 = vmatpush3.msra.mxu0 %v1533_v7  ;;  %11030 = vmatprep.mubr.msk.f32.mxu0 %vm11804_vm0, %v11805_v11 }
 0x36f   :  { %v1373_v51 = vmul.f32 %v11716_v54, %v11700_v44  ;;  %v1354_v18 = vpop.xlane.xlu1 %1353  ;;  %11038 = vmatprep.subr.mxu0 %v11805_v11 }
 0x370   :  { %v1357_v19 = vpop.xlane.xlu0 %1356  ;;  %11721 = vrcp.f32 %v1354_v18 }
 0x371   :  { %11723 = vrcp.f32 %v1357_v19  ;;  %11026 = vmatmul.mubr.msk.f32.vlgmr.msra.gmra.mrb[16].mxu1 %vm678_vm2, %v1373_v51  ;;  %v11777_v51 = vld [vmem:[%s13826_s19] sm:$0xff] }
 0x372   :  { %v11718_v20 = vpop.eup %11717  ;;  %11034 = vmatpush3.msra.mxu1 %v1609_v8  ;;  %11035 = vmatprep.mubr.msk.f32.mxu1 %vm11804_vm0, %v11805_v11  ;;  %v9634_v8 = vld [vmem:[%s13807_s4] ss:$0 sm:$0xff] }
 0x373   :  { %v1374_v21 = vmul.f32 %v11718_v20, %v11702_v48  ;;  %11043 = vmatprep.subr.mxu1 %v11805_v11 }
 0x375   :  { %11031 = vmatmul.mubr.msk.f32.vlgmr.msra.gmra.mrb[18].mxu0 %vm678_vm2, %v1374_v21 }
 0x376   :  { %v11720_v22 = vpop.eup %11719  ;;  %11039 = vmatpush3.msra.mxu0 %v1685_v10  ;;  %11040 = vmatprep.mubr.msk.f32.mxu0 %vm11804_vm0, %v11805_v11 }
 0x377   :  { %v1375_v23 = vmul.f32 %v11720_v22, %v11704_v56  ;;  %v1360_v24 = vpop.xlane.xlu1 %1359  ;;  %11048 = vmatprep.subr.mxu0 %v11805_v11 }
 0x378   :  { %v1363_v25 = vpop.xlane.xlu0 %1362  ;;  %11725 = vrcp.f32 %v1360_v24 }
 0x379   :  { %11727 = vrcp.f32 %v1363_v25  ;;  %11036 = vmatmul.mubr.msk.f32.vlgmr.msra.gmra.mrb[18].mxu1 %vm678_vm2, %v1375_v23 }
 0x37a   :  { %v11722_v26 = vpop.eup %11721  ;;  %11044 = vmatpush3.msra.mxu1 %v1761_v9  ;;  %11045 = vmatprep.mubr.msk.f32.mxu1 %vm11804_vm0, %v11805_v11 }
 0x37b   :  { %v11724_v27 = vpop.eup %11723  ;;  %v1376_v28 = vmul.f32 %v11722_v26, %v11706_v62  ;;  %11053 = vmatprep.subr.mxu1 %v11805_v11  ;;  %v1913_v31 = vpop.permute.xlu1 %1912 }
 0x37c   :  { %v1377_v29 = vmul.f32 %v11724_v27, %v11708_v63  ;;  %v1837_v30 = vpop.permute.xlu0 %1836 }
 0x37d   :  { %11041 = vmatmul.mubr.msk.f32.vlgmr.msra.gmra.mrb[20].mxu0 %vm678_vm2, %v1376_v28 }
 0x37e   :  { %11046 = vmatmul.mubr.msk.f32.vlgmr.msra.gmra.mrb[20].mxu1 %vm678_vm2, %v1377_v29  ;;  %11049 = vmatpush3.msra.mxu0 %v1837_v30  ;;  %v11778_v30 = vld [vmem:[%s13826_s19 + $0x8] sm:$0xff] }
 0x37f   :  { %11054 = vmatpush3.msra.mxu1 %v1913_v31  ;;  %11050 = vmatprep.mubr.msk.f32.mxu0 %vm11804_vm0, %v11805_v11 }
 0x380   :  { %11055 = vmatprep.mubr.msk.f32.mxu1 %vm11804_vm0, %v11805_v11  ;;  %11058 = vmatprep.subr.mxu0 %v11805_v11 }
 0x381   :  { %11063 = vmatprep.subr.mxu1 %v11805_v11 }
 0x382   :  { %v11726_v32 = vpop.eup %11725 }
 0x383   :  { %v11728_v33 = vpop.eup %11727  ;;  %v1378_v34 = vmul.f32 %v11726_v32, %v12122_v2 }
 0x384   :  { %v1379_v35 = vmul.f32 %v11728_v33, %v12124_v4 }
 0x385   :  { %11051 = vmatmul.mubr.msk.f32.vlgmr.msra.gmra.mrb[22].mxu0 %vm678_vm2, %v1378_v34 }
 0x386   :  { %11056 = vmatmul.mubr.msk.f32.vlgmr.msra.gmra.mrb[22].mxu1 %vm678_vm2, %v1379_v35  ;;  %11060 = vmatprep.mubr.msk.f32.mxu0 %vm11804_vm0, %v11805_v11 }
 0x387   :  { %11065 = vmatprep.mubr.msk.f32.mxu1 %vm11804_vm0, %v11805_v11  ;;  %11059 = vmatpush3.msra.mxu0 %v80_v36 }
 0x388   :  { %11068 = vmatprep.subr.mxu0 %v11805_v11  ;;  %11064 = vmatpush3.msra.mxu1 %v81_v37 }
 0x389   :  { %11073 = vmatprep.subr.mxu1 %v11805_v11 }
 0x440   :  { %v1452_v39 = vpop.f32.mrb[16].mxu0 }
 0x441   :  { %v11022_v40 = vpop.f32.mrb[17].mxu0  ;;  %11061 = vmatmul.mubr.msk.f32.vlgmr.msra.gmra.mrb[24].mxu0 %vm678_vm2, %v1452_v39 }
 0x442   :  { %11069 = vmatpush3.msra.mxu0 %v82_v38  ;;  %11070 = vmatprep.mubr.msk.f32.mxu0 %vm11804_vm0, %v11805_v11 }
 0x443   :  { %11078 = vmatprep.subr.mxu0 %v11805_v11 }
 0x444   :  { %v1528_v42 = vpop.f32.mrb[16].mxu1 }
 0x445   :  { %v11027_v43 = vpop.f32.mrb[17].mxu1  ;;  %11066 = vmatmul.mubr.msk.f32.vlgmr.msra.gmra.mrb[24].mxu1 %vm678_vm2, %v1528_v42 }
 0x446   :  { %11074 = vmatpush3.msra.mxu1 %v83_v41  ;;  %11075 = vmatprep.mubr.msk.f32.mxu1 %vm11804_vm0, %v11805_v11  ;;  %v2643_v43 = vld [vmem:[%s13810_s7] sm:$0xff] }
 0x447   :  { %11083 = vmatprep.subr.mxu1 %v11805_v11 }
 0x448   :  { %v1604_v44 = vpop.f32.mrb[18].mxu0 }
 0x449   :  { %v11032_v45 = vpop.f32.mrb[19].mxu0  ;;  %11071 = vmatmul.mubr.msk.f32.vlgmr.msra.gmra.mrb[26].mxu0 %vm678_vm2, %v1604_v44  ;;  %v2651_v44 = vld [vmem:[%s13810_s7 + $0x40] sm:$0xff] }
 0x44a   :  { %11079 = vmatpush3.msra.mxu0 %v80_v36  ;;  %11080 = vmatprep.mubr.msk.f32.mxu0 %vm11804_vm0, %v11805_v11  ;;  %v2644_v45 = vld [vmem:[%s13810_s7 + $0x8] sm:$0xff] }
 0x44b   :  { %11088 = vmatprep.subr.mxu0 %v11805_v11 }
 0x44c   :  { %v1680_v46 = vpop.f32.mrb[18].mxu1 }
 0x44d   :  { %v11037_v47 = vpop.f32.mrb[19].mxu1  ;;  %11076 = vmatmul.mubr.msk.f32.vlgmr.msra.gmra.mrb[26].mxu1 %vm678_vm2, %v1680_v46  ;;  %v9638_v46 = vcombine.high %v2643_v43, %v2651_v44 }
 0x44e   :  { %11084 = vmatpush3.msra.mxu1 %v81_v37  ;;  %11085 = vmatprep.mubr.msk.f32.mxu1 %vm11804_vm0, %v11805_v11  ;;  %v2652_v47 = vld [vmem:[%s13810_s7 + $0x48] sm:$0xff] }
 0x44f   :  { %11093 = vmatprep.subr.mxu1 %v11805_v11 }
 0x450   :  { %v1756_v48 = vpop.f32.mrb[20].mxu0 }
 0x451   :  { %v1832_v49 = vpop.f32.mrb[20].mxu1  ;;  %v11042_v50 = vpop.f32.mrb[21].mxu0  ;;  %11081 = vmatmul.mubr.msk.f32.vlgmr.msra.gmra.mrb[28].mxu0 %vm678_vm2, %v1756_v48  ;;  %v9637_v48 = vcombine.low %v2643_v43, %v2651_v44 }
 0x452   :  { %v11047_v52 = vpop.f32.mrb[21].mxu1  ;;  %11086 = vmatmul.mubr.msk.f32.vlgmr.msra.gmra.mrb[28].mxu1 %vm678_vm2, %v1832_v49  ;;  %11089 = vmatpush3.msra.mxu0 %v82_v38  ;;  %v9639_v49 = vcombine.low %v2644_v45, %v2652_v47  ;;  %v9640_v50 = vcombine.high %v2644_v45, %v2652_v47  ;;  %v2649_v45 = vld [vmem:[%s13810_s7 + $0x30] sm:$0xff]  ;;  %v2650_v47 = vld [vmem:[%s13810_s7 + $0x38] sm:$0xff] }
 0x453   :  { %11090 = vmatprep.mubr.msk.f32.mxu0 %vm11804_vm0, %v11805_v11  ;;  %11094 = vmatpush3.msra.mxu1 %v83_v41  ;;  %v2659_v52 = vld [vmem:[%s13810_s7 + $0x80] sm:$0xff] }
 0x454   :  { %11095 = vmatprep.mubr.msk.f32.mxu1 %vm11804_vm0, %v11805_v11  ;;  %2922 = vmatprep.subr.bf16.mxu0 %v9638_v46  ;;  %v2657_v46 = vld [vmem:[%s13810_s7 + $0x70] sm:$0xff] }
 0x455   :  { %2965 = vmatprep.subr.bf16.mxu1 %v9640_v50 }
 0x458   :  { %v1908_v53 = vpop.f32.mrb[22].mxu0 }
 0x459   :  { %v1984_v55 = vpop.f32.mrb[22].mxu1  ;;  %v11052_v56 = vpop.f32.mrb[23].mxu0  ;;  %11091 = vmatmul.mubr.msk.f32.vlgmr.msra.gmra.mrb[30].mxu0 %vm678_vm2, %v1908_v53  ;;  %v2667_v53 = vld [vmem:[%s13810_s7 + $0xc0] sm:$0xff] }
 0x45a   :  { %v11057_v57 = vpop.f32.mrb[23].mxu1  ;;  %11096 = vmatmul.mubr.msk.f32.vlgmr.msra.gmra.mrb[30].mxu1 %vm678_vm2, %v1984_v55  ;;  %2923 = vmatpush1.bf16.msra.mxu0 %v9637_v48  ;;  %v2660_v55 = vld [vmem:[%s13810_s7 + $0x88] sm:$0xff]  ;;  %v9654_v56 = vcombine.high %v2659_v52, %v2667_v53  ;;  %v2658_v48 = vld [vmem:[%s13810_s7 + $0x78] sm:$0xff] }
 0x45b   :  { %2966 = vmatpush1.bf16.msra.mxu1 %v9639_v49  ;;  %v2668_v57 = vld [vmem:[%s13810_s7 + $0xc8] sm:$0xff] }
 0x45c   :  { %2924 = vmatprep.subr.bf16.mxu0 %v9654_v56  ;;  %v2673_v56 = vld [vmem:[%s13810_s7 + $0xf0] sm:$0xff] }
 0x514   :  { %v2057_v58 = vpop.f32.mrb[24].mxu0 }
 0x515   :  { %v11062_v59 = vpop.f32.mrb[25].mxu0  ;;  %v2572_v61 = vsel %vm108_vm1, %v2057_v58, 0.0  ;;  %v9653_v58 = vcombine.low %v2659_v52, %v2667_v53  ;;  %v9650_v52 = vcombine.high %v2649_v45, %v2657_v46  ;;  %v9652_v53 = vcombine.high %v2650_v47, %v2658_v48 }
 0x516   :  { %v9655_v59 = vcombine.low %v2660_v55, %v2668_v57 }
 0x517   :  { %2925 = vmatpush1.bf16.msra.mxu0 %v9653_v58  ;;  %v2674_v58 = vld [vmem:[%s13810_s7 + $0xf8] sm:$0xff] }
 0x518   :  { %v2130_v60 = vpop.f32.mrb[24].mxu1 }
 0x519   :  { %v2573_v62 = vsel %vm108_vm1, %v2130_v60, 0.0  ;;  %v11067_v63 = vpop.f32.mrb[25].mxu1  ;;  %v9656_v60 = vcombine.high %v2660_v55, %v2668_v57  ;;  %v2665_v55 = vld [vmem:[%s13810_s7 + $0xb0] sm:$0xff]  ;;  %v2666_v57 = vld [vmem:[%s13810_s7 + $0xb8] sm:$0xff] }
 0x51a   :  { %v2574_v0 = vadd.f32 %v2573_v62, %v2572_v61  ;;  %v2645_v61 = vld [vmem:[%s13810_s7 + $0x10] sm:$0xff]  ;;  %v2646_v63 = vld [vmem:[%s13810_s7 + $0x18] sm:$0xff] }
 0x51b   :  { %2967 = vmatprep.subr.bf16.mxu1 %v9656_v60  ;;  %v2653_v62 = vld [vmem:[%s13810_s7 + $0x50] sm:$0xff]  ;;  %v9651_v60 = vcombine.low %v2650_v47, %v2658_v48 }
 0x51c   :  { %v2203_v1 = vpop.f32.mrb[26].mxu0  ;;  %2968 = vmatpush1.bf16.msra.mxu1 %v9655_v59  ;;  %v9649_v59 = vcombine.low %v2649_v45, %v2657_v46 }
 0x51d   :  { %v2575_v2 = vsel %vm108_vm1, %v2203_v1, 0.0  ;;  %v11072_v4 = vpop.f32.mrb[27].mxu0  ;;  %v9641_v1 = vcombine.low %v2645_v61, %v2653_v62 }
 0x51e   :  { %v2576_v5 = vadd.f32 %v2575_v2, %v2574_v0  ;;  %v11808_v0 = vmov 0   ;;  %v9642_v2 = vcombine.high %v2645_v61, %v2653_v62  ;;  %v2654_v4 = vld [vmem:[%s13810_s7 + $0x58] sm:$0xff]  ;;  %v9666_v61 = vcombine.high %v2665_v55, %v2673_v56 }
 0x51f   :  { %2954 = vmatprep.mubr.bf16.mxu0 %v11808_v0  ;;  %2997 = vmatprep.mubr.bf16.mxu1 %v11808_v0  ;;  %v9668_v62 = vcombine.high %v2666_v57, %v2674_v58 }
 0x520   :  { %v2276_v6 = vpop.f32.mrb[26].mxu1  ;;  %3008 = vmatprep.subr.bf16.mxu0 %v9642_v2  ;;  %v11441_v2 = vld [vmem:[%s13812_s9 + $0x40] sm:$0xff]  }
 0x521   :  { %v2577_v7 = vsel %vm108_vm1, %v2276_v6, 0.0  ;;  %v11077_v9 = vpop.f32.mrb[27].mxu1  ;;  %v9644_v6 = vcombine.high %v2646_v63, %v2654_v4 }
 0x522   :  { %v2578_v10 = vadd.f32 %v2577_v7, %v2576_v5  ;;  %v9643_v5 = vcombine.low %v2646_v63, %v2654_v4  ;;  %v9665_v63 = vcombine.low %v2665_v55, %v2673_v56  ;;  %v11442_v4 = vld [vmem:[%s13812_s9 + $0xc0] sm:$0xff]  }
 0x523   :  { %3051 = vmatprep.subr.bf16.mxu1 %v9644_v6  ;;  %v11444_v6 = vld [vmem:[%s13812_s9 + $0x80] sm:$0xff]  }
 0x524   :  { %v2593_v12 = vadd.f32 %v9634_v8, %v2578_v10  ;;  %v2349_v13 = vpop.f32.mrb[28].mxu0 }
 0x525   :  { %v2579_v14 = vsel %vm108_vm1, %v2349_v13, 0.0  ;;  %v2422_v15 = vpop.f32.mrb[28].mxu1  ;;  %v11082_v16 = vpop.f32.mrb[29].mxu0 }
 0x526   :  { %v2580_v17 = vsel %vm108_vm1, %v2422_v15, 0.0  ;;  %v11087_v54 = vpop.f32.mrb[29].mxu1  ;;  %v2595_v18 = vadd.f32 %v11777_v51, %v2593_v12  ;;  %v9635_v16 = vld [vmem:[%s13808_s5] ss:$0 sm:$0xff] }
 0x527   :  { %v2581_v19 = vadd.f32 %v2580_v17, %v2579_v14 }
 0x528   :  { %v2599_v20 = vsel %vm108_vm1, %v2595_v18, 0.0 }
 0x529   :  { %2600 = vadd.xlane.f32.xlu0 %v2599_v20  ;;  %v2661_v20 = vld [vmem:[%s13810_s7 + $0x90] sm:$0xff] }
 0x52c   :  { %v2495_v21 = vpop.f32.mrb[30].mxu0 }
 0x52d   :  { %v2582_v22 = vsel %vm108_vm1, %v2495_v21, 0.0  ;;  %v2568_v23 = vpop.f32.mrb[30].mxu1  ;;  %v11092_v24 = vpop.f32.mrb[31].mxu0  ;;  %v2669_v21 = vld [vmem:[%s13810_s7 + $0xd0] sm:$0xff] }
 0x52e   :  { %v2583_v25 = vadd.f32 %v2582_v22, %v2581_v19  ;;  %v11097_v26 = vpop.f32.mrb[31].mxu1  ;;  %v2584_v27 = vsel %vm108_vm1, %v2568_v23, 0.0  ;;  %v2662_v22 = vld [vmem:[%s13810_s7 + $0x98] sm:$0xff] }
 0x52f   :  { %v2670_v23 = vld [vmem:[%s13810_s7 + $0xd8] sm:$0xff] }
 0x530   :  { %v2585_v28 = vadd.f32 %v2584_v27, %v2583_v25  ;;  %v9658_v27 = vcombine.high %v2661_v20, %v2669_v21 }
 0x532   :  { %v2594_v29 = vadd.f32 %v9634_v8, %v2585_v28  ;;  %v9660_v28 = vcombine.high %v2662_v22, %v2670_v23 }
 0x534   :  { %v2596_v31 = vadd.f32 %v11778_v30, %v2594_v29  ;;  %v2647_v29 = vld [vmem:[%s13810_s7 + $0x20] sm:$0xff] }
 0x535   :  { %v2655_v30 = vld [vmem:[%s13810_s7 + $0x60] sm:$0xff] }
 0x536   :  { %v2602_v32 = vsel %vm108_vm1, %v2596_v31, 0.0 }
 0x537   :  { %2603 = vadd.xlane.f32.xlu1 %v2602_v32  ;;  %v2656_v32 = vld [vmem:[%s13810_s7 + $0x68] sm:$0xff] }
 0x5b6   :  { %v2601_v33 = vpop.xlane.xlu0 %2600 }
 0x5b7   :  { %v2606_v34 = vmul.f32 0.03125, %v2601_v33  ;;  %v9657_v33 = vcombine.low %v2661_v20, %v2669_v21  ;;  %v11459_v20 = vld [vmem:[%s13812_s9 + $0x20] sm:$0xff]  }
 0x5b8   :  { %v11460_v21 = vld [vmem:[%s13812_s9 + $0xa0] sm:$0xff]  }
 0x5b9   :  { %v2608_v35 = vsub.f32 %v2595_v18, %v2606_v34  ;;  %v9636_v18 = vld [vmem:[%s13809_s6] ss:$0 sm:$0xff]  ;;  %v9659_v34 = vcombine.low %v2662_v22, %v2670_v23  ;;  %v11461_v22 = vld [vmem:[%s13812_s9 + $0x68] sm:$0xff]  }
 0x5ba   :  { %v11462_v23 = vld [vmem:[%s13812_s9 + $0xe8] sm:$0xff]  }
 0x5bb   :  { %v2610_v36 = vmul.f32 %v2608_v35, %v2608_v35 }
 0x5bd   :  { %v2612_v37 = vsel %vm108_vm1, %v2610_v36, 0.0 }
 0x5be   :  { %2613 = vadd.xlane.f32.xlu0 %v2612_v37  ;;  %v2663_v37 = vld [vmem:[%s13810_s7 + $0xa0] sm:$0xff] }
 0x5c4   :  { %v2604_v38 = vpop.xlane.xlu1 %2603 }
 0x5c5   :  { %v2607_v39 = vmul.f32 0.03125, %v2604_v38  ;;  %v2671_v38 = vld [vmem:[%s13810_s7 + $0xe0] sm:$0xff] }
 0x5c6   :  { %v9662_v43 = vcombine.high %v2663_v37, %v2671_v38  ;;  %v9661_v49 = vcombine.low %v2663_v37, %v2671_v38  ;;  %v11474_v37 = vld [vmem:[%s13812_s9 + $0x1c0] sm:$0xff]   ;;  %v2679_v38 = vlaneseq }
 0x5c7   :  { %v2609_v40 = vsub.f32 %v2596_v31, %v2607_v39  ;;  %v2648_v31 = vld [vmem:[%s13810_s7 + $0x28] sm:$0xff] }
 0x5c8   :  { %v9648_v36 = vcombine.high %v2648_v31, %v2656_v32  ;;  %v2664_v39 = vld [vmem:[%s13810_s7 + $0xa8] sm:$0xff] }
 0x5c9   :  { %v2611_v41 = vmul.f32 %v2609_v40, %v2609_v40 }
 0x5cb   :  { %v2615_v42 = vsel %vm108_vm1, %v2611_v41, 0.0  ;;  %v9645_v41 = vcombine.low %v2647_v29, %v2655_v30 }
 0x5cc   :  { %2616 = vadd.xlane.f32.xlu0 %v2615_v42  ;;  %v9647_v42 = vcombine.low %v2648_v31, %v2656_v32  ;;  %v11468_v31 = vld [vmem:[%s13812_s9 + $0xb0] sm:$0xff]   ;;  %v11469_v32 = vld [vmem:[%s13812_s9 + $0x78] sm:$0xff]  }
 0x64b   :  { %v2614_v7 = vpop.xlane.xlu0 %2613 }
 0x64c   :  { %v2618_v8 = vmul.f32 0.03125, %v2614_v7  ;;  %v11445_v7 = vld [vmem:[%s13812_s9 + $0x48] sm:$0xff]  }
 0x64e   :  { %v2620_v9 = vadd.f32 1e-05, %v2618_v8  ;;  %v11446_v8 = vld [vmem:[%s13812_s9 + $0xc8] sm:$0xff]  }
 0x650   :  { %11729 = vrsqrt.f32 %v2620_v9  ;;  %v11447_v9 = vld [vmem:[%s13812_s9 + $0x8] sm:$0xff]  }
 0x659   :  { %v2617_v10 = vpop.xlane.xlu0 %2616 }
 0x65a   :  { %v2619_v12 = vmul.f32 0.03125, %v2617_v10  ;;  %v11730_v14 = vpop.eup %11729  ;;  %v11448_v10 = vld [vmem:[%s13812_s9 + $0x88] sm:$0xff]  }
 0x65b   :  { %v2624_v15 = vmul.f32 %v11730_v14, %v2608_v35  ;;  %v9646_v35 = vcombine.high %v2647_v29, %v2655_v30  ;;  %v11451_v14 = vld [vmem:[%s13812_s9 + $0x10] sm:$0xff]  }
 0x65c   :  { %v2621_v13 = vadd.f32 1e-05, %v2619_v12  ;;  %v11449_v12 = vld [vmem:[%s13812_s9 + $0x50] sm:$0xff]  }
 0x65d   :  { %v2632_v54 = vmul.f32 %v9635_v16, %v2624_v15  ;;  %v11452_v15 = vld [vmem:[%s13812_s9 + $0x90] sm:$0xff]  }
 0x65e   :  { %11731 = vrsqrt.f32 %v2621_v13  ;;  %v11450_v13 = vld [vmem:[%s13812_s9 + $0xd0] sm:$0xff]  }
 0x65f   :  { %v12281_v24 = vadd.f32 %v9636_v18, %v2632_v54  ;;  %v11455_v54 = vld [vmem:[%s13812_s9 + $0x18] sm:$0xff]   ;;  %v11466_v29 = vld [vmem:[%s13812_s9 + $0xf0] sm:$0xff]  }
 0x660   :  { %v11467_v30 = vld [vmem:[%s13812_s9 + $0x30] sm:$0xff]  }
 0x668   :  { %v11732_v17 = vpop.eup %11731 }
 0x669   :  { %v2625_v51 = vmul.f32 %v11732_v17, %v2609_v40  ;;  %v2672_v40 = vld [vmem:[%s13810_s7 + $0xe8] sm:$0xff]  ;;  %v11454_v17 = vld [vmem:[%s13812_s9 + $0xd8] sm:$0xff]  }
 0x66a   :  { %v9664_v44 = vcombine.high %v2664_v39, %v2672_v40  ;;  %v9663_v50 = vcombine.low %v2664_v39, %v2672_v40  ;;  %v2680_v39 = vshrl.u32 %v2679_v38, 7 }
 0x66b   :  { %v2633_v19 = vmul.f32 %v9635_v16, %v2625_v51  ;;  %v11453_v16 = vld [vmem:[%s13812_s9 + $0x58] sm:$0xff]  }
 0x66c   :  { %v11456_v51 = vld [vmem:[%s13812_s9 + $0x98] sm:$0xff]   ;;  %v12461_v40 = vsub.s32 0, %v2680_v39  ;;  %v12480_v55 = vsub.s32 5, %v2680_v39  ;;  %v12482_v56 = vsub.s32 7, %v2680_v39 }
 0x66d   :  { %v12283_v25 = vadd.f32 %v9636_v18, %v2633_v19  ;;  %v11457_v18 = vld [vmem:[%s13812_s9 + $0x60] sm:$0xff]  }
 0x66e   :  { %v11458_v19 = vld [vmem:[%s13812_s9 + $0xe0] sm:$0xff]  }
 0x66f   :  { %v12287_v26 = vpack.c.bf16 %v12283_v25, %v12281_v24 }
 0x671   :  { %9669 = vmatmul.mubr.msk.bf16.vlgmr.msra.gmra.mrb[32].mxu0 %vm108_vm1, %v12287_v26  ;;  %9670 = vmatmul.mubr.msk.bf16.vlgmr.msra.gmra.mrb[32].mxu1 %vm108_vm1, %v12287_v26 }
 0x672   :  { %3009 = vmatpush1.bf16.msra.mxu0 %v9641_v1  ;;  %3052 = vmatpush1.bf16.msra.mxu1 %v9643_v5  ;;  %v9667_v1 = vcombine.low %v2666_v57, %v2674_v58  ;;  %v11443_v5 = vld [vmem:[%s13812_s9] sm:$0xff]  }
 0x673   :  { %3010 = vmatprep.subr.bf16.mxu0 %v9658_v27  ;;  %3053 = vmatprep.subr.bf16.mxu1 %v9660_v28  ;;  %v11464_v27 = vld [vmem:[%s13812_s9 + $0xa8] sm:$0xff]   ;;  %v11465_v28 = vld [vmem:[%s13812_s9 + $0x70] sm:$0xff]  }
 0x674   :  { %3040 = vmatprep.mubr.bf16.mxu0 %v11808_v0  ;;  %3083 = vmatprep.mubr.bf16.mxu1 %v11808_v0 }
 0x676   :  { %3011 = vmatpush1.bf16.msra.mxu0 %v9657_v33  ;;  %3054 = vmatpush1.bf16.msra.mxu1 %v9659_v34  ;;  %v11470_v33 = vld [vmem:[%s13812_s9 + $0xf8] sm:$0xff]  }
 0x677   :  { %3094 = vmatprep.subr.bf16.mxu0 %v9646_v35  ;;  %3137 = vmatprep.subr.bf16.mxu1 %v9648_v36  ;;  %v11471_v34 = vld [vmem:[%s13812_s9 + $0x38] sm:$0xff]   ;;  %v11473_v36 = vld [vmem:[%s13812_s9 + $0x140] sm:$0xff]  }
 0x678   :  { %v11472_v35 = vld [vmem:[%s13812_s9 + $0xb8] sm:$0xff]  }
 0x679   :  { %9671 = vmatmul.mubr.msk.bf16.vlgmr.msra.gmra.mrb[36].mxu0 %vm108_vm1, %v12287_v26  ;;  %9672 = vmatmul.mubr.msk.bf16.vlgmr.msra.gmra.mrb[36].mxu1 %vm108_vm1, %v12287_v26 }
 0x67a   :  { %3095 = vmatpush1.bf16.msra.mxu0 %v9645_v41  ;;  %3138 = vmatpush1.bf16.msra.mxu1 %v9647_v42  ;;  %v12463_v41 = vsub.s32 2, %v2680_v39  ;;  %v2675_v42 = vld [vmem:[%s13811_s8] sm:$0xff] }
 0x67b   :  { %3096 = vmatprep.subr.bf16.mxu0 %v9662_v43  ;;  %3139 = vmatprep.subr.bf16.mxu1 %v9664_v44  ;;  %v12468_v43 = vsub.s32 1, %v2680_v39  ;;  %v12470_v44 = vsub.s32 3, %v2680_v39  ;;  %v2682_v45 = vrot.slane %v2675_v42, %v12461_v40 }
 0x67c   :  { %3126 = vmatprep.mubr.bf16.mxu0 %v11808_v0  ;;  %3169 = vmatprep.mubr.bf16.mxu1 %v11808_v0  ;;  %v2690_v46 = vrot.slane %v2675_v42, %v12463_v41 }
 0x67d   :  { %v2686_v47 = vrot.slane %v2675_v42, %v12468_v43  ;;  %v2694_v48 = vrot.slane %v2675_v42, %v12470_v44 }
 0x67e   :  { %3097 = vmatpush1.bf16.msra.mxu0 %v9661_v49  ;;  %3140 = vmatpush1.bf16.msra.mxu1 %v9663_v50  ;;  %v12476_v49 = vsub.s32 4, %v2680_v39  ;;  %v12478_v50 = vsub.s32 6, %v2680_v39 }
 0x67f   :  { %3180 = vmatprep.subr.bf16.mxu0 %v9650_v52  ;;  %3223 = vmatprep.subr.bf16.mxu1 %v9652_v53 }
 0x681   :  { %9673 = vmatmul.mubr.msk.bf16.vlgmr.msra.gmra.mrb[40].mxu0 %vm108_vm1, %v12287_v26  ;;  %9674 = vmatmul.mubr.msk.bf16.vlgmr.msra.gmra.mrb[40].mxu1 %vm108_vm1, %v12287_v26 }
 0x682   :  { %3181 = vmatpush1.bf16.msra.mxu0 %v9649_v59  ;;  %3224 = vmatpush1.bf16.msra.mxu1 %v9651_v60 }
 0x683   :  { %3182 = vmatprep.subr.bf16.mxu0 %v9666_v61  ;;  %3225 = vmatprep.subr.bf16.mxu1 %v9668_v62 }
 0x684   :  { %3212 = vmatprep.mubr.bf16.mxu0 %v11808_v0  ;;  %3255 = vmatprep.mubr.bf16.mxu1 %v11808_v0 }
 0x686   :  { %3183 = vmatpush1.bf16.msra.mxu0 %v9665_v63  ;;  %3226 = vmatpush1.bf16.msra.mxu1 %v9667_v1 }
 0x687   :  { %10440 = vmatprep.subr.bf16.mxu0 %v11441_v2  ;;  %10462 = vmatprep.subr.bf16.mxu1 %v11442_v4 }
 0x689   :  { %9675 = vmatmul.mubr.msk.bf16.vlgmr.msra.gmra.mrb[44].mxu0 %vm108_vm1, %v12287_v26  ;;  %9676 = vmatmul.mubr.msk.bf16.vlgmr.msra.gmra.mrb[44].mxu1 %vm108_vm1, %v12287_v26  ;;  %v11463_v26 = vld [vmem:[%s13812_s9 + $0x28] sm:$0xff]  }
 0x68a   :  { %10441 = vmatpush3.bf16.msra.mxu0 %v11443_v5  ;;  %10463 = vmatpush3.bf16.msra.mxu1 %v11444_v6 }
 0x68b   :  { %10442 = vmatprep.subr.bf16.mxu0 %v11445_v7  ;;  %10464 = vmatprep.subr.bf16.mxu1 %v11446_v8  ;;  %v2698_v7 = vrot.slane %v2675_v42, %v12476_v49  ;;  %v2706_v8 = vrot.slane %v2675_v42, %v12478_v50 }
 0x68e   :  { %10443 = vmatpush3.bf16.msra.mxu0 %v11447_v9  ;;  %10465 = vmatpush3.bf16.msra.mxu1 %v11448_v10 }
 0x68f   :  { %10444 = vmatprep.subr.bf16.mxu0 %v11449_v12  ;;  %10466 = vmatprep.subr.bf16.mxu1 %v11450_v13  ;;  %v2702_v12 = vrot.slane %v2675_v42, %v12480_v55  ;;  %v2710_v13 = vrot.slane %v2675_v42, %v12482_v56 }
 0x692   :  { %10445 = vmatpush3.bf16.msra.mxu0 %v11451_v14  ;;  %10467 = vmatpush3.bf16.msra.mxu1 %v11452_v15 }
 0x693   :  { %10446 = vmatprep.subr.bf16.mxu0 %v11453_v16  ;;  %10468 = vmatprep.subr.bf16.mxu1 %v11454_v17 }
 0x696   :  { %10447 = vmatpush3.bf16.msra.mxu0 %v11455_v54  ;;  %10469 = vmatpush3.bf16.msra.mxu1 %v11456_v51 }
 0x697   :  { %10448 = vmatprep.subr.bf16.mxu0 %v11457_v18  ;;  %10470 = vmatprep.subr.bf16.mxu1 %v11458_v19 }
 0x69a   :  { %10449 = vmatpush3.bf16.msra.mxu0 %v11459_v20  ;;  %10471 = vmatpush3.bf16.msra.mxu1 %v11460_v21  ;;  %v12491_v20 = vld [vmem:[%s13811_s8 + $0x8] sm:$0xff] }
 0x69b   :  { %10450 = vmatprep.subr.bf16.mxu0 %v11461_v22  ;;  %10472 = vmatprep.subr.bf16.mxu1 %v11462_v23 }
 0x69e   :  { %10451 = vmatpush3.bf16.msra.mxu0 %v11463_v26  ;;  %10473 = vmatpush3.bf16.msra.mxu1 %v11464_v27 }
 0x69f   :  { %10452 = vmatprep.subr.bf16.mxu0 %v11465_v28  ;;  %10474 = vmatprep.subr.bf16.mxu1 %v11466_v29  ;;  %v11475_v29 = vld [vmem:[%s13812_s9 + $0x100] sm:$0xff]  }
 0x6a2   :  { %10453 = vmatpush3.bf16.msra.mxu0 %v11467_v30  ;;  %10475 = vmatpush3.bf16.msra.mxu1 %v11468_v31  ;;  %v11476_v30 = vld [vmem:[%s13812_s9 + $0x180] sm:$0xff]  }
 0x6a3   :  { %10454 = vmatprep.subr.bf16.mxu0 %v11469_v32  ;;  %10476 = vmatprep.subr.bf16.mxu1 %v11470_v33 }
 0x6a6   :  { %10455 = vmatpush3.bf16.msra.mxu0 %v11471_v34  ;;  %10477 = vmatpush3.bf16.msra.mxu1 %v11472_v35  ;;  %v11477_v35 = vld [vmem:[%s13812_s9 + $0x148] sm:$0xff]  }
 0x6a7   :  { %10484 = vmatprep.subr.bf16.mxu0 %v11473_v36  ;;  %10506 = vmatprep.subr.bf16.mxu1 %v11474_v37  ;;  %v11478_v36 = vld [vmem:[%s13812_s9 + $0x1c8] sm:$0xff]   ;;  %v2714_v37 = vrot.slane %v12491_v20, %v12461_v40 }
 0x744   :  { %v2956_v52 = vpop.f32.mrb[32].mxu0  ;;  %v2999_v53 = vpop.f32.mrb[32].mxu1 }
 0x745   :  { %v2957_v57 = vadd.f32 %v2956_v52, %v2682_v45  ;;  %v3000_v58 = vadd.f32 %v2999_v53, %v2690_v46  ;;  %v2958_v59 = vpop.f32.mrb[33].mxu0  ;;  %v3001_v60 = vpop.f32.mrb[33].mxu1 }
 0x746   :  { %v2959_v61 = vadd.f32 %v2958_v59, %v2686_v47  ;;  %v3002_v62 = vadd.f32 %v3001_v60, %v2694_v48  ;;  %v2960_v63 = vpop.f32.mrb[34].mxu0  ;;  %v3003_v1 = vpop.f32.mrb[34].mxu1  ;;  %v11479_v60 = vld [vmem:[%s13812_s9 + $0x108] sm:$0xff]  }
 0x747   :  { %v2961_v2 = vadd.f32 %v2960_v63, %v2682_v45  ;;  %v3004_v4 = vadd.f32 %v3003_v1, %v2690_v46  ;;  %v2962_v5 = vpop.f32.mrb[35].mxu0  ;;  %v3005_v6 = vpop.f32.mrb[35].mxu1  ;;  %v3266_v14 = vmax.f32 %v2957_v57, 0.0  ;;  %v3268_v15 = vmax.f32 %v3000_v58, 0.0 }
 0x748   :  { %v2963_v9 = vadd.f32 %v2962_v5, %v2686_v47  ;;  %v3006_v10 = vadd.f32 %v3005_v6, %v2694_v48  ;;  %v3267_v54 = vmax.f32 %v2959_v61, 0.0  ;;  %v3269_v51 = vmax.f32 %v3002_v62, 0.0  ;;  %v11480_v61 = vld [vmem:[%s13812_s9 + $0x188] sm:$0xff]   ;;  %v11481_v5 = vld [vmem:[%s13812_s9 + $0x150] sm:$0xff]  }
 0x749   :  { %v3282_v16 = vmax.f32 %v2961_v2, 0.0  ;;  %v3284_v17 = vmax.f32 %v3004_v4, 0.0  ;;  %v2722_v46 = vrot.slane %v12491_v20, %v12463_v41  ;;  %v2718_v57 = vrot.slane %v12491_v20, %v12468_v43  ;;  %v11482_v6 = vld [vmem:[%s13812_s9 + $0x1d0] sm:$0xff]  }
 0x74a   :  { %v3283_v18 = vmax.f32 %v2963_v9, 0.0  ;;  %v3285_v19 = vmax.f32 %v3006_v10, 0.0  ;;  %v2726_v62 = vrot.slane %v12491_v20, %v12470_v44 }
 0x74b   :  { %v3298_v21 = vpack.c.bf16 %v3282_v16, %v3266_v14  ;;  %v3300_v22 = vpack.c.bf16 %v3284_v17, %v3268_v15 }
 0x74c   :  { %v3299_v23 = vpack.c.bf16 %v3283_v18, %v3267_v54  ;;  %v3301_v26 = vpack.c.bf16 %v3285_v19, %v3269_v51  ;;  %v3042_v27 = vpop.f32.mrb[36].mxu0  ;;  %v3085_v28 = vpop.f32.mrb[36].mxu1  ;;  %v11483_v54 = vld [vmem:[%s13812_s9 + $0x110] sm:$0xff]  }
 0x74d   :  { %v3043_v31 = vadd.f32 %v3042_v27, %v2698_v7  ;;  %v3086_v32 = vadd.f32 %v3085_v28, %v2706_v8  ;;  %v3044_v33 = vpop.f32.mrb[37].mxu0  ;;  %v3087_v34 = vpop.f32.mrb[37].mxu1  ;;  %v11484_v51 = vld [vmem:[%s13812_s9 + $0x190] sm:$0xff]  }
 0x74e   :  { %v3045_v38 = vadd.f32 %v3044_v33, %v2702_v12  ;;  %v3088_v39 = vadd.f32 %v3087_v34, %v2710_v13  ;;  %v3046_v42 = vpop.f32.mrb[38].mxu0  ;;  %v3089_v45 = vpop.f32.mrb[38].mxu1  ;;  %4377 = vmatprep.mubr.bf16.mxu0 %v3299_v23  ;;  %4418 = vmatprep.mubr.bf16.mxu1 %v3301_v26  ;;  %v11485_v23 = vld [vmem:[%s13812_s9 + $0x158] sm:$0xff]  }
 0x74f   :  { %v3047_v47 = vadd.f32 %v3046_v42, %v2698_v7  ;;  %v3090_v48 = vadd.f32 %v3089_v45, %v2706_v8  ;;  %v3048_v52 = vpop.f32.mrb[39].mxu0  ;;  %v3091_v53 = vpop.f32.mrb[39].mxu1  ;;  %4378 = vmatmul.mubr.bf16.vlgmr.msra.gmra.mrb[48].mxu0 %v3298_v21  ;;  %4419 = vmatmul.mubr.bf16.vlgmr.msra.gmra.mrb[48].mxu1 %v3300_v22  ;;  %v3270_v63 = vmax.f32 %v3043_v31, 0.0  ;;  %v3272_v1 = vmax.f32 %v3086_v32, 0.0  ;;  %v11486_v26 = vld [vmem:[%s13812_s9 + $0x1d8] sm:$0xff]  }
 0x750   :  { %v3049_v58 = vadd.f32 %v3048_v52, %v2702_v12  ;;  %v3092_v59 = vadd.f32 %v3091_v53, %v2710_v13  ;;  %10485 = vmatpush3.bf16.msra.mxu0 %v11475_v29  ;;  %10507 = vmatpush3.bf16.msra.mxu1 %v11476_v30  ;;  %v3271_v7 = vmax.f32 %v3045_v38, 0.0  ;;  %v3273_v8 = vmax.f32 %v3088_v39, 0.0  ;;  %v11487_v45 = vld [vmem:[%s13812_s9 + $0x118] sm:$0xff]  }
 0x751   :  { %v3286_v2 = vmax.f32 %v3047_v47, 0.0  ;;  %v3288_v4 = vmax.f32 %v3090_v48, 0.0  ;;  %10486 = vmatprep.subr.bf16.mxu0 %v11477_v35  ;;  %10508 = vmatprep.subr.bf16.mxu1 %v11478_v36  ;;  %v2730_v31 = vrot.slane %v12491_v20, %v12476_v49  ;;  %v2738_v36 = vrot.slane %v12491_v20, %v12478_v50 }
 0x752   :  { %v3287_v9 = vmax.f32 %v3049_v58, 0.0  ;;  %v3289_v10 = vmax.f32 %v3092_v59, 0.0  ;;  %v2734_v38 = vrot.slane %v12491_v20, %v12480_v55  ;;  %v11490_v58 = vld [vmem:[%s13812_s9 + $0x1e0] sm:$0xff]  }
 0x753   :  { %v12525_v12 = vpack.c.bf16 %v3286_v2, %v3270_v63  ;;  %v12527_v13 = vpack.c.bf16 %v3288_v4, %v3272_v1 }
 0x754   :  { %v3303_v14 = vpack.c.bf16 %v3287_v9, %v3271_v7  ;;  %v3305_v15 = vpack.c.bf16 %v3289_v10, %v3273_v8  ;;  %10487 = vmatpush3.bf16.msra.mxu0 %v11479_v60  ;;  %10509 = vmatpush3.bf16.msra.mxu1 %v11480_v61  ;;  %v3128_v16 = vpop.f32.mrb[40].mxu0  ;;  %v3171_v17 = vpop.f32.mrb[40].mxu1  ;;  %v11492_v7 = vld [vmem:[%s13812_s9 + $0x1a0] sm:$0xff]  }
 0x755   :  { %v3129_v18 = vadd.f32 %v3128_v16, %v2714_v37  ;;  %v3172_v19 = vadd.f32 %v3171_v17, %v2722_v46  ;;  %v3130_v21 = vpop.f32.mrb[41].mxu0  ;;  %v3173_v22 = vpop.f32.mrb[41].mxu1  ;;  %10488 = vmatprep.subr.bf16.mxu0 %v11481_v5  ;;  %10510 = vmatprep.subr.bf16.mxu1 %v11482_v6  ;;  %v11491_v6 = vld [vmem:[%s13812_s9 + $0x120] sm:$0xff]   ;;  %v11494_v16 = vld [vmem:[%s13812_s9 + $0x1e8] sm:$0xff]  }
 0x756   :  { %v3131_v27 = vadd.f32 %v3130_v21, %v2718_v57  ;;  %v3174_v28 = vadd.f32 %v3173_v22, %v2726_v62  ;;  %v3132_v29 = vpop.f32.mrb[42].mxu0  ;;  %v3175_v30 = vpop.f32.mrb[42].mxu1  ;;  %4459 = vmatprep.mubr.bf16.mxu0 %v3303_v14  ;;  %4500 = vmatprep.mubr.bf16.mxu1 %v3305_v15  ;;  %v11493_v15 = vld [vmem:[%s13812_s9 + $0x168] sm:$0xff]  }
 0x757   :  { %v3133_v32 = vadd.f32 %v3132_v29, %v2714_v37  ;;  %v3176_v33 = vadd.f32 %v3175_v30, %v2722_v46  ;;  %v3134_v34 = vpop.f32.mrb[43].mxu0  ;;  %v3177_v35 = vpop.f32.mrb[43].mxu1  ;;  %v11488_v37 = vld [vmem:[%s13812_s9 + $0x198] sm:$0xff]   ;;  %v2742_v46 = vrot.slane %v12491_v20, %v12482_v56  ;;  %v3274_v47 = vmax.f32 %v3129_v18, 0.0  ;;  %v11496_v29 = vld [vmem:[%s13812_s9 + $0x1a8] sm:$0xff]  }
 0x758   :  { %v3135_v39 = vadd.f32 %v3134_v34, %v2718_v57  ;;  %v3178_v42 = vadd.f32 %v3177_v35, %v2726_v62  ;;  %10489 = vmatpush3.bf16.msra.mxu0 %v11483_v54  ;;  %10511 = vmatpush3.bf16.msra.mxu1 %v11484_v51  ;;  %v3276_v48 = vmax.f32 %v3172_v19, 0.0  ;;  %v11489_v57 = vld [vmem:[%s13812_s9 + $0x160] sm:$0xff]   ;;  %v3275_v59 = vmax.f32 %v3131_v27, 0.0  ;;  %v11498_v35 = vld [vmem:[%s13812_s9 + $0x1f0] sm:$0xff]  }
 0x759   :  { %v3290_v52 = vmax.f32 %v3133_v32, 0.0  ;;  %v3292_v53 = vmax.f32 %v3176_v33, 0.0  ;;  %10490 = vmatprep.subr.bf16.mxu0 %v11485_v23  ;;  %10512 = vmatprep.subr.bf16.mxu1 %v11486_v26  ;;  %v3277_v60 = vmax.f32 %v3174_v28, 0.0  ;;  %v11495_v28 = vld [vmem:[%s13812_s9 + $0x128] sm:$0xff]  }
 0x75a   :  { %v3291_v61 = vmax.f32 %v3135_v39, 0.0  ;;  %v3293_v62 = vmax.f32 %v3178_v42, 0.0 }
 0x75b   :  { %v12561_v63 = vpack.c.bf16 %v3290_v52, %v3274_v47  ;;  %v12563_v20 = vpack.c.bf16 %v3292_v53, %v3276_v48  ;;  %v11499_v48 = vld [vmem:[%s13812_s9 + $0x130] sm:$0xff]   ;;  %v11501_v53 = vld [vmem:[%s13812_s9 + $0x178] sm:$0xff]  }
 0x75c   :  { %v12565_v1 = vpack.c.bf16 %v3291_v61, %v3275_v59  ;;  %v12567_v2 = vpack.c.bf16 %v3293_v62, %v3277_v60  ;;  %10491 = vmatpush3.bf16.msra.mxu0 %v11487_v45  ;;  %10513 = vmatpush3.bf16.msra.mxu1 %v11488_v37  ;;  %v3214_v4 = vpop.f32.mrb[44].mxu0  ;;  %v3257_v5 = vpop.f32.mrb[44].mxu1  ;;  %v11500_v52 = vld [vmem:[%s13812_s9 + $0x1b0] sm:$0xff]   ;;  %v11504_v59 = vld [vmem:[%s13812_s9 + $0x1b8] sm:$0xff]   ;;  %v11505_v60 = vld [vmem:[%s13812_s9 + $0x240] sm:$0xff]  }
 0x75d   :  { %v3215_v8 = vadd.f32 %v3214_v4, %v2730_v31  ;;  %v3258_v9 = vadd.f32 %v3257_v5, %v2738_v36  ;;  %v3216_v10 = vpop.f32.mrb[45].mxu0  ;;  %v3259_v14 = vpop.f32.mrb[45].mxu1  ;;  %10492 = vmatprep.subr.bf16.mxu0 %v11489_v57  ;;  %10514 = vmatprep.subr.bf16.mxu1 %v11490_v58  ;;  %v11502_v57 = vld [vmem:[%s13812_s9 + $0x1f8] sm:$0xff]   ;;  %v11506_v61 = vld [vmem:[%s13812_s9 + $0x2c0] sm:$0xff]   ;;  %v11509_v5 = vld [vmem:[%s13812_s9 + $0x248] sm:$0xff]  }
 0x75e   :  { %v3217_v17 = vadd.f32 %v3216_v10, %v2734_v38  ;;  %v3260_v54 = vadd.f32 %v3259_v14, %v2742_v46  ;;  %v3218_v51 = vpop.f32.mrb[46].mxu0  ;;  %v3261_v18 = vpop.f32.mrb[46].mxu1  ;;  %v11503_v58 = vld [vmem:[%s13812_s9 + $0x138] sm:$0xff]   ;;  %v11507_v62 = vld [vmem:[%s13812_s9 + $0x200] sm:$0xff]  }
 0x75f   :  { %v3219_v19 = vadd.f32 %v3218_v51, %v2730_v31  ;;  %v3262_v21 = vadd.f32 %v3261_v18, %v2738_v36  ;;  %v3220_v22 = vpop.f32.mrb[47].mxu0  ;;  %v3263_v23 = vpop.f32.mrb[47].mxu1  ;;  %v3278_v30 = vmax.f32 %v3215_v8, 0.0  ;;  %v3280_v32 = vmax.f32 %v3258_v9, 0.0  ;;  %v11497_v31 = vld [vmem:[%s13812_s9 + $0x170] sm:$0xff]   ;;  %v11508_v4 = vld [vmem:[%s13812_s9 + $0x280] sm:$0xff]  }
 0x760   :  { %v3221_v26 = vadd.f32 %v3220_v22, %v2734_v38  ;;  %v3264_v27 = vadd.f32 %v3263_v23, %v2742_v46  ;;  %10493 = vmatpush3.bf16.msra.mxu0 %v11491_v6  ;;  %10515 = vmatpush3.bf16.msra.mxu1 %v11492_v7  ;;  %v3279_v36 = vmax.f32 %v3217_v17, 0.0  ;;  %v3281_v38 = vmax.f32 %v3260_v54, 0.0  ;;  %v11510_v6 = vld [vmem:[%s13812_s9 + $0x2c8] sm:$0xff]   ;;  %v11517_v9 = vld [vmem:[%s13812_s9 + $0x258] sm:$0xff]   ;;  %v11522_v17 = vld [vmem:[%s13812_s9 + $0x2e0] sm:$0xff]  }
 0x761   :  { %v3294_v33 = vmax.f32 %v3219_v19, 0.0  ;;  %v3296_v34 = vmax.f32 %v3262_v21, 0.0  ;;  %10494 = vmatprep.subr.bf16.mxu0 %v11493_v15  ;;  %10516 = vmatprep.subr.bf16.mxu1 %v11494_v16  ;;  %v11511_v7 = vld [vmem:[%s13812_s9 + $0x208] sm:$0xff]   ;;  %v11518_v10 = vld [vmem:[%s13812_s9 + $0x2d8] sm:$0xff]   ;;  %v11521_v16 = vld [vmem:[%s13812_s9 + $0x260] sm:$0xff]  }
 0x762   :  { %v3295_v39 = vmax.f32 %v3221_v26, 0.0  ;;  %v3297_v42 = vmax.f32 %v3264_v27, 0.0  ;;  %v11512_v8 = vld [vmem:[%s13812_s9 + $0x288] sm:$0xff]   ;;  %v11519_v14 = vld [vmem:[%s13812_s9 + $0x218] sm:$0xff]   ;;  %v11523_v54 = vld [vmem:[%s13812_s9 + $0x220] sm:$0xff]  }
 0x763   :  { %v12593_v45 = vpack.c.bf16 %v3294_v33, %v3278_v30  ;;  %v12595_v37 = vpack.c.bf16 %v3296_v34, %v3280_v32  ;;  %v11520_v15 = vld [vmem:[%s13812_s9 + $0x298] sm:$0xff]   ;;  %v11524_v51 = vld [vmem:[%s13812_s9 + $0x2a0] sm:$0xff]   ;;  %v11525_v18 = vld [vmem:[%s13812_s9 + $0x268] sm:$0xff]  }
 0x764   :  { %v12597_v46 = vpack.c.bf16 %v3295_v39, %v3279_v36  ;;  %v12599_v47 = vpack.c.bf16 %v3297_v42, %v3281_v38  ;;  %10495 = vmatpush3.bf16.msra.mxu0 %v11495_v28  ;;  %10517 = vmatpush3.bf16.msra.mxu1 %v11496_v29  ;;  %v11526_v19 = vld [vmem:[%s13812_s9 + $0x2e8] sm:$0xff]   ;;  %v11529_v23 = vld [vmem:[%s13812_s9 + $0x270] sm:$0xff]   ;;  %v11533_v29 = vld [vmem:[%s13812_s9 + $0x278] sm:$0xff]  }
 0x765   :  { %10496 = vmatprep.subr.bf16.mxu0 %v11497_v31  ;;  %10518 = vmatprep.subr.bf16.mxu1 %v11498_v35  ;;  %v11527_v21 = vld [vmem:[%s13812_s9 + $0x228] sm:$0xff]   ;;  %v11530_v26 = vld [vmem:[%s13812_s9 + $0x2f0] sm:$0xff]   ;;  %v11534_v30 = vld [vmem:[%s13812_s9 + $0x2f8] sm:$0xff]  }
 0x766   :  { %v11528_v22 = vld [vmem:[%s13812_s9 + $0x2a8] sm:$0xff]   ;;  %v11531_v27 = vld [vmem:[%s13812_s9 + $0x230] sm:$0xff]   ;;  %v11535_v32 = vld [vmem:[%s13812_s9 + $0x238] sm:$0xff]  }
 0x767   :  { %v11532_v28 = vld [vmem:[%s13812_s9 + $0x2b0] sm:$0xff]   ;;  %v11536_v33 = vld [vmem:[%s13812_s9 + $0x2b8] sm:$0xff]   ;;  %v11537_v34 = vld [vmem:[%s13812_s9 + $0x340] sm:$0xff]  }
 0x768   :  { %10497 = vmatpush3.bf16.msra.mxu0 %v11499_v48  ;;  %10519 = vmatpush3.bf16.msra.mxu1 %v11500_v52  ;;  %v11538_v31 = vld [vmem:[%s13812_s9 + $0x3c0] sm:$0xff]   ;;  %v11541_v38 = vld [vmem:[%s13812_s9 + $0x348] sm:$0xff]   ;;  %v11548_v52 = vld [vmem:[%s13812_s9 + $0x390] sm:$0xff]  }
 0x769   :  { %10498 = vmatprep.subr.bf16.mxu0 %v11501_v53  ;;  %10520 = vmatprep.subr.bf16.mxu1 %v11502_v57  ;;  %v11539_v35 = vld [vmem:[%s13812_s9 + $0x300] sm:$0xff]   ;;  %v11542_v39 = vld [vmem:[%s13812_s9 + $0x3c8] sm:$0xff]   ;;  %v11550_v53 = vld [vmem:[%s13812_s9 + $0x3d8] sm:$0xff]  }
 0x76a   :  { %v11540_v36 = vld [vmem:[%s13812_s9 + $0x380] sm:$0xff]   ;;  %v11543_v42 = vld [vmem:[%s13812_s9 + $0x308] sm:$0xff]   ;;  %v11551_v57 = vld [vmem:[%s13812_s9 + $0x318] sm:$0xff]  }
 0x76b   :  { %v11544_v48 = vld [vmem:[%s13812_s9 + $0x388] sm:$0xff]  }
 0x76c   :  { %10499 = vmatpush3.bf16.msra.mxu0 %v11503_v58  ;;  %10521 = vmatpush3.bf16.msra.mxu1 %v11504_v59  ;;  %v11552_v58 = vld [vmem:[%s13812_s9 + $0x398] sm:$0xff]   ;;  %v11553_v59 = vld [vmem:[%s13812_s9 + $0x360] sm:$0xff]  }
 0x76d   :  { %10528 = vmatprep.subr.bf16.mxu0 %v11505_v60  ;;  %10550 = vmatprep.subr.bf16.mxu1 %v11506_v61  ;;  %v11554_v60 = vld [vmem:[%s13812_s9 + $0x3e0] sm:$0xff]  }
 0x76e   :  { %v11555_v61 = vld [vmem:[%s13812_s9 + $0x320] sm:$0xff]  }
 0x76f   :  { %4460 = vmatmul.mubr.bf16.vlgmr.msra.gmra.mrb[52].mxu0 %v12525_v12  ;;  %4501 = vmatmul.mubr.bf16.vlgmr.msra.gmra.mrb[52].mxu1 %v12527_v13  ;;  %v11513_v12 = vld [vmem:[%s13812_s9 + $0x250] sm:$0xff]  }
 0x770   :  { %10529 = vmatpush3.bf16.msra.mxu0 %v11507_v62  ;;  %4541 = vmatprep.mubr.bf16.mxu0 %v12565_v1  ;;  %v11514_v13 = vld [vmem:[%s13812_s9 + $0x2d0] sm:$0xff]   ;;  %v11556_v62 = vld [vmem:[%s13812_s9 + $0x3a0] sm:$0xff]  }
 0x771   :  { %10551 = vmatpush3.bf16.msra.mxu1 %v11508_v4  ;;  %4582 = vmatprep.mubr.bf16.mxu1 %v12567_v2  ;;  %v11515_v1 = vld [vmem:[%s13812_s9 + $0x210] sm:$0xff]   ;;  %v11557_v4 = vld [vmem:[%s13812_s9 + $0x368] sm:$0xff]  }
 0x772   :  { %10530 = vmatprep.subr.bf16.mxu0 %v11509_v5  ;;  %10552 = vmatprep.subr.bf16.mxu1 %v11510_v6  ;;  %v11516_v2 = vld [vmem:[%s13812_s9 + $0x290] sm:$0xff]   ;;  %v11558_v5 = vld [vmem:[%s13812_s9 + $0x3e8] sm:$0xff]  }
 0x773   :  { %v11559_v6 = vld [vmem:[%s13812_s9 + $0x328] sm:$0xff]  }
 0x774   :  { %10531 = vmatpush3.bf16.msra.mxu0 %v11511_v7  ;;  %v11560_v7 = vld [vmem:[%s13812_s9 + $0x3a8] sm:$0xff]  }
 0x775   :  { %10553 = vmatpush3.bf16.msra.mxu1 %v11512_v8  ;;  %10532 = vmatprep.subr.bf16.mxu0 %v11513_v12  ;;  %v11561_v8 = vld [vmem:[%s13812_s9 + $0x370] sm:$0xff]  }
 0x776   :  { %10554 = vmatprep.subr.bf16.mxu1 %v11514_v13  ;;  %v11562_v12 = vld [vmem:[%s13812_s9 + $0x3f0] sm:$0xff]  }
 0x777   :  { %v11563_v13 = vld [vmem:[%s13812_s9 + $0x330] sm:$0xff]  }
 0x778   :  { %10533 = vmatpush3.bf16.msra.mxu0 %v11515_v1  ;;  %v11564_v1 = vld [vmem:[%s13812_s9 + $0x3b0] sm:$0xff]  }
 0x779   :  { %10555 = vmatpush3.bf16.msra.mxu1 %v11516_v2  ;;  %10534 = vmatprep.subr.bf16.mxu0 %v11517_v9  ;;  %v11565_v2 = vld [vmem:[%s13812_s9 + $0x378] sm:$0xff]  }
 0x77a   :  { %10556 = vmatprep.subr.bf16.mxu1 %v11518_v10  ;;  %v11566_v9 = vld [vmem:[%s13812_s9 + $0x3f8] sm:$0xff]  }
 0x77b   :  { %v11567_v10 = vld [vmem:[%s13812_s9 + $0x338] sm:$0xff]  }
 0x77c   :  { %10535 = vmatpush3.bf16.msra.mxu0 %v11519_v14  ;;  %v11568_v14 = vld [vmem:[%s13812_s9 + $0x3b8] sm:$0xff]  }
 0x77d   :  { %10557 = vmatpush3.bf16.msra.mxu1 %v11520_v15  ;;  %10536 = vmatprep.subr.bf16.mxu0 %v11521_v16 }
 0x77e   :  { %10558 = vmatprep.subr.bf16.mxu1 %v11522_v17  ;;  %v9677_v17 = vld [vmem:[%s13813_s10] ss:$0 sm:$0xff] }
 0x780   :  { %10537 = vmatpush3.bf16.msra.mxu0 %v11523_v54 }
 0x781   :  { %10559 = vmatpush3.bf16.msra.mxu1 %v11524_v51  ;;  %10538 = vmatprep.subr.bf16.mxu0 %v11525_v18 }
 0x782   :  { %10560 = vmatprep.subr.bf16.mxu1 %v11526_v19 }
 0x784   :  { %10539 = vmatpush3.bf16.msra.mxu0 %v11527_v21 }
 0x785   :  { %10561 = vmatpush3.bf16.msra.mxu1 %v11528_v22  ;;  %10540 = vmatprep.subr.bf16.mxu0 %v11529_v23 }
 0x786   :  { %10562 = vmatprep.subr.bf16.mxu1 %v11530_v26 }
 0x788   :  { %10541 = vmatpush3.bf16.msra.mxu0 %v11531_v27 }
 0x789   :  { %10563 = vmatpush3.bf16.msra.mxu1 %v11532_v28  ;;  %10542 = vmatprep.subr.bf16.mxu0 %v11533_v29 }
 0x78a   :  { %10564 = vmatprep.subr.bf16.mxu1 %v11534_v30 }
 0x78c   :  { %10543 = vmatpush3.bf16.msra.mxu0 %v11535_v32 }
 0x78d   :  { %10565 = vmatpush3.bf16.msra.mxu1 %v11536_v33  ;;  %10572 = vmatprep.subr.bf16.mxu0 %v11537_v34 }
 0x78e   :  { %10594 = vmatprep.subr.bf16.mxu1 %v11538_v31 }
 0x78f   :  { %4542 = vmatmul.mubr.bf16.vlgmr.msra.gmra.mrb[56].mxu0 %v12561_v63  ;;  %v11545_v63 = vld [vmem:[%s13812_s9 + $0x350] sm:$0xff]  }
 0x790   :  { %4583 = vmatmul.mubr.bf16.vlgmr.msra.gmra.mrb[56].mxu1 %v12563_v20  ;;  %10573 = vmatpush3.bf16.msra.mxu0 %v11539_v35  ;;  %v11546_v20 = vld [vmem:[%s13812_s9 + $0x3d0] sm:$0xff]  }
 0x791   :  { %4623 = vmatprep.mubr.bf16.mxu0 %v12597_v46  ;;  %10595 = vmatpush3.bf16.msra.mxu1 %v11540_v36  ;;  %v11547_v46 = vld [vmem:[%s13812_s9 + $0x310] sm:$0xff]  }
 0x792   :  { %4664 = vmatprep.mubr.bf16.mxu1 %v12599_v47  ;;  %10574 = vmatprep.subr.bf16.mxu0 %v11541_v38  ;;  %v11549_v47 = vld [vmem:[%s13812_s9 + $0x358] sm:$0xff]  }
 0x793   :  { %10596 = vmatprep.subr.bf16.mxu1 %v11542_v39 }
 0x794   :  { %10575 = vmatpush3.bf16.msra.mxu0 %v11543_v42 }
 0x795   :  { %10597 = vmatpush3.bf16.msra.mxu1 %v11544_v48  ;;  %10576 = vmatprep.subr.bf16.mxu0 %v11545_v63 }
 0x796   :  { %10598 = vmatprep.subr.bf16.mxu1 %v11546_v20 }
 0x798   :  { %10577 = vmatpush3.bf16.msra.mxu0 %v11547_v46 }
 0x799   :  { %10599 = vmatpush3.bf16.msra.mxu1 %v11548_v52  ;;  %10578 = vmatprep.subr.bf16.mxu0 %v11549_v47 }
 0x79a   :  { %10600 = vmatprep.subr.bf16.mxu1 %v11550_v53 }
 0x79c   :  { %10579 = vmatpush3.bf16.msra.mxu0 %v11551_v57 }
 0x79d   :  { %10601 = vmatpush3.bf16.msra.mxu1 %v11552_v58  ;;  %10580 = vmatprep.subr.bf16.mxu0 %v11553_v59 }
 0x79e   :  { %10602 = vmatprep.subr.bf16.mxu1 %v11554_v60 }
 0x7a0   :  { %10581 = vmatpush3.bf16.msra.mxu0 %v11555_v61 }
 0x7a1   :  { %10603 = vmatpush3.bf16.msra.mxu1 %v11556_v62  ;;  %10582 = vmatprep.subr.bf16.mxu0 %v11557_v4 }
 0x7a2   :  { %10604 = vmatprep.subr.bf16.mxu1 %v11558_v5 }
 0x7a4   :  { %10583 = vmatpush3.bf16.msra.mxu0 %v11559_v6 }
 0x7a5   :  { %10605 = vmatpush3.bf16.msra.mxu1 %v11560_v7  ;;  %10584 = vmatprep.subr.bf16.mxu0 %v11561_v8 }
 0x7a6   :  { %10606 = vmatprep.subr.bf16.mxu1 %v11562_v12 }
 0x7a8   :  { %10585 = vmatpush3.bf16.msra.mxu0 %v11563_v13 }
 0x7a9   :  { %10607 = vmatpush3.bf16.msra.mxu1 %v11564_v1  ;;  %10586 = vmatprep.subr.bf16.mxu0 %v11565_v2 }
 0x7aa   :  { %10608 = vmatprep.subr.bf16.mxu1 %v11566_v9 }
 0x7ac   :  { %10587 = vmatpush3.bf16.msra.mxu0 %v11567_v10 }
 0x7ad   :  { %10609 = vmatpush3.bf16.msra.mxu1 %v11568_v14  ;;  %11372 = vmatprep.subr.bf16.mxu0 %v11803_v3 }
 0x7ae   :  { %11378 = vmatprep.subr.bf16.mxu1 %v11803_v3 }
 0x7af   :  { %4624 = vmatmul.mubr.bf16.vlgmr.msra.gmra.mrb[60].mxu0 %v12593_v45 }
 0x7b0   :  { %4665 = vmatmul.mubr.bf16.vlgmr.msra.gmra.mrb[60].mxu1 %v12595_v37  ;;  %11106 = vmatprep.mubr.msk.f32.mxu0 %vm11804_vm0, %v11805_v11 }
 0x7b1   :  { %11117 = vmatprep.mubr.msk.f32.mxu1 %vm11804_vm0, %v11805_v11 }
 0x822   :  { %v10456_v15 = vpop.f32.mrb[48].mxu0  ;;  %v10478_v16 = vpop.f32.mrb[48].mxu1 }
 0x823   :  { %v10457_v54 = vpop.f32.mrb[49].mxu0  ;;  %v10479_v51 = vpop.f32.mrb[49].mxu1 }
 0x824   :  { %v10458_v18 = vadd.f32 %v10457_v54, %v10456_v15  ;;  %v10480_v19 = vadd.f32 %v10479_v51, %v10478_v16  ;;  %v10459_v21 = vpop.f32.mrb[50].mxu0  ;;  %v10481_v45 = vpop.f32.mrb[50].mxu1 }
 0x825   :  { %v10460_v22 = vpop.f32.mrb[51].mxu0  ;;  %v10482_v37 = vpop.f32.mrb[51].mxu1 }
 0x826   :  { %v4380_v23 = vadd.f32 %v10458_v18, %v9677_v17  ;;  %v10461_v26 = vadd.f32 %v10460_v22, %v10459_v21  ;;  %v10483_v27 = vadd.f32 %v10482_v37, %v10481_v45 }
 0x828   :  { %v4421_v28 = vadd.f32 %v10480_v19, %v4380_v23  ;;  %v4383_v29 = vadd.f32 %v10461_v26, %v9677_v17 }
 0x82a   :  { %v4424_v30 = vadd.f32 %v10483_v27, %v4383_v29 }
 0x842   :  { %v10500_v32 = vpop.f32.mrb[52].mxu0  ;;  %v10522_v33 = vpop.f32.mrb[52].mxu1 }
 0x843   :  { %v10501_v34 = vpop.f32.mrb[53].mxu0  ;;  %v10523_v31 = vpop.f32.mrb[53].mxu1 }
 0x844   :  { %v10502_v35 = vadd.f32 %v10501_v34, %v10500_v32  ;;  %v10524_v36 = vadd.f32 %v10523_v31, %v10522_v33  ;;  %v10503_v38 = vpop.f32.mrb[54].mxu0  ;;  %v10525_v39 = vpop.f32.mrb[54].mxu1 }
 0x845   :  { %v10504_v42 = vpop.f32.mrb[55].mxu0  ;;  %v10526_v48 = vpop.f32.mrb[55].mxu1 }
 0x846   :  { %v4462_v63 = vadd.f32 %v10502_v35, %v4421_v28  ;;  %v10505_v20 = vadd.f32 %v10504_v42, %v10503_v38  ;;  %v10527_v46 = vadd.f32 %v10526_v48, %v10525_v39  ;;  %v9808_v48 = vld [vmem:[%s13825_s26 + $0x80] sm:$0xff] }
 0x848   :  { %v4503_v52 = vadd.f32 %v10524_v36, %v4462_v63  ;;  %v4465_v47 = vadd.f32 %v10505_v20, %v4424_v30  ;;  %v9809_v63 = vld [vmem:[%s13825_s26 + $0x88] sm:$0xff]  ;;  %v9812_v20 = vld [vmem:[%s13825_s26 + $0xa0] sm:$0xff] }
 0x84a   :  { %v4506_v53 = vadd.f32 %v10527_v46, %v4465_v47  ;;  %v11373_v46 = vpack.c.bf16 %v9809_v63, %v9808_v48  ;;  %v9835_v48 = vld [vmem:[%s13805_s2 + $0x7] ss:$0 sm:$0xff] }
 0x84c   :  { %11374 = vmatpush3.bf16.msra.mxu0 %v11373_v46 }
 0x84d   :  { %11375 = vmatprep.subr.bf16.mxu0 %v11803_v3 }
 0x862   :  { %v10544_v57 = vpop.f32.mrb[56].mxu0 }
 0x863   :  { %v10566_v58 = vpop.f32.mrb[56].mxu1  ;;  %v10545_v59 = vpop.f32.mrb[57].mxu0 }
 0x864   :  { %v10546_v60 = vadd.f32 %v10545_v59, %v10544_v57  ;;  %v10567_v61 = vpop.f32.mrb[57].mxu1  ;;  %v10547_v62 = vpop.f32.mrb[58].mxu0  ;;  %v9811_v57 = vld [vmem:[%s13825_s26 + $0x98] sm:$0xff] }
 0x865   :  { %v10568_v4 = vadd.f32 %v10567_v61, %v10566_v58  ;;  %v10569_v5 = vpop.f32.mrb[58].mxu1  ;;  %v10548_v6 = vpop.f32.mrb[59].mxu0  ;;  %v9814_v58 = vld [vmem:[%s13825_s26 + $0xb0] sm:$0xff] }
 0x866   :  { %v4544_v7 = vadd.f32 %v10546_v60, %v4503_v52  ;;  %v10549_v8 = vadd.f32 %v10548_v6, %v10547_v62  ;;  %v10570_v12 = vpop.f32.mrb[59].mxu1  ;;  %v9813_v52 = vld [vmem:[%s13825_s26 + $0xa8] sm:$0xff]  ;;  %v9815_v60 = vld [vmem:[%s13825_s26 + $0xb8] sm:$0xff] }
 0x867   :  { %v10571_v13 = vadd.f32 %v10570_v12, %v10569_v5  ;;  %v11379_v47 = vpack.c.bf16 %v9813_v52, %v9812_v20  ;;  %v11382_v61 = vpack.c.bf16 %v9815_v60, %v9814_v58 }
 0x868   :  { %v4585_v1 = vadd.f32 %v10568_v4, %v4544_v7  ;;  %v4547_v2 = vadd.f32 %v10549_v8, %v4506_v53  ;;  %v9810_v53 = vld [vmem:[%s13825_s26 + $0x90] sm:$0xff] }
 0x869   :  { %11380 = vmatpush3.bf16.msra.mxu1 %v11379_v47  ;;  %v11376_v59 = vpack.c.bf16 %v9811_v57, %v9810_v53 }
 0x86a   :  { %v4588_v9 = vadd.f32 %v10571_v13, %v4547_v2  ;;  %11381 = vmatprep.subr.bf16.mxu1 %v11803_v3  ;;  %v9806_v13 = vld [vmem:[%s13814_s11] ss:$0 sm:$0xff] }
 0x86b   :  { %11377 = vmatpush3.bf16.msra.mxu0 %v11376_v59 }
 0x86c   :  { %11384 = vmatprep.subr.bf16.mxu0 %v11803_v3 }
 0x86d   :  { %11383 = vmatpush3.bf16.msra.mxu1 %v11382_v61 }
 0x86e   :  { %11390 = vmatprep.subr.bf16.mxu1 %v11803_v3 }
 0x882   :  { %v10588_v10 = vpop.f32.mrb[60].mxu0 }
 0x883   :  { %v10610_v14 = vpop.f32.mrb[60].mxu1  ;;  %v10589_v15 = vpop.f32.mrb[61].mxu0 }
 0x884   :  { %v10590_v16 = vadd.f32 %v10589_v15, %v10588_v10  ;;  %v10611_v17 = vpop.f32.mrb[61].mxu1  ;;  %v10591_v54 = vpop.f32.mrb[62].mxu0  ;;  %v9820_v10 = vld [vmem:[%s13825_s26 + $0xe0] sm:$0xff] }
 0x885   :  { %v10612_v51 = vadd.f32 %v10611_v17, %v10610_v14  ;;  %v10613_v18 = vpop.f32.mrb[62].mxu1  ;;  %v10592_v19 = vpop.f32.mrb[63].mxu0  ;;  %v9821_v14 = vld [vmem:[%s13825_s26 + $0xe8] sm:$0xff]  ;;  %v9807_v15 = vld [vmem:[%s13815_s12] ss:$0 sm:$0xff] }
 0x886   :  { %v4626_v21 = vadd.f32 %v10590_v16, %v4585_v1  ;;  %v10593_v45 = vadd.f32 %v10592_v19, %v10591_v54  ;;  %v10614_v22 = vpop.f32.mrb[63].mxu1  ;;  %v9816_v1 = vld [vmem:[%s13825_s26 + $0xc0] sm:$0xff]  ;;  %v11391_v54 = vpack.c.bf16 %v9821_v14, %v9820_v10  ;;  %v9819_v19 = vld [vmem:[%s13825_s26 + $0xd8] sm:$0xff] }
 0x887   :  { %v10615_v37 = vadd.f32 %v10614_v22, %v10613_v18 }
 0x888   :  { %v4667_v23 = vadd.f32 %v10612_v51, %v4626_v21  ;;  %v4629_v26 = vadd.f32 %v10593_v45, %v4588_v9  ;;  %v9817_v9 = vld [vmem:[%s13825_s26 + $0xc8] sm:$0xff]  ;;  %v9818_v51 = vld [vmem:[%s13825_s26 + $0xd0] sm:$0xff]  ;;  %v9823_v45 = vld [vmem:[%s13825_s26 + $0xf8] sm:$0xff] }
 0x889   :  { %v11385_v17 = vpack.c.bf16 %v9817_v9, %v9816_v1  ;;  %v9822_v21 = vld [vmem:[%s13825_s26 + $0xf0] sm:$0xff]  ;;  %v11388_v22 = vpack.c.bf16 %v9819_v19, %v9818_v51 }
 0x88a   :  { %v4670_v27 = vadd.f32 %v10615_v37, %v4629_v26  ;;  %v4673_v28 = vadd.f32 %v4667_v23, %v12281_v24  ;;  %v11394_v37 = vpack.c.bf16 %v9823_v45, %v9822_v21 }
 0x88c   :  { %v4677_v29 = vsel %vm108_vm1, %v4673_v28, 0.0  ;;  %v4674_v30 = vadd.f32 %v4670_v27, %v12283_v25 }
 0x88d   :  { %4678 = vadd.xlane.f32.xlu1 %v4677_v29  ;;  %v9833_v29 = vld [vmem:[%s13805_s2 + $0x5] ss:$0 sm:$0xff] }
 0x88e   :  { %v4680_v32 = vsel %vm108_vm1, %v4674_v30, 0.0 }
 0x88f   :  { %4681 = vadd.xlane.f32.xlu0 %v4680_v32 }
 0x91a   :  { %v4679_v33 = vpop.xlane.xlu1 %4678 }
 0x91b   :  { %v4683_v34 = vmul.f32 0.03125, %v4679_v33 }
 0x91c   :  { %v4682_v31 = vpop.xlane.xlu0 %4681 }
 0x91d   :  { %v4685_v35 = vsub.f32 %v4673_v28, %v4683_v34  ;;  %v4684_v36 = vmul.f32 0.03125, %v4682_v31 }
 0x91f   :  { %v12834_v38 = vsub.f32 %v4674_v30, %v4684_v36  ;;  %v4687_v39 = vmul.f32 %v4685_v35, %v4685_v35  ;;  %v9834_v36 = vld [vmem:[%s13805_s2 + $0x6] ss:$0 sm:$0xff] }
 0x921   :  { %v4689_v42 = vsel %vm108_vm1, %v4687_v39, 0.0  ;;  %v4688_v24 = vmul.f32 %v12834_v38, %v12834_v38 }
 0x922   :  { %4690 = vadd.xlane.f32.xlu1 %v4689_v42 }
 0x923   :  { %v4692_v25 = vsel %vm108_vm1, %v4688_v24, 0.0 }
 0x924   :  { %4693 = vadd.xlane.f32.xlu0 %v4692_v25 }
 0x9af   :  { %v4691_v62 = vpop.xlane.xlu1 %4690 }
 0x9b0   :  { %v4695_v4 = vmul.f32 0.03125, %v4691_v62 }
 0x9b1   :  { %v4694_v6 = vpop.xlane.xlu0 %4693 }
 0x9b2   :  { %v4697_v5 = vadd.f32 1e-05, %v4695_v4  ;;  %v4696_v7 = vmul.f32 0.03125, %v4694_v6 }
 0x9b4   :  { %11733 = vrsqrt.f32 %v4697_v5  ;;  %v4698_v8 = vadd.f32 1e-05, %v4696_v7 }
 0x9b6   :  { %11735 = vrsqrt.f32 %v4698_v8 }
 0x9be   :  { %v11734_v12 = vpop.eup %11733 }
 0x9bf   :  { %v4701_v2 = vmul.f32 %v11734_v12, %v4685_v35 }
 0x9c0   :  { %v11736_v23 = vpop.eup %11735 }
 0x9c1   :  { %v4709_v16 = vmul.f32 %v9806_v13, %v4701_v2  ;;  %v4702_v26 = vmul.f32 %v11736_v23, %v12834_v38 }
 0x9c3   :  { %v12889_v18 = vadd.f32 %v9807_v15, %v4709_v16  ;;  %v4710_v27 = vmul.f32 %v9806_v13, %v4702_v26 }
 0x9c5   :  { %11107 = vmatmul.mubr.msk.f32.vlgmr.msra.gmra.mrb[64].mxu0 %vm108_vm1, %v12889_v18  ;;  %11118 = vmatmul.mubr.msk.f32.vlgmr.msra.gmra.mrb[64].mxu1 %vm108_vm1, %v12889_v18  ;;  %v12923_v28 = vadd.f32 %v9807_v15, %v4710_v27 }
 0x9c6   :  { %11386 = vmatpush3.bf16.msra.mxu0 %v11385_v17  ;;  %11392 = vmatpush3.bf16.msra.mxu1 %v11391_v54 }
 0x9c7   :  { %11387 = vmatprep.subr.bf16.mxu0 %v11803_v3  ;;  %11393 = vmatprep.subr.bf16.mxu1 %v11803_v3 }
 0x9c8   :  { %11128 = vmatprep.mubr.msk.f32.mxu0 %vm11804_vm0, %v11805_v11  ;;  %11139 = vmatprep.mubr.msk.f32.mxu1 %vm11804_vm0, %v11805_v11 }
 0x9ca   :  { %11389 = vmatpush3.bf16.msra.mxu0 %v11388_v22  ;;  %11395 = vmatpush3.bf16.msra.mxu1 %v11394_v37 }
 0x9cb   :  { %11396 = vmatprep.subr.bf16.mxu0 %v11803_v3  ;;  %11402 = vmatprep.subr.bf16.mxu1 %v11803_v3 }
 0x9cd   :  { %11129 = vmatmul.mubr.msk.f32.vlgmr.msra.gmra.mrb[66].mxu0 %vm108_vm1, %v12889_v18  ;;  %11140 = vmatmul.mubr.msk.f32.vlgmr.msra.gmra.mrb[66].mxu1 %vm108_vm1, %v12889_v18 }
 0x9ce   :  { %11398 = vmatpush3.bf16.msra.mxu0 %v11373_v46  ;;  %11404 = vmatpush3.bf16.msra.mxu1 %v11379_v47 }
 0x9cf   :  { %11399 = vmatprep.subr.bf16.mxu0 %v11803_v3  ;;  %11405 = vmatprep.subr.bf16.mxu1 %v11803_v3 }
 0x9d0   :  { %11150 = vmatprep.mubr.msk.f32.mxu0 %vm11804_vm0, %v11805_v11  ;;  %11161 = vmatprep.mubr.msk.f32.mxu1 %vm11804_vm0, %v11805_v11 }
 0x9d2   :  { %11401 = vmatpush3.bf16.msra.mxu0 %v11376_v59  ;;  %11407 = vmatpush3.bf16.msra.mxu1 %v11382_v61 }
 0x9d3   :  { %11408 = vmatprep.subr.bf16.mxu0 %v11803_v3  ;;  %11414 = vmatprep.subr.bf16.mxu1 %v11803_v3 }
 0x9d5   :  { %11151 = vmatmul.mubr.msk.f32.vlgmr.msra.gmra.mrb[68].mxu0 %vm108_vm1, %v12923_v28  ;;  %11162 = vmatmul.mubr.msk.f32.vlgmr.msra.gmra.mrb[68].mxu1 %vm108_vm1, %v12923_v28 }
 0x9d6   :  { %11410 = vmatpush3.bf16.msra.mxu0 %v11385_v17  ;;  %11416 = vmatpush3.bf16.msra.mxu1 %v11391_v54 }
 0x9d7   :  { %11411 = vmatprep.subr.bf16.mxu0 %v11803_v3  ;;  %11417 = vmatprep.subr.bf16.mxu1 %v11803_v3  ;;  %v9832_v3 = vld [vmem:[%s13805_s2 + $0x4] ss:$0 sm:$0xff] }
 0x9d8   :  { %11172 = vmatprep.mubr.msk.f32.mxu0 %vm11804_vm0, %v11805_v11  ;;  %11183 = vmatprep.mubr.msk.f32.mxu1 %vm11804_vm0, %v11805_v11 }
 0x9da   :  { %11413 = vmatpush3.bf16.msra.mxu0 %v11388_v22  ;;  %11419 = vmatpush3.bf16.msra.mxu1 %v11394_v37 }
 0x9db   :  { %11191 = vmatprep.subr.mxu1 %v11805_v11  ;;  %11186 = vmatprep.subr.mxu0 %v11805_v11 }
 0x9dd   :  { %11173 = vmatmul.mubr.msk.f32.vlgmr.msra.gmra.mrb[70].mxu0 %vm108_vm1, %v12923_v28  ;;  %11184 = vmatmul.mubr.msk.f32.vlgmr.msra.gmra.mrb[70].mxu1 %vm108_vm1, %v12923_v28 }
 0x9de   :  { %11188 = vmatprep.mubr.msk.f32.mxu0 %vm11804_vm0, %v11805_v11  ;;  %11193 = vmatprep.mubr.msk.f32.mxu1 %vm11804_vm0, %v11805_v11 }
 0xa98   :  { %v4839_v30 = vpop.f32.mrb[64].mxu0  ;;  %v4909_v32 = vpop.f32.mrb[64].mxu1 }
 0xa99   :  { %v12953_v33 = vadd.f32 %v9832_v3, %v4839_v30  ;;  %v12955_v34 = vadd.f32 %v9833_v29, %v4909_v32  ;;  %v11108_v31 = vpop.f32.mrb[65].mxu0  ;;  %v11119_v35 = vpop.f32.mrb[65].mxu1 }
 0xa9b   :  { %5414 = vrot.lane.b32.xlu0 %v12955_v34, %s11806_s24  ;;  %5337 = vrot.lane.b32.xlu1 %v12953_v33, %s11806_s24 }
 0xaa0   :  { %v4979_v38 = vpop.f32.mrb[66].mxu0  ;;  %v5049_v39 = vpop.f32.mrb[66].mxu1 }
 0xaa1   :  { %v12964_v42 = vadd.f32 %v9834_v36, %v4979_v38  ;;  %v11130_v24 = vpop.f32.mrb[67].mxu0  ;;  %v11141_v25 = vpop.f32.mrb[67].mxu1  ;;  %v12971_v63 = vadd.f32 %v9835_v48, %v5049_v39 }
 0xaa3   :  { %5491 = vrot.lane.b32.xlu1 %v12964_v42, %s11806_s24 }
 0xaa7   :  { %5568 = vrot.lane.b32.xlu1 %v12971_v63, %s11806_s24 }
 0xaa8   :  { %v5122_v20 = vpop.f32.mrb[68].mxu0  ;;  %v5192_v46 = vpop.f32.mrb[68].mxu1 }
 0xaa9   :  { %v12975_v52 = vadd.f32 %v9832_v3, %v5122_v20  ;;  %v12977_v47 = vadd.f32 %v9833_v29, %v5192_v46  ;;  %v11152_v53 = vpop.f32.mrb[69].mxu0  ;;  %v11163_v57 = vpop.f32.mrb[69].mxu1 }
 0xaab   :  { %5722 = vrot.lane.b32.xlu1 %v12977_v47, %s11806_s24  ;;  %5645 = vrot.lane.b32.xlu0 %v12975_v52, %s11806_s24 }
 0xab0   :  { %v5262_v58 = vpop.f32.mrb[70].mxu0  ;;  %v5332_v59 = vpop.f32.mrb[70].mxu1 }
 0xab1   :  { %v12983_v60 = vadd.f32 %v9834_v36, %v5262_v58  ;;  %v12985_v61 = vadd.f32 %v9835_v48, %v5332_v59  ;;  %v11174_v62 = vpop.f32.mrb[71].mxu0  ;;  %v11185_v4 = vpop.f32.mrb[71].mxu1 }
 0xab3   :  { %5876 = vrot.lane.b32.xlu1 %v12985_v61, %s11806_s24  ;;  %5799 = vrot.lane.b32.xlu0 %v12983_v60, %s11806_s24 }
 0xb0d   :  { %v5415_v5 = vpop.permute.xlu0 %5414  ;;  %v5338_v6 = vpop.permute.xlu1 %5337 }
 0xb0e   :  { %11187 = vmatpush3.xpose.msk.msra.mxu0 %vm678_vm2, %v5338_v6  ;;  %11192 = vmatpush3.xpose.msk.msra.mxu1 %vm678_vm2, %v5415_v5 }
 0xb0f   :  { %11196 = vmatprep.subr.mxu0 %v11805_v11  ;;  %11201 = vmatprep.subr.mxu1 %v11805_v11 }
 0xb11   :  { %11189 = vmatmul.mubr.msk.f32.vlgmr.msra.gmra.mrb[72].mxu0 %vm678_vm2, %v12953_v33  ;;  %11194 = vmatmul.mubr.msk.f32.vlgmr.msra.gmra.mrb[72].mxu1 %vm678_vm2, %v12955_v34 }
 0xb12   :  { %11198 = vmatprep.mubr.msk.f32.mxu0 %vm11804_vm0, %v11805_v11  ;;  %11203 = vmatprep.mubr.msk.f32.mxu1 %vm11804_vm0, %v11805_v11 }
 0xb15   :  { %v5492_v7 = vpop.permute.xlu1 %5491 }
 0xb16   :  { %11197 = vmatpush3.xpose.msk.msra.mxu0 %vm678_vm2, %v5492_v7 }
 0xb17   :  { %11206 = vmatprep.subr.mxu0 %v11805_v11 }
 0xb19   :  { %11199 = vmatmul.mubr.msk.f32.vlgmr.msra.gmra.mrb[74].mxu0 %vm678_vm2, %v12964_v42  ;;  %v5569_v8 = vpop.permute.xlu1 %5568 }
 0xb1a   :  { %11202 = vmatpush3.xpose.msk.msra.mxu1 %vm678_vm2, %v5569_v8  ;;  %11208 = vmatprep.mubr.msk.f32.mxu0 %vm11804_vm0, %v11805_v11 }
 0xb1b   :  { %11211 = vmatprep.subr.mxu1 %v11805_v11 }
 0xb1d   :  { %11204 = vmatmul.mubr.msk.f32.vlgmr.msra.gmra.mrb[74].mxu1 %vm678_vm2, %v12971_v63  ;;  %v5723_v12 = vpop.permute.xlu1 %5722  ;;  %v5646_v13 = vpop.permute.xlu0 %5645 }
 0xb1e   :  { %11207 = vmatpush3.xpose.msk.msra.mxu0 %vm678_vm2, %v5646_v13  ;;  %11212 = vmatpush3.xpose.msk.msra.mxu1 %vm678_vm2, %v5723_v12 }
 0xb1f   :  { %11213 = vmatprep.mubr.msk.f32.mxu1 %vm11804_vm0, %v11805_v11  ;;  %11221 = vmatprep.subr.mxu1 %v11805_v11 }
 0xb20   :  { %11216 = vmatprep.subr.mxu0 %v11805_v11 }
 0xb21   :  { %11209 = vmatmul.mubr.msk.f32.vlgmr.msra.gmra.mrb[76].mxu0 %vm678_vm2, %v12975_v52  ;;  %11214 = vmatmul.mubr.msk.f32.vlgmr.msra.gmra.mrb[76].mxu1 %vm678_vm2, %v12977_v47 }
 0xb22   :  { %11218 = vmatprep.mubr.msk.f32.mxu0 %vm11804_vm0, %v11805_v11  ;;  %11223 = vmatprep.mubr.msk.f32.mxu1 %vm11804_vm0, %v11805_v11 }
 0xb25   :  { %v5877_v1 = vpop.permute.xlu1 %5876  ;;  %v5800_v2 = vpop.permute.xlu0 %5799 }
 0xb26   :  { %11217 = vmatpush3.xpose.msk.msra.mxu0 %vm678_vm2, %v5800_v2  ;;  %11222 = vmatpush3.xpose.msk.msra.mxu1 %vm678_vm2, %v5877_v1 }
 0xb27   :  { %11226 = vmatprep.subr.mxu0 %v11805_v11  ;;  %11231 = vmatprep.subr.mxu1 %v11805_v11 }
 0xb29   :  { %11219 = vmatmul.mubr.msk.f32.vlgmr.msra.gmra.mrb[78].mxu0 %vm678_vm2, %v12983_v60  ;;  %11224 = vmatmul.mubr.msk.f32.vlgmr.msra.gmra.mrb[78].mxu1 %vm678_vm2, %v12985_v61 }
 0xb2a   :  { %11228 = vmatprep.mubr.msk.f32.mxu0 %vm11804_vm0, %v11805_v11  ;;  %11233 = vmatprep.mubr.msk.f32.mxu1 %vm11804_vm0, %v11805_v11 }
 0xbe4   :  { %v5409_v9 = vpop.f32.mrb[72].mxu0  ;;  %v5486_v10 = vpop.f32.mrb[72].mxu1 }
 0xbe5   :  { %v11190_v14 = vpop.f32.mrb[73].mxu0  ;;  %v11195_v15 = vpop.f32.mrb[73].mxu1  ;;  %v5955_v16 = vsel %vm678_vm2, %v5486_v10, -inf  ;;  %v5952_v17 = vsel %vm678_vm2, %v5409_v9, -inf }
 0xbe6   :  { %5956 = vmax.xlane.f32.xlu1 %v5955_v16  ;;  %5953 = vmax.xlane.f32.xlu0 %v5952_v17 }
 0xbec   :  { %v5563_v54 = vpop.f32.mrb[74].mxu0 }
 0xbed   :  { %v11200_v51 = vpop.f32.mrb[75].mxu0  ;;  %v5958_v19 = vsel %vm678_vm2, %v5563_v54, -inf }
 0xbee   :  { %5959 = vmax.xlane.f32.xlu0 %v5958_v19 }
 0xbf0   :  { %v5640_v21 = vpop.f32.mrb[74].mxu1 }
 0xbf1   :  { %v11205_v45 = vpop.f32.mrb[75].mxu1  ;;  %v5961_v22 = vsel %vm678_vm2, %v5640_v21, -inf }
 0xbf2   :  { %5962 = vmax.xlane.f32.xlu0 %v5961_v22 }
 0xbf4   :  { %v5717_v37 = vpop.f32.mrb[76].mxu0  ;;  %v5794_v23 = vpop.f32.mrb[76].mxu1 }
 0xbf5   :  { %v11210_v26 = vpop.f32.mrb[77].mxu0  ;;  %v11215_v27 = vpop.f32.mrb[77].mxu1  ;;  %v5967_v3 = vsel %vm678_vm2, %v5794_v23, -inf  ;;  %v5964_v29 = vsel %vm678_vm2, %v5717_v37, -inf }
 0xbf6   :  { %5968 = vmax.xlane.f32.xlu0 %v5967_v3  ;;  %5965 = vmax.xlane.f32.xlu1 %v5964_v29 }
 0xbfc   :  { %v5871_v30 = vpop.f32.mrb[78].mxu0  ;;  %v5948_v32 = vpop.f32.mrb[78].mxu1 }
 0xbfd   :  { %v11220_v31 = vpop.f32.mrb[79].mxu0  ;;  %v11225_v35 = vpop.f32.mrb[79].mxu1  ;;  %v5973_v36 = vsel %vm678_vm2, %v5948_v32, -inf  ;;  %v5970_v38 = vsel %vm678_vm2, %v5871_v30, -inf }
 0xbfe   :  { %5974 = vmax.xlane.f32.xlu0 %v5973_v36  ;;  %5971 = vmax.xlane.f32.xlu1 %v5970_v38 }
 0xc0f   :  { %6040 = vrot.lane.b32.xlu1 %v12953_v33, %s11807_s0 }
 0xc13   :  { %6192 = vrot.lane.b32.xlu1 %v12964_v42, %s11807_s0 }
 0xc14   :  { %6116 = vrot.lane.b32.xlu0 %v12955_v34, %s11807_s0 }
 0xc17   :  { %6268 = vrot.lane.b32.xlu1 %v12971_v63, %s11807_s0 }
 0xc18   :  { %6344 = vrot.lane.b32.xlu0 %v12975_v52, %s11807_s0 }
 0xc1b   :  { %6420 = vrot.lane.b32.xlu1 %v12977_v47, %s11807_s0 }
 0xc73   :  { %v5957_v39 = vpop.xlane.xlu1 %5956  ;;  %v5954_v24 = vpop.xlane.xlu0 %5953 }
 0xc74   :  { %v5977_v25 = vsub.f32 %v5486_v10, %v5957_v39  ;;  %v5976_v48 = vsub.f32 %v5409_v9, %v5954_v24 }
 0xc76   :  { %v5986_v33 = vmul.f32 1.442695, %v5977_v25  ;;  %v5984_v20 = vmul.f32 1.442695, %v5976_v48 }
 0xc78   :  { %11737 = vpow2.f32 %v5986_v33 }
 0xc79   :  { %11739 = vpow2.f32 %v5984_v20 }
 0xc7b   :  { %v5960_v42 = vpop.xlane.xlu0 %5959 }
 0xc7c   :  { %v5978_v46 = vsub.f32 %v5563_v54, %v5960_v42 }
 0xc7e   :  { %v5988_v34 = vmul.f32 1.442695, %v5978_v46 }
 0xc7f   :  { %v5963_v53 = vpop.xlane.xlu0 %5962 }
 0xc80   :  { %11741 = vpow2.f32 %v5988_v34  ;;  %v5979_v63 = vsub.f32 %v5640_v21, %v5963_v53 }
 0xc82   :  { %v11738_v57 = vpop.eup %11737  ;;  %v5990_v58 = vmul.f32 1.442695, %v5979_v63 }
 0xc83   :  { %v11740_v52 = vpop.eup %11739  ;;  %v5969_v59 = vpop.xlane.xlu0 %5968  ;;  %v6003_v47 = vsel %vm678_vm2, %v11738_v57, 0.0 }
 0xc84   :  { %v5966_v62 = vpop.xlane.xlu1 %5965  ;;  %11743 = vpow2.f32 %v5990_v58  ;;  %v5981_v4 = vsub.f32 %v5794_v23, %v5969_v59  ;;  %6004 = vadd.xlane.f32.xlu0 %v6003_v47  ;;  %v6000_v6 = vsel %vm678_vm2, %v11740_v52, 0.0 }
 0xc85   :  { %v5980_v5 = vsub.f32 %v5717_v37, %v5966_v62  ;;  %6001 = vadd.xlane.f32.xlu1 %v6000_v6 }
 0xc86   :  { %v5994_v7 = vmul.f32 1.442695, %v5981_v4 }
 0xc87   :  { %v5992_v8 = vmul.f32 1.442695, %v5980_v5 }
 0xc88   :  { %11745 = vpow2.f32 %v5994_v7  ;;  %v9828_v7 = vld [vmem:[%s13806_s3 + $0x20] sm:$0xff] }
 0xc89   :  { %11747 = vpow2.f32 %v5992_v8  ;;  %v9829_v8 = vld [vmem:[%s13806_s3 + $0x28] sm:$0xff] }
 0xc8a   :  { %v13061_v12 = vpop.eup %11741 }
 0xc8b   :  { %v5975_v13 = vpop.xlane.xlu0 %5974  ;;  %v5972_v1 = vpop.xlane.xlu1 %5971  ;;  %v6006_v2 = vsel %vm678_vm2, %v13061_v12, 0.0 }
 0xc8c   :  { %v5983_v9 = vsub.f32 %v5948_v32, %v5975_v13  ;;  %v5982_v10 = vsub.f32 %v5871_v30, %v5972_v1  ;;  %6007 = vadd.xlane.f32.xlu1 %v6006_v2  ;;  %v9830_v1 = vld [vmem:[%s13806_s3 + $0x30] sm:$0xff] }
 0xc8e   :  { %v11744_v14 = vpop.eup %11743  ;;  %v5998_v15 = vmul.f32 1.442695, %v5983_v9  ;;  %v5996_v16 = vmul.f32 1.442695, %v5982_v10 }
 0xc8f   :  { %v6117_v17 = vpop.permute.xlu0 %6116  ;;  %v6041_v54 = vpop.permute.xlu1 %6040  ;;  %v6009_v51 = vsel %vm678_vm2, %v11744_v14, 0.0 }
 0xc90   :  { %11749 = vpow2.f32 %v5998_v15  ;;  %6010 = vadd.xlane.f32.xlu0 %v6009_v51  ;;  %11227 = vmatpush3.msra.mxu0 %v6041_v54 }
 0xc91   :  { %11751 = vpow2.f32 %v5996_v16  ;;  %11232 = vmatpush3.msra.mxu1 %v6117_v17  ;;  %11236 = vmatprep.subr.mxu0 %v11805_v11 }
 0xc92   :  { %v11746_v19 = vpop.eup %11745  ;;  %11241 = vmatprep.subr.mxu1 %v11805_v11 }
 0xc93   :  { %v11748_v21 = vpop.eup %11747  ;;  %v6015_v45 = vsel %vm678_vm2, %v11746_v19, 0.0  ;;  %v6193_v3 = vpop.permute.xlu1 %6192 }
 0xc94   :  { %6016 = vadd.xlane.f32.xlu0 %v6015_v45  ;;  %v6012_v22 = vsel %vm678_vm2, %v11748_v21, 0.0  ;;  %v6345_v30 = vpop.permute.xlu0 %6344 }
 0xc95   :  { %6013 = vadd.xlane.f32.xlu1 %v6012_v22 }
 0xc97   :  { %v6269_v29 = vpop.permute.xlu1 %6268 }
 0xc9a   :  { %v13070_v37 = vpop.eup %11749 }
 0xc9b   :  { %v13072_v23 = vpop.eup %11751  ;;  %v6021_v26 = vsel %vm678_vm2, %v13070_v37, 0.0  ;;  %v6421_v32 = vpop.permute.xlu1 %6420 }
 0xc9c   :  { %6022 = vadd.xlane.f32.xlu0 %v6021_v26  ;;  %v6018_v27 = vsel %vm678_vm2, %v13072_v23, 0.0 }
 0xc9d   :  { %6019 = vadd.xlane.f32.xlu1 %v6018_v27 }
 0xcae   :  { %6572 = vrot.lane.b32.xlu1 %v12985_v61, %s11807_s0 }
 0xcb2   :  { %6496 = vrot.lane.b32.xlu0 %v12983_v60, %s11807_s0 }
 0xd11   :  { %v6005_v31 = vpop.xlane.xlu0 %6004 }
 0xd12   :  { %11753 = vrcp.f32 %v6005_v31  ;;  %v6002_v35 = vpop.xlane.xlu1 %6001 }
 0xd13   :  { %11755 = vrcp.f32 %v6002_v35 }
 0xd19   :  { %v6008_v36 = vpop.xlane.xlu1 %6007 }
 0xd1a   :  { %11757 = vrcp.f32 %v6008_v36 }
 0xd1c   :  { %v11754_v38 = vpop.eup %11753 }
 0xd1d   :  { %v11756_v39 = vpop.eup %11755  ;;  %v6033_v24 = vmul.f32 %v11754_v38, %v11738_v57  ;;  %v6011_v25 = vpop.xlane.xlu0 %6010 }
 0xd1e   :  { %v6032_v48 = vmul.f32 %v11756_v39, %v11740_v52  ;;  %11759 = vrcp.f32 %v6011_v25  ;;  %v9877_v25 = vld [vmem:[%s13807_s4 + $0x1] ss:$0 sm:$0xff] }
 0xd1f   :  { %11234 = vmatmul.mubr.msk.f32.vlgmr.msra.gmra.mrb[80].mxu1 %vm678_vm2, %v6033_v24 }
 0xd20   :  { %11229 = vmatmul.mubr.msk.f32.vlgmr.msra.gmra.mrb[80].mxu0 %vm678_vm2, %v6032_v48  ;;  %11242 = vmatpush3.msra.mxu1 %v6269_v29 }
 0xd21   :  { %11237 = vmatpush3.msra.mxu0 %v6193_v3  ;;  %v6017_v60 = vpop.xlane.xlu0 %6016  ;;  %11238 = vmatprep.mubr.msk.f32.mxu0 %vm11804_vm0, %v11805_v11 }
 0xd22   :  { %11761 = vrcp.f32 %v6017_v60  ;;  %v6014_v61 = vpop.xlane.xlu1 %6013  ;;  %11246 = vmatprep.subr.mxu0 %v11805_v11  ;;  %11243 = vmatprep.mubr.msk.f32.mxu1 %vm11804_vm0, %v11805_v11 }
 0xd23   :  { %11763 = vrcp.f32 %v6014_v61  ;;  %11251 = vmatprep.subr.mxu1 %v11805_v11 }
 0xd24   :  { %v11758_v33 = vpop.eup %11757 }
 0xd25   :  { %v6034_v20 = vmul.f32 %v11758_v33, %v13061_v12  ;;  %v9831_v12 = vld [vmem:[%s13806_s3 + $0x38] sm:$0xff] }
 0xd27   :  { %11239 = vmatmul.mubr.msk.f32.vlgmr.msra.gmra.mrb[82].mxu0 %vm678_vm2, %v6034_v20 }
 0xd28   :  { %v11760_v42 = vpop.eup %11759  ;;  %11247 = vmatpush3.msra.mxu0 %v6345_v30  ;;  %11248 = vmatprep.mubr.msk.f32.mxu0 %vm11804_vm0, %v11805_v11 }
 0xd29   :  { %v6035_v46 = vmul.f32 %v11760_v42, %v11744_v14  ;;  %v6023_v34 = vpop.xlane.xlu0 %6022  ;;  %11256 = vmatprep.subr.mxu0 %v11805_v11 }
 0xd2a   :  { %11765 = vrcp.f32 %v6023_v34  ;;  %v6020_v53 = vpop.xlane.xlu1 %6019 }
 0xd2b   :  { %11767 = vrcp.f32 %v6020_v53  ;;  %11244 = vmatmul.mubr.msk.f32.vlgmr.msra.gmra.mrb[82].mxu1 %vm678_vm2, %v6035_v46 }
 0xd2c   :  { %v11762_v63 = vpop.eup %11761  ;;  %11252 = vmatpush3.msra.mxu1 %v6421_v32  ;;  %11253 = vmatprep.mubr.msk.f32.mxu1 %vm11804_vm0, %v11805_v11 }
 0xd2d   :  { %v11764_v57 = vpop.eup %11763  ;;  %v6037_v58 = vmul.f32 %v11762_v63, %v11746_v19  ;;  %11261 = vmatprep.subr.mxu1 %v11805_v11  ;;  %v6497_v59 = vpop.permute.xlu0 %6496 }
 0xd2e   :  { %v6036_v52 = vmul.f32 %v11764_v57, %v11748_v21  ;;  %v6573_v62 = vpop.permute.xlu1 %6572 }
 0xd2f   :  { %11254 = vmatmul.mubr.msk.f32.vlgmr.msra.gmra.mrb[84].mxu1 %vm678_vm2, %v6037_v58 }
 0xd30   :  { %11249 = vmatmul.mubr.msk.f32.vlgmr.msra.gmra.mrb[84].mxu0 %vm678_vm2, %v6036_v52  ;;  %11262 = vmatpush3.msra.mxu1 %v6573_v62 }
 0xd31   :  { %11257 = vmatpush3.msra.mxu0 %v6497_v59  ;;  %11258 = vmatprep.mubr.msk.f32.mxu0 %vm11804_vm0, %v11805_v11 }
 0xd32   :  { %11263 = vmatprep.mubr.msk.f32.mxu1 %vm11804_vm0, %v11805_v11  ;;  %11266 = vmatprep.subr.mxu0 %v11805_v11 }
 0xd33   :  { %11271 = vmatprep.subr.mxu1 %v11805_v11 }
 0xd34   :  { %v11766_v47 = vpop.eup %11765 }
 0xd35   :  { %v11768_v4 = vpop.eup %11767  ;;  %v6039_v5 = vmul.f32 %v11766_v47, %v13070_v37 }
 0xd36   :  { %v6038_v6 = vmul.f32 %v11768_v4, %v13072_v23 }
 0xd37   :  { %11264 = vmatmul.mubr.msk.f32.vlgmr.msra.gmra.mrb[86].mxu1 %vm678_vm2, %v6039_v5 }
 0xd38   :  { %11259 = vmatmul.mubr.msk.f32.vlgmr.msra.gmra.mrb[86].mxu0 %vm678_vm2, %v6038_v6  ;;  %11273 = vmatprep.mubr.msk.f32.mxu1 %vm11804_vm0, %v11805_v11 }
 0xd39   :  { %11268 = vmatprep.mubr.msk.f32.mxu0 %vm11804_vm0, %v11805_v11  ;;  %11267 = vmatpush3.msra.mxu0 %v9828_v7 }
 0xd3a   :  { %11272 = vmatpush3.msra.mxu1 %v9829_v8  ;;  %11276 = vmatprep.subr.mxu0 %v11805_v11 }
 0xd3b   :  { %11281 = vmatprep.subr.mxu1 %v11805_v11 }
 0xdf2   :  { %v6188_v13 = vpop.f32.mrb[80].mxu1 }
 0xdf3   :  { %v6112_v2 = vpop.f32.mrb[80].mxu0  ;;  %v11235_v9 = vpop.f32.mrb[81].mxu1  ;;  %11274 = vmatmul.mubr.msk.f32.vlgmr.msra.gmra.mrb[88].mxu1 %vm678_vm2, %v6188_v13 }
 0xdf4   :  { %v11230_v10 = vpop.f32.mrb[81].mxu0  ;;  %11269 = vmatmul.mubr.msk.f32.vlgmr.msra.gmra.mrb[88].mxu0 %vm678_vm2, %v6112_v2  ;;  %11282 = vmatpush3.msra.mxu1 %v9831_v12 }
 0xdf5   :  { %11277 = vmatpush3.msra.mxu0 %v9830_v1  ;;  %11278 = vmatprep.mubr.msk.f32.mxu0 %vm11804_vm0, %v11805_v11 }
 0xdf6   :  { %11283 = vmatprep.mubr.msk.f32.mxu1 %vm11804_vm0, %v11805_v11  ;;  %11286 = vmatprep.subr.mxu0 %v11805_v11 }
 0xdf7   :  { %11291 = vmatprep.subr.mxu1 %v11805_v11 }
 0xdfa   :  { %v6264_v14 = vpop.f32.mrb[82].mxu0 }
 0xdfb   :  { %v11240_v15 = vpop.f32.mrb[83].mxu0  ;;  %11279 = vmatmul.mubr.msk.f32.vlgmr.msra.gmra.mrb[90].mxu0 %vm678_vm2, %v6264_v14 }
 0xdfc   :  { %11287 = vmatpush3.msra.mxu0 %v9828_v7  ;;  %11288 = vmatprep.mubr.msk.f32.mxu0 %vm11804_vm0, %v11805_v11 }
 0xdfd   :  { %11296 = vmatprep.subr.mxu0 %v11805_v11 }
 0xdfe   :  { %v6340_v16 = vpop.f32.mrb[82].mxu1 }
 0xdff   :  { %v11245_v17 = vpop.f32.mrb[83].mxu1  ;;  %11284 = vmatmul.mubr.msk.f32.vlgmr.msra.gmra.mrb[90].mxu1 %vm678_vm2, %v6340_v16 }
 0xe00   :  { %11292 = vmatpush3.msra.mxu1 %v9829_v8  ;;  %11293 = vmatprep.mubr.msk.f32.mxu1 %vm11804_vm0, %v11805_v11 }
 0xe01   :  { %11301 = vmatprep.subr.mxu1 %v11805_v11 }
 0xe02   :  { %v6492_v54 = vpop.f32.mrb[84].mxu1 }
 0xe03   :  { %v6416_v51 = vpop.f32.mrb[84].mxu0  ;;  %v11255_v19 = vpop.f32.mrb[85].mxu1  ;;  %11294 = vmatmul.mubr.msk.f32.vlgmr.msra.gmra.mrb[92].mxu1 %vm678_vm2, %v6492_v54 }
 0xe04   :  { %v11250_v21 = vpop.f32.mrb[85].mxu0  ;;  %11289 = vmatmul.mubr.msk.f32.vlgmr.msra.gmra.mrb[92].mxu0 %vm678_vm2, %v6416_v51  ;;  %11302 = vmatpush3.msra.mxu1 %v9831_v12  ;;  %v9890_v51 = vld [vmem:[%s13810_s7 + $0x140] sm:$0xff]  ;;  %v9883_v19 = vld [vmem:[%s13810_s7 + $0x108] sm:$0xff] }
 0xe05   :  { %11297 = vmatpush3.msra.mxu0 %v9830_v1  ;;  %11298 = vmatprep.mubr.msk.f32.mxu0 %vm11804_vm0, %v11805_v11 }
 0xe06   :  { %11303 = vmatprep.mubr.msk.f32.mxu1 %vm11804_vm0, %v11805_v11 }
 0xe0a   :  { %v6644_v45 = vpop.f32.mrb[86].mxu1 }
 0xe0b   :  { %v6568_v22 = vpop.f32.mrb[86].mxu0  ;;  %v11265_v37 = vpop.f32.mrb[87].mxu1  ;;  %11304 = vmatmul.mubr.msk.f32.vlgmr.msra.gmra.mrb[94].mxu1 %vm678_vm2, %v6644_v45  ;;  %v9891_v45 = vld [vmem:[%s13810_s7 + $0x148] sm:$0xff] }
 0xe0c   :  { %v11260_v23 = vpop.f32.mrb[87].mxu0  ;;  %11299 = vmatmul.mubr.msk.f32.vlgmr.msra.gmra.mrb[94].mxu0 %vm678_vm2, %v6568_v22  ;;  %7661 = vmatprep.mubr.bf16.mxu1 %v11808_v0  ;;  %v9918_v37 = vcombine.low %v9883_v19, %v9891_v45 }
 0xe0d   :  { %7618 = vmatprep.mubr.bf16.mxu0 %v11808_v0  ;;  %v9919_v23 = vcombine.high %v9883_v19, %v9891_v45  ;;  %v9903_v19 = vld [vmem:[%s13810_s7 + $0x1a8] sm:$0xff] }
 0xe0f   :  { %7629 = vmatprep.subr.bf16.mxu1 %v9919_v23 }
 0xe10   :  { %7630 = vmatpush1.bf16.msra.mxu1 %v9918_v37 }
 0xec6   :  { %v6790_v26 = vpop.f32.mrb[88].mxu1 }
 0xec7   :  { %v6717_v27 = vpop.f32.mrb[88].mxu0  ;;  %v7233_v3 = vsel %vm108_vm1, %v6790_v26, 0.0  ;;  %v11275_v29 = vpop.f32.mrb[89].mxu1  ;;  %v9898_v26 = vld [vmem:[%s13810_s7 + $0x180] sm:$0xff] }
 0xec8   :  { %v7232_v30 = vsel %vm108_vm1, %v6717_v27, 0.0  ;;  %v11270_v11 = vpop.f32.mrb[89].mxu0  ;;  %v9906_v27 = vld [vmem:[%s13810_s7 + $0x1c0] sm:$0xff] }
 0xec9   :  { %v7234_v32 = vadd.f32 %v7233_v3, %v7232_v30  ;;  %v9899_v3 = vld [vmem:[%s13810_s7 + $0x188] sm:$0xff]  ;;  %v9933_v29 = vcombine.high %v9898_v26, %v9906_v27  ;;  %v9932_v11 = vcombine.low %v9898_v26, %v9906_v27  ;;  %v9888_v26 = vld [vmem:[%s13810_s7 + $0x130] sm:$0xff] }
 0xeca   :  { %v9907_v30 = vld [vmem:[%s13810_s7 + $0x1c8] sm:$0xff]  ;;  %v9896_v27 = vld [vmem:[%s13810_s7 + $0x170] sm:$0xff] }
 0xece   :  { %v6863_v31 = vpop.f32.mrb[90].mxu0 }
 0xecf   :  { %v7235_v35 = vsel %vm108_vm1, %v6863_v31, 0.0  ;;  %v11280_v36 = vpop.f32.mrb[91].mxu0  ;;  %v9935_v31 = vcombine.high %v9899_v3, %v9907_v30 }
 0xed0   :  { %v7236_v38 = vadd.f32 %v7235_v35, %v7234_v32  ;;  %v9934_v32 = vcombine.low %v9899_v3, %v9907_v30  ;;  %v9884_v35 = vld [vmem:[%s13810_s7 + $0x110] sm:$0xff]  ;;  %v9889_v3 = vld [vmem:[%s13810_s7 + $0x138] sm:$0xff] }
 0xed1   :  { %7631 = vmatprep.subr.bf16.mxu1 %v9935_v31  ;;  %v9892_v36 = vld [vmem:[%s13810_s7 + $0x150] sm:$0xff] }
 0xed2   :  { %v6936_v39 = vpop.f32.mrb[90].mxu1  ;;  %7632 = vmatpush1.bf16.msra.mxu1 %v9934_v32  ;;  %v9929_v32 = vcombine.high %v9888_v26, %v9896_v27 }
 0xed3   :  { %v7237_v24 = vsel %vm108_vm1, %v6936_v39, 0.0  ;;  %v11285_v48 = vpop.f32.mrb[91].mxu1  ;;  %v9921_v39 = vcombine.high %v9884_v35, %v9892_v36 }
 0xed4   :  { %v7238_v60 = vadd.f32 %v7237_v24, %v7236_v38  ;;  %v9885_v38 = vld [vmem:[%s13810_s7 + $0x118] sm:$0xff] }
 0xed5   :  { %v9893_v24 = vld [vmem:[%s13810_s7 + $0x158] sm:$0xff] }
 0xed6   :  { %v7254_v61 = vadd.f32 %v9877_v25, %v7238_v60  ;;  %v7082_v33 = vpop.f32.mrb[92].mxu1  ;;  %v9922_v48 = vcombine.low %v9885_v38, %v9893_v24  ;;  %v9923_v60 = vcombine.high %v9885_v38, %v9893_v24  ;;  %v9905_v38 = vld [vmem:[%s13810_s7 + $0x1b8] sm:$0xff]  ;;  %v9928_v24 = vcombine.low %v9888_v26, %v9896_v27 }
 0xed7   :  { %v7009_v20 = vpop.f32.mrb[92].mxu0  ;;  %v7240_v42 = vsel %vm108_vm1, %v7082_v33, 0.0  ;;  %v11295_v46 = vpop.f32.mrb[93].mxu1 }
 0xed8   :  { %v7239_v34 = vsel %vm108_vm1, %v7009_v20, 0.0  ;;  %v11290_v53 = vpop.f32.mrb[93].mxu0  ;;  %v7256_v63 = vadd.f32 %v7254_v61, %v12889_v18  ;;  %7715 = vmatprep.subr.bf16.mxu1 %v9923_v60 }
 0xed9   :  { %v7241_v57 = vadd.f32 %v7240_v42, %v7239_v34 }
 0xeda   :  { %v7262_v58 = vsel %vm108_vm1, %v7256_v63, 0.0 }
 0xedb   :  { %7263 = vadd.xlane.f32.xlu0 %v7262_v58 }
 0xede   :  { %v7228_v52 = vpop.f32.mrb[94].mxu1 }
 0xedf   :  { %v7155_v59 = vpop.f32.mrb[94].mxu0  ;;  %v11305_v62 = vpop.f32.mrb[95].mxu1  ;;  %v7244_v6 = vsel %vm108_vm1, %v7228_v52, 0.0 }
 0xee0   :  { %v7242_v47 = vsel %vm108_vm1, %v7155_v59, 0.0  ;;  %v11300_v4 = vpop.f32.mrb[95].mxu0  ;;  %v9881_v62 = vld [vmem:[%s13809_s6 + $0x1] ss:$0 sm:$0xff] }
 0xee1   :  { %v7243_v5 = vadd.f32 %v7242_v47, %v7241_v57  ;;  %v9880_v57 = vld [vmem:[%s13808_s5 + $0x1] ss:$0 sm:$0xff]  ;;  %v9900_v4 = vld [vmem:[%s13810_s7 + $0x190] sm:$0xff] }
 0xee3   :  { %v7245_v7 = vadd.f32 %v7244_v6, %v7243_v5  ;;  %v9908_v5 = vld [vmem:[%s13810_s7 + $0x1d0] sm:$0xff]  ;;  %v9901_v6 = vld [vmem:[%s13810_s7 + $0x198] sm:$0xff] }
 0xee5   :  { %v7255_v8 = vadd.f32 %v9877_v25, %v7245_v7  ;;  %v9920_v25 = vcombine.low %v9884_v35, %v9892_v36  ;;  %v9909_v7 = vld [vmem:[%s13810_s7 + $0x1d8] sm:$0xff]  ;;  %v9904_v35 = vld [vmem:[%s13810_s7 + $0x1b0] sm:$0xff] }
 0xee6   :  { %v9912_v36 = vld [vmem:[%s13810_s7 + $0x1f0] sm:$0xff] }
 0xee7   :  { %v7257_v12 = vadd.f32 %v7255_v8, %v12923_v28  ;;  %v9882_v28 = vld [vmem:[%s13810_s7 + $0x100] sm:$0xff] }
 0xee8   :  { %v9917_v21 = vcombine.high %v9882_v28, %v9890_v51  ;;  %v9916_v22 = vcombine.low %v9882_v28, %v9890_v51  ;;  %v9902_v28 = vld [vmem:[%s13810_s7 + $0x1a0] sm:$0xff] }
 0xee9   :  { %v7265_v13 = vsel %vm108_vm1, %v7257_v12, 0.0  ;;  %v9910_v51 = vld [vmem:[%s13810_s7 + $0x1e0] sm:$0xff] }
 0xeea   :  { %7266 = vadd.xlane.f32.xlu1 %v7265_v13  ;;  %7586 = vmatprep.subr.bf16.mxu0 %v9917_v21  ;;  %v9911_v21 = vld [vmem:[%s13810_s7 + $0x1e8] sm:$0xff]  ;;  %v9941_v37 = vcombine.high %v9902_v28, %v9910_v51  ;;  %v9940_v30 = vcombine.low %v9902_v28, %v9910_v51  ;;  %v11597_v28 = vld [vmem:[%s13812_s9 + $0x478] sm:$0xff]  }
 0xeeb   :  { %7587 = vmatpush1.bf16.msra.mxu0 %v9916_v22  ;;  %v9943_v23 = vcombine.high %v9903_v19, %v9911_v21  ;;  %v11598_v51 = vld [vmem:[%s13812_s9 + $0x4f8] sm:$0xff]  }
 0xeec   :  { %7588 = vmatprep.subr.bf16.mxu0 %v9933_v29  ;;  %v9897_v29 = vld [vmem:[%s13810_s7 + $0x178] sm:$0xff] }
 0xeed   :  { %v9931_v31 = vcombine.high %v9889_v3, %v9897_v29 }
 0xeef   :  { %7589 = vmatpush1.bf16.msra.mxu0 %v9932_v11  ;;  %v9942_v11 = vcombine.low %v9903_v19, %v9911_v21  ;;  %v11599_v19 = vld [vmem:[%s13812_s9 + $0x438] sm:$0xff]  }
 0xef0   :  { %7672 = vmatprep.subr.bf16.mxu0 %v9921_v39  ;;  %v9913_v39 = vld [vmem:[%s13810_s7 + $0x1f8] sm:$0xff] }
 0xef1   :  { %v9947_v60 = vcombine.high %v9905_v38, %v9913_v39  ;;  %v11600_v21 = vld [vmem:[%s13812_s9 + $0x4b8] sm:$0xff]  }
 0xf68   :  { %v7264_v18 = vpop.xlane.xlu0 %7263 }
 0xf69   :  { %v7268_v1 = vmul.f32 0.03125, %v7264_v18  ;;  %v9937_v18 = vcombine.high %v9900_v4, %v9908_v5 }
 0xf6b   :  { %v7270_v2 = vsub.f32 %v7256_v63, %v7268_v1  ;;  %v9939_v1 = vcombine.high %v9901_v6, %v9909_v7 }
 0xf6d   :  { %v7272_v9 = vmul.f32 %v7270_v2, %v7270_v2 }
 0xf6f   :  { %v7274_v10 = vsel %vm108_vm1, %v7272_v9, 0.0  ;;  %v9894_v9 = vld [vmem:[%s13810_s7 + $0x160] sm:$0xff] }
 0xf70   :  { %7275 = vadd.xlane.f32.xlu0 %v7274_v10  ;;  %v9887_v10 = vld [vmem:[%s13810_s7 + $0x128] sm:$0xff] }
 0xf77   :  { %v7267_v14 = vpop.xlane.xlu1 %7266 }
 0xf78   :  { %v7269_v15 = vmul.f32 0.03125, %v7267_v14  ;;  %v9895_v14 = vld [vmem:[%s13810_s7 + $0x168] sm:$0xff] }
 0xf79   :  { %v9926_v22 = vcombine.low %v9887_v10, %v9895_v14 }
 0xf7a   :  { %v7271_v16 = vsub.f32 %v7257_v12, %v7269_v15  ;;  %v9936_v15 = vcombine.low %v9900_v4, %v9908_v5  ;;  %v11582_v4 = vld [vmem:[%s13812_s9 + $0x4d8] sm:$0xff]  }
 0xf7b   :  { %v11583_v5 = vld [vmem:[%s13812_s9 + $0x418] sm:$0xff]  }
 0xf7c   :  { %v7273_v17 = vmul.f32 %v7271_v16, %v7271_v16 }
 0xf7e   :  { %v7277_v54 = vsel %vm108_vm1, %v7273_v17, 0.0 }
 0xf7f   :  { %7278 = vadd.xlane.f32.xlu0 %v7277_v54  ;;  %v9927_v54 = vcombine.high %v9887_v10, %v9895_v14  ;;  %v11591_v10 = vld [vmem:[%s13812_s9 + $0x428] sm:$0xff]  }
 0xf80   :  { %v11592_v14 = vld [vmem:[%s13812_s9 + $0x4a8] sm:$0xff]  }
 0xffd   :  { %v7276_v61 = vpop.xlane.xlu0 %7275 }
 0xffe   :  { %v7280_v33 = vmul.f32 0.03125, %v7276_v61  ;;  %v9944_v61 = vcombine.low %v9904_v35, %v9912_v36 }
0x1000   :  { %v7282_v20 = vadd.f32 1e-05, %v7280_v33  ;;  %v9946_v33 = vcombine.low %v9905_v38, %v9913_v39 }
0x1002   :  { %11769 = vrsqrt.f32 %v7282_v20  ;;  %v11569_v20 = vld [vmem:[%s13812_s9 + $0x440] sm:$0xff]  }
0x100c   :  { %v7279_v42 = vpop.xlane.xlu0 %7278  ;;  %v11770_v53 = vpop.eup %11769 }
0x100d   :  { %v7281_v46 = vmul.f32 0.03125, %v7279_v42  ;;  %v7286_v63 = vmul.f32 %v11770_v53, %v7270_v2  ;;  %v9886_v2 = vld [vmem:[%s13810_s7 + $0x120] sm:$0xff]  ;;  %v11573_v53 = vld [vmem:[%s13812_s9 + $0x448] sm:$0xff]  }
0x100e   :  { %v9925_v17 = vcombine.high %v9886_v2, %v9894_v9  ;;  %v9924_v45 = vcombine.low %v9886_v2, %v9894_v9  ;;  %v11570_v42 = vld [vmem:[%s13812_s9 + $0x4c0] sm:$0xff]   ;;  %v11589_v2 = vld [vmem:[%s13812_s9 + $0x468] sm:$0xff]  }
0x100f   :  { %v7283_v34 = vadd.f32 1e-05, %v7281_v46  ;;  %v7294_v52 = vmul.f32 %v9880_v57, %v7286_v63  ;;  %v11571_v46 = vld [vmem:[%s13812_s9 + $0x400] sm:$0xff]   ;;  %v11575_v63 = vld [vmem:[%s13812_s9 + $0x408] sm:$0xff]  }
0x1010   :  { %v11590_v9 = vld [vmem:[%s13812_s9 + $0x4e8] sm:$0xff]  }
0x1011   :  { %11771 = vrsqrt.f32 %v7283_v34  ;;  %v13226_v8 = vadd.f32 %v9881_v62, %v7294_v52  ;;  %v11572_v34 = vld [vmem:[%s13812_s9 + $0x480] sm:$0xff]   ;;  %v11578_v52 = vld [vmem:[%s13812_s9 + $0x4d0] sm:$0xff]  }
0x101b   :  { %v11772_v58 = vpop.eup %11771 }
0x101c   :  { %v7287_v59 = vmul.f32 %v11772_v58, %v7271_v16  ;;  %v9938_v16 = vcombine.low %v9901_v6, %v9909_v7  ;;  %v11577_v58 = vld [vmem:[%s13812_s9 + $0x450] sm:$0xff]   ;;  %v11584_v6 = vld [vmem:[%s13812_s9 + $0x498] sm:$0xff]   ;;  %v11585_v7 = vld [vmem:[%s13812_s9 + $0x460] sm:$0xff]  }
0x101e   :  { %v7295_v47 = vmul.f32 %v9880_v57, %v7287_v59  ;;  %v11576_v57 = vld [vmem:[%s13812_s9 + $0x488] sm:$0xff]   ;;  %v11579_v59 = vld [vmem:[%s13812_s9 + $0x410] sm:$0xff]  }
0x1020   :  { %v13228_v12 = vadd.f32 %v9881_v62, %v7295_v47  ;;  %v11580_v62 = vld [vmem:[%s13812_s9 + $0x490] sm:$0xff]   ;;  %v11581_v47 = vld [vmem:[%s13812_s9 + $0x458] sm:$0xff]  }
0x1022   :  { %v13232_v13 = vpack.c.bf16 %v13228_v12, %v13226_v8 }
0x1024   :  { %9948 = vmatmul.mubr.msk.bf16.vlgmr.msra.gmra.mrb[96].mxu0 %vm108_vm1, %v13232_v13  ;;  %9949 = vmatmul.mubr.msk.bf16.vlgmr.msra.gmra.mrb[96].mxu1 %vm108_vm1, %v13232_v13 }
0x1025   :  { %7673 = vmatpush1.bf16.msra.mxu0 %v9920_v25  ;;  %7716 = vmatpush1.bf16.msra.mxu1 %v9922_v48  ;;  %v9930_v25 = vcombine.low %v9889_v3, %v9897_v29  ;;  %v9945_v48 = vcombine.high %v9904_v35, %v9912_v36 }
0x1026   :  { %7674 = vmatprep.subr.bf16.mxu0 %v9937_v18  ;;  %7717 = vmatprep.subr.bf16.mxu1 %v9939_v1  ;;  %v11587_v18 = vld [vmem:[%s13812_s9 + $0x420] sm:$0xff]  }
0x1027   :  { %7704 = vmatprep.mubr.bf16.mxu0 %v11808_v0  ;;  %7747 = vmatprep.mubr.bf16.mxu1 %v11808_v0  ;;  %v11588_v1 = vld [vmem:[%s13812_s9 + $0x4a0] sm:$0xff]  }
0x1029   :  { %7675 = vmatpush1.bf16.msra.mxu0 %v9936_v15  ;;  %7718 = vmatpush1.bf16.msra.mxu1 %v9938_v16  ;;  %v11593_v15 = vld [vmem:[%s13812_s9 + $0x470] sm:$0xff]  }
0x102a   :  { %7758 = vmatprep.subr.bf16.mxu0 %v9925_v17  ;;  %7801 = vmatprep.subr.bf16.mxu1 %v9927_v54  ;;  %v11594_v16 = vld [vmem:[%s13812_s9 + $0x4f0] sm:$0xff]  }
0x102b   :  { %v11595_v17 = vld [vmem:[%s13812_s9 + $0x430] sm:$0xff]  }
0x102c   :  { %9950 = vmatmul.mubr.msk.bf16.vlgmr.msra.gmra.mrb[100].mxu0 %vm108_vm1, %v13232_v13  ;;  %9951 = vmatmul.mubr.msk.bf16.vlgmr.msra.gmra.mrb[100].mxu1 %vm108_vm1, %v13232_v13  ;;  %v11596_v54 = vld [vmem:[%s13812_s9 + $0x4b0] sm:$0xff]  }
0x102d   :  { %7759 = vmatpush1.bf16.msra.mxu0 %v9924_v45  ;;  %7802 = vmatpush1.bf16.msra.mxu1 %v9926_v22  ;;  %v11601_v45 = vld [vmem:[%s13812_s9 + $0x540] sm:$0xff]  }
0x102e   :  { %7760 = vmatprep.subr.bf16.mxu0 %v9941_v37  ;;  %7803 = vmatprep.subr.bf16.mxu1 %v9943_v23  ;;  %v11602_v22 = vld [vmem:[%s13812_s9 + $0x5c0] sm:$0xff]   ;;  %v9914_v37 = vld [vmem:[%s13811_s8 + $0x10] sm:$0xff] }
0x102f   :  { %7790 = vmatprep.mubr.bf16.mxu0 %v11808_v0  ;;  %7833 = vmatprep.mubr.bf16.mxu1 %v11808_v0  ;;  %v7346_v23 = vrot.slane %v9914_v37, %v12461_v40  ;;  %v7354_v26 = vrot.slane %v9914_v37, %v12463_v41  ;;  %v7350_v27 = vrot.slane %v9914_v37, %v12468_v43 }
0x1030   :  { %v7358_v3 = vrot.slane %v9914_v37, %v12470_v44 }
0x1031   :  { %7761 = vmatpush1.bf16.msra.mxu0 %v9940_v30  ;;  %7804 = vmatpush1.bf16.msra.mxu1 %v9942_v11 }
0x1032   :  { %7844 = vmatprep.subr.bf16.mxu0 %v9929_v32  ;;  %7887 = vmatprep.subr.bf16.mxu1 %v9931_v31 }
0x1034   :  { %9952 = vmatmul.mubr.msk.bf16.vlgmr.msra.gmra.mrb[104].mxu0 %vm108_vm1, %v13232_v13  ;;  %9953 = vmatmul.mubr.msk.bf16.vlgmr.msra.gmra.mrb[104].mxu1 %vm108_vm1, %v13232_v13 }
0x1035   :  { %7845 = vmatpush1.bf16.msra.mxu0 %v9928_v24  ;;  %7888 = vmatpush1.bf16.msra.mxu1 %v9930_v25 }
0x1036   :  { %7846 = vmatprep.subr.bf16.mxu0 %v9945_v48  ;;  %7889 = vmatprep.subr.bf16.mxu1 %v9947_v60 }
0x1037   :  { %7876 = vmatprep.mubr.bf16.mxu0 %v11808_v0  ;;  %7919 = vmatprep.mubr.bf16.mxu1 %v11808_v0  ;;  %v11574_v0 = vld [vmem:[%s13812_s9 + $0x4c8] sm:$0xff]  }
0x1039   :  { %7847 = vmatpush1.bf16.msra.mxu0 %v9944_v61  ;;  %7890 = vmatpush1.bf16.msra.mxu1 %v9946_v33  ;;  %v7362_v33 = vrot.slane %v9914_v37, %v12476_v49 }
0x103a   :  { %10704 = vmatprep.subr.bf16.mxu0 %v11569_v20  ;;  %10726 = vmatprep.subr.bf16.mxu1 %v11570_v42  ;;  %v7370_v20 = vrot.slane %v9914_v37, %v12478_v50 }
0x103c   :  { %9954 = vmatmul.mubr.msk.bf16.vlgmr.msra.gmra.mrb[108].mxu0 %vm108_vm1, %v13232_v13  ;;  %9955 = vmatmul.mubr.msk.bf16.vlgmr.msra.gmra.mrb[108].mxu1 %vm108_vm1, %v13232_v13  ;;  %v11586_v13 = vld [vmem:[%s13812_s9 + $0x4e0] sm:$0xff]  }
0x103d   :  { %10705 = vmatpush3.bf16.msra.mxu0 %v11571_v46  ;;  %10727 = vmatpush3.bf16.msra.mxu1 %v11572_v34  ;;  %v7366_v34 = vrot.slane %v9914_v37, %v12480_v55 }
0x103e   :  { %10706 = vmatprep.subr.bf16.mxu0 %v11573_v53  ;;  %10728 = vmatprep.subr.bf16.mxu1 %v11574_v0  ;;  %v7374_v53 = vrot.slane %v9914_v37, %v12482_v56 }
0x1041   :  { %10707 = vmatpush3.bf16.msra.mxu0 %v11575_v63  ;;  %10729 = vmatpush3.bf16.msra.mxu1 %v11576_v57 }
0x1042   :  { %10708 = vmatprep.subr.bf16.mxu0 %v11577_v58  ;;  %10730 = vmatprep.subr.bf16.mxu1 %v11578_v52 }
0x1045   :  { %10709 = vmatpush3.bf16.msra.mxu0 %v11579_v59  ;;  %10731 = vmatpush3.bf16.msra.mxu1 %v11580_v62 }
0x1046   :  { %10710 = vmatprep.subr.bf16.mxu0 %v11581_v47  ;;  %10732 = vmatprep.subr.bf16.mxu1 %v11582_v4  ;;  %v13420_v4 = vld [vmem:[%s13811_s8 + $0x18] sm:$0xff] }
0x1049   :  { %10711 = vmatpush3.bf16.msra.mxu0 %v11583_v5  ;;  %10733 = vmatpush3.bf16.msra.mxu1 %v11584_v6 }
0x104a   :  { %10712 = vmatprep.subr.bf16.mxu0 %v11585_v7  ;;  %10734 = vmatprep.subr.bf16.mxu1 %v11586_v13 }
0x104d   :  { %10713 = vmatpush3.bf16.msra.mxu0 %v11587_v18  ;;  %10735 = vmatpush3.bf16.msra.mxu1 %v11588_v1 }
0x104e   :  { %10714 = vmatprep.subr.bf16.mxu0 %v11589_v2  ;;  %10736 = vmatprep.subr.bf16.mxu1 %v11590_v9  ;;  %v11603_v2 = vld [vmem:[%s13812_s9 + $0x500] sm:$0xff]  }
0x104f   :  { %v11604_v9 = vld [vmem:[%s13812_s9 + $0x580] sm:$0xff]  }
0x1051   :  { %10715 = vmatpush3.bf16.msra.mxu0 %v11591_v10  ;;  %10737 = vmatpush3.bf16.msra.mxu1 %v11592_v14 }
0x1052   :  { %10716 = vmatprep.subr.bf16.mxu0 %v11593_v15  ;;  %10738 = vmatprep.subr.bf16.mxu1 %v11594_v16 }
0x1055   :  { %10717 = vmatpush3.bf16.msra.mxu0 %v11595_v17  ;;  %10739 = vmatpush3.bf16.msra.mxu1 %v11596_v54  ;;  %v11605_v17 = vld [vmem:[%s13812_s9 + $0x548] sm:$0xff]  }
0x1056   :  { %10718 = vmatprep.subr.bf16.mxu0 %v11597_v28  ;;  %10740 = vmatprep.subr.bf16.mxu1 %v11598_v51  ;;  %v11606_v54 = vld [vmem:[%s13812_s9 + $0x5c8] sm:$0xff]   ;;  %v7378_v28 = vrot.slane %v13420_v4, %v12461_v40 }
0x1059   :  { %10719 = vmatpush3.bf16.msra.mxu0 %v11599_v19  ;;  %10741 = vmatpush3.bf16.msra.mxu1 %v11600_v21 }
0x105a   :  { %10748 = vmatprep.subr.bf16.mxu0 %v11601_v45  ;;  %10770 = vmatprep.subr.bf16.mxu1 %v11602_v22  ;;  %v7386_v22 = vrot.slane %v13420_v4, %v12463_v41  ;;  %v11608_v41 = vld [vmem:[%s13812_s9 + $0x588] sm:$0xff]  }
0x10f7   :  { %v7620_v29 = vpop.f32.mrb[96].mxu0  ;;  %v7663_v30 = vpop.f32.mrb[96].mxu1 }
0x10f8   :  { %v7621_v11 = vadd.f32 %v7620_v29, %v7346_v23  ;;  %v7664_v32 = vadd.f32 %v7663_v30, %v7354_v26  ;;  %v7622_v31 = vpop.f32.mrb[97].mxu0  ;;  %v7665_v35 = vpop.f32.mrb[97].mxu1  ;;  %v11607_v30 = vld [vmem:[%s13812_s9 + $0x508] sm:$0xff]  }
0x10f9   :  { %v7623_v36 = vadd.f32 %v7622_v31, %v7350_v27  ;;  %v7666_v38 = vadd.f32 %v7665_v35, %v7358_v3  ;;  %v7624_v39 = vpop.f32.mrb[98].mxu0  ;;  %v7667_v24 = vpop.f32.mrb[98].mxu1 }
0x10fa   :  { %v7625_v25 = vadd.f32 %v7624_v39, %v7346_v23  ;;  %v7668_v48 = vadd.f32 %v7667_v24, %v7354_v26  ;;  %v7626_v60 = vpop.f32.mrb[99].mxu0  ;;  %v7669_v61 = vpop.f32.mrb[99].mxu1  ;;  %v7930_v0 = vmax.f32 %v7621_v11, 0.0  ;;  %v7932_v63 = vmax.f32 %v7664_v32, 0.0 }
0x10fb   :  { %v7627_v42 = vadd.f32 %v7626_v60, %v7350_v27  ;;  %v7670_v46 = vadd.f32 %v7669_v61, %v7358_v3  ;;  %v7931_v52 = vmax.f32 %v7623_v36, 0.0  ;;  %v7933_v59 = vmax.f32 %v7666_v38, 0.0  ;;  %v11610_v38 = vld [vmem:[%s13812_s9 + $0x5d0] sm:$0xff]  }
0x10fc   :  { %v7946_v57 = vmax.f32 %v7625_v25, 0.0  ;;  %v7948_v58 = vmax.f32 %v7668_v48, 0.0  ;;  %v7382_v3 = vrot.slane %v13420_v4, %v12468_v43  ;;  %v7390_v11 = vrot.slane %v13420_v4, %v12470_v44  ;;  %v11609_v43 = vld [vmem:[%s13812_s9 + $0x550] sm:$0xff]  }
0x10fd   :  { %v7947_v62 = vmax.f32 %v7627_v42, 0.0  ;;  %v7949_v47 = vmax.f32 %v7670_v46, 0.0  ;;  %v11611_v46 = vld [vmem:[%s13812_s9 + $0x510] sm:$0xff]  }
0x10fe   :  { %v7962_v5 = vpack.c.bf16 %v7946_v57, %v7930_v0  ;;  %v7964_v6 = vpack.c.bf16 %v7948_v58, %v7932_v63  ;;  %v11613_v58 = vld [vmem:[%s13812_s9 + $0x558] sm:$0xff]  }
0x10ff   :  { %v7963_v7 = vpack.c.bf16 %v7947_v62, %v7931_v52  ;;  %v7965_v13 = vpack.c.bf16 %v7949_v47, %v7933_v59  ;;  %v7706_v18 = vpop.f32.mrb[100].mxu0  ;;  %v7749_v1 = vpop.f32.mrb[100].mxu1  ;;  %v11614_v52 = vld [vmem:[%s13812_s9 + $0x5d8] sm:$0xff]  }
0x1100   :  { %v7707_v10 = vadd.f32 %v7706_v18, %v7362_v33  ;;  %v7750_v14 = vadd.f32 %v7749_v1, %v7370_v20  ;;  %v7708_v15 = vpop.f32.mrb[101].mxu0  ;;  %v7751_v16 = vpop.f32.mrb[101].mxu1 }
0x1101   :  { %v7709_v51 = vadd.f32 %v7708_v15, %v7366_v34  ;;  %v7752_v19 = vadd.f32 %v7751_v16, %v7374_v53  ;;  %v7710_v21 = vpop.f32.mrb[102].mxu0  ;;  %v7753_v45 = vpop.f32.mrb[102].mxu1  ;;  %9043 = vmatprep.mubr.bf16.mxu0 %v7963_v7  ;;  %9084 = vmatprep.mubr.bf16.mxu1 %v7965_v13  ;;  %v11615_v15 = vld [vmem:[%s13812_s9 + $0x518] sm:$0xff]   ;;  %v7406_v16 = vrot.slane %v13420_v4, %v12482_v56 }
0x1102   :  { %v7711_v37 = vadd.f32 %v7710_v21, %v7362_v33  ;;  %v7754_v23 = vadd.f32 %v7753_v45, %v7370_v20  ;;  %v7712_v26 = vpop.f32.mrb[103].mxu0  ;;  %v7755_v27 = vpop.f32.mrb[103].mxu1  ;;  %9044 = vmatmul.mubr.bf16.vlgmr.msra.gmra.mrb[112].mxu0 %v7962_v5  ;;  %9085 = vmatmul.mubr.bf16.vlgmr.msra.gmra.mrb[112].mxu1 %v7964_v6  ;;  %v7934_v32 = vmax.f32 %v7707_v10, 0.0  ;;  %v7936_v31 = vmax.f32 %v7750_v14, 0.0 }
0x1103   :  { %v7713_v29 = vadd.f32 %v7712_v26, %v7366_v34  ;;  %v7756_v40 = vadd.f32 %v7755_v27, %v7374_v53  ;;  %10749 = vmatpush3.bf16.msra.mxu0 %v11603_v2  ;;  %10771 = vmatpush3.bf16.msra.mxu1 %v11604_v9  ;;  %v7935_v39 = vmax.f32 %v7709_v51, 0.0  ;;  %v7937_v24 = vmax.f32 %v7752_v19, 0.0  ;;  %v11612_v34 = vld [vmem:[%s13812_s9 + $0x590] sm:$0xff]   ;;  %v11618_v51 = vld [vmem:[%s13812_s9 + $0x5e0] sm:$0xff]  }
0x1104   :  { %v7950_v35 = vmax.f32 %v7711_v37, 0.0  ;;  %v7952_v36 = vmax.f32 %v7754_v23, 0.0  ;;  %10750 = vmatprep.subr.bf16.mxu0 %v11605_v17  ;;  %10772 = vmatprep.subr.bf16.mxu1 %v11606_v54  ;;  %v7394_v6 = vrot.slane %v13420_v4, %v12476_v49  ;;  %v7402_v2 = vrot.slane %v13420_v4, %v12478_v50  ;;  %v11616_v49 = vld [vmem:[%s13812_s9 + $0x598] sm:$0xff]  }
0x1105   :  { %v7951_v25 = vmax.f32 %v7713_v29, 0.0  ;;  %v7953_v48 = vmax.f32 %v7756_v40, 0.0  ;;  %v7398_v9 = vrot.slane %v13420_v4, %v12480_v55  ;;  %v11617_v55 = vld [vmem:[%s13812_s9 + $0x560] sm:$0xff]  }
0x1106   :  { %v13454_v60 = vpack.c.bf16 %v7950_v35, %v7934_v32  ;;  %v13456_v44 = vpack.c.bf16 %v7952_v36, %v7936_v31  ;;  %v11620_v29 = vld [vmem:[%s13812_s9 + $0x5a0] sm:$0xff]   ;;  %v11621_v32 = vld [vmem:[%s13812_s9 + $0x568] sm:$0xff]  }
0x1107   :  { %v7967_v61 = vpack.c.bf16 %v7951_v25, %v7935_v39  ;;  %v7969_v33 = vpack.c.bf16 %v7953_v48, %v7937_v24  ;;  %10751 = vmatpush3.bf16.msra.mxu0 %v11607_v30  ;;  %10773 = vmatpush3.bf16.msra.mxu1 %v11608_v41  ;;  %v7792_v20 = vpop.f32.mrb[104].mxu0  ;;  %v7835_v42 = vpop.f32.mrb[104].mxu1  ;;  %v11622_v31 = vld [vmem:[%s13812_s9 + $0x5e8] sm:$0xff]  }
0x1108   :  { %v7793_v53 = vadd.f32 %v7792_v20, %v7378_v28  ;;  %v7836_v0 = vadd.f32 %v7835_v42, %v7386_v22  ;;  %v7794_v63 = vpop.f32.mrb[105].mxu0  ;;  %v7837_v57 = vpop.f32.mrb[105].mxu1  ;;  %10752 = vmatprep.subr.bf16.mxu0 %v11609_v43  ;;  %10774 = vmatprep.subr.bf16.mxu1 %v11610_v38  ;;  %v11623_v20 = vld [vmem:[%s13812_s9 + $0x528] sm:$0xff]  }
0x1109   :  { %v7795_v59 = vadd.f32 %v7794_v63, %v7382_v3  ;;  %v7838_v62 = vadd.f32 %v7837_v57, %v7390_v11  ;;  %v7796_v47 = vpop.f32.mrb[106].mxu0  ;;  %v7839_v5 = vpop.f32.mrb[106].mxu1  ;;  %9125 = vmatprep.mubr.bf16.mxu0 %v7967_v61  ;;  %9166 = vmatprep.mubr.bf16.mxu1 %v7969_v33  ;;  %v11624_v42 = vld [vmem:[%s13812_s9 + $0x5a8] sm:$0xff]   ;;  %v11625_v63 = vld [vmem:[%s13812_s9 + $0x570] sm:$0xff]  }
0x110a   :  { %v7797_v7 = vadd.f32 %v7796_v47, %v7378_v28  ;;  %v7840_v13 = vadd.f32 %v7839_v5, %v7386_v22  ;;  %v7798_v18 = vpop.f32.mrb[107].mxu0  ;;  %v7841_v1 = vpop.f32.mrb[107].mxu1  ;;  %v7938_v17 = vmax.f32 %v7793_v53, 0.0  ;;  %v7940_v50 = vmax.f32 %v7836_v0, 0.0  ;;  %v11626_v57 = vld [vmem:[%s13812_s9 + $0x5f0] sm:$0xff]  }
0x110b   :  { %v7799_v10 = vadd.f32 %v7798_v18, %v7382_v3  ;;  %v7842_v14 = vadd.f32 %v7841_v1, %v7390_v11  ;;  %10753 = vmatpush3.bf16.msra.mxu0 %v11611_v46  ;;  %10775 = vmatpush3.bf16.msra.mxu1 %v11612_v34  ;;  %v7939_v19 = vmax.f32 %v7795_v59, 0.0  ;;  %v7941_v21 = vmax.f32 %v7838_v62, 0.0  ;;  %v11619_v3 = vld [vmem:[%s13812_s9 + $0x520] sm:$0xff]   ;;  %v11628_v18 = vld [vmem:[%s13812_s9 + $0x5b0] sm:$0xff]   ;;  %v11629_v1 = vld [vmem:[%s13812_s9 + $0x578] sm:$0xff]  }
0x110c   :  { %v7954_v54 = vmax.f32 %v7797_v7, 0.0  ;;  %v7956_v28 = vmax.f32 %v7840_v13, 0.0  ;;  %10754 = vmatprep.subr.bf16.mxu0 %v11613_v58  ;;  %10776 = vmatprep.subr.bf16.mxu1 %v11614_v52  ;;  %v11627_v13 = vld [vmem:[%s13812_s9 + $0x530] sm:$0xff]  }
0x110d   :  { %v7955_v45 = vmax.f32 %v7799_v10, 0.0  ;;  %v7957_v22 = vmax.f32 %v7842_v14, 0.0  ;;  %v11632_v10 = vld [vmem:[%s13812_s9 + $0x5b8] sm:$0xff]   ;;  %v11633_v14 = vld [vmem:[%s13812_s9 + $0x640] sm:$0xff]  }
0x110e   :  { %v13490_v37 = vpack.c.bf16 %v7954_v54, %v7938_v17  ;;  %v13492_v56 = vpack.c.bf16 %v7956_v28, %v7940_v50  ;;  %v11637_v17 = vld [vmem:[%s13812_s9 + $0x648] sm:$0xff]  }
0x110f   :  { %v13494_v4 = vpack.c.bf16 %v7955_v45, %v7939_v19  ;;  %v13496_v23 = vpack.c.bf16 %v7957_v22, %v7941_v21  ;;  %10755 = vmatpush3.bf16.msra.mxu0 %v11615_v15  ;;  %10777 = vmatpush3.bf16.msra.mxu1 %v11616_v49  ;;  %v7878_v26 = vpop.f32.mrb[108].mxu0  ;;  %v7921_v27 = vpop.f32.mrb[108].mxu1  ;;  %v11634_v15 = vld [vmem:[%s13812_s9 + $0x6c0] sm:$0xff]   ;;  %v11638_v50 = vld [vmem:[%s13812_s9 + $0x6c8] sm:$0xff]   ;;  %v11645_v19 = vld [vmem:[%s13812_s9 + $0x658] sm:$0xff]  }
0x1110   :  { %v7879_v40 = vadd.f32 %v7878_v26, %v7394_v6  ;;  %v7922_v30 = vadd.f32 %v7921_v27, %v7402_v2  ;;  %v7880_v41 = vpop.f32.mrb[109].mxu0  ;;  %v7923_v11 = vpop.f32.mrb[109].mxu1  ;;  %10756 = vmatprep.subr.bf16.mxu0 %v11617_v55  ;;  %10778 = vmatprep.subr.bf16.mxu1 %v11618_v51  ;;  %v11635_v49 = vld [vmem:[%s13812_s9 + $0x600] sm:$0xff]   ;;  %v11639_v54 = vld [vmem:[%s13812_s9 + $0x608] sm:$0xff]   ;;  %v11643_v55 = vld [vmem:[%s13812_s9 + $0x610] sm:$0xff]  }
0x1111   :  { %v7881_v35 = vadd.f32 %v7880_v41, %v7398_v9  ;;  %v7924_v36 = vadd.f32 %v7923_v11, %v7406_v16  ;;  %v7882_v43 = vpop.f32.mrb[110].mxu0  ;;  %v7925_v38 = vpop.f32.mrb[110].mxu1  ;;  %v11640_v28 = vld [vmem:[%s13812_s9 + $0x688] sm:$0xff]   ;;  %v11644_v51 = vld [vmem:[%s13812_s9 + $0x690] sm:$0xff]   ;;  %v11646_v21 = vld [vmem:[%s13812_s9 + $0x6d8] sm:$0xff]  }
0x1112   :  { %v7883_v39 = vadd.f32 %v7882_v43, %v7394_v6  ;;  %v7926_v24 = vadd.f32 %v7925_v38, %v7402_v2  ;;  %v7884_v25 = vpop.f32.mrb[111].mxu0  ;;  %v7927_v48 = vpop.f32.mrb[111].mxu1  ;;  %v7942_v46 = vmax.f32 %v7879_v40, 0.0  ;;  %v7944_v34 = vmax.f32 %v7922_v30, 0.0  ;;  %v11630_v2 = vld [vmem:[%s13812_s9 + $0x5f8] sm:$0xff]   ;;  %v11651_v26 = vld [vmem:[%s13812_s9 + $0x620] sm:$0xff]  }
0x1113   :  { %v7885_v61 = vadd.f32 %v7884_v25, %v7398_v9  ;;  %v7928_v33 = vadd.f32 %v7927_v48, %v7406_v16  ;;  %10757 = vmatpush3.bf16.msra.mxu0 %v11619_v3  ;;  %10779 = vmatpush3.bf16.msra.mxu1 %v11620_v29  ;;  %v7943_v58 = vmax.f32 %v7881_v35, 0.0  ;;  %v7945_v52 = vmax.f32 %v7924_v36, 0.0  ;;  %v11631_v9 = vld [vmem:[%s13812_s9 + $0x538] sm:$0xff]   ;;  %v11636_v16 = vld [vmem:[%s13812_s9 + $0x680] sm:$0xff]   ;;  %v11653_v3 = vld [vmem:[%s13812_s9 + $0x668] sm:$0xff]  }
0x1114   :  { %v7958_v53 = vmax.f32 %v7883_v39, 0.0  ;;  %v7960_v0 = vmax.f32 %v7926_v24, 0.0  ;;  %10758 = vmatprep.subr.bf16.mxu0 %v11621_v32  ;;  %10780 = vmatprep.subr.bf16.mxu1 %v11622_v31  ;;  %v11647_v45 = vld [vmem:[%s13812_s9 + $0x618] sm:$0xff]   ;;  %v11652_v27 = vld [vmem:[%s13812_s9 + $0x6a0] sm:$0xff]   ;;  %v11654_v29 = vld [vmem:[%s13812_s9 + $0x6e8] sm:$0xff]  }
0x1115   :  { %v7959_v59 = vmax.f32 %v7885_v61, 0.0  ;;  %v7961_v62 = vmax.f32 %v7928_v33, 0.0  ;;  %v11648_v22 = vld [vmem:[%s13812_s9 + $0x698] sm:$0xff]   ;;  %v11655_v40 = vld [vmem:[%s13812_s9 + $0x628] sm:$0xff]   ;;  %v11657_v41 = vld [vmem:[%s13812_s9 + $0x670] sm:$0xff]  }
0x1116   :  { %v13522_v47 = vpack.c.bf16 %v7958_v53, %v7942_v46  ;;  %v13524_v5 = vpack.c.bf16 %v7960_v0, %v7944_v34  ;;  %v11656_v30 = vld [vmem:[%s13812_s9 + $0x6a8] sm:$0xff]   ;;  %v11658_v11 = vld [vmem:[%s13812_s9 + $0x6f0] sm:$0xff]   ;;  %v11661_v35 = vld [vmem:[%s13812_s9 + $0x678] sm:$0xff]  }
0x1117   :  { %v13526_v6 = vpack.c.bf16 %v7959_v59, %v7943_v58  ;;  %v13528_v7 = vpack.c.bf16 %v7961_v62, %v7945_v52  ;;  %10759 = vmatpush3.bf16.msra.mxu0 %v11623_v20  ;;  %10781 = vmatpush3.bf16.msra.mxu1 %v11624_v42  ;;  %v11659_v32 = vld [vmem:[%s13812_s9 + $0x630] sm:$0xff]   ;;  %v11662_v36 = vld [vmem:[%s13812_s9 + $0x6f8] sm:$0xff]   ;;  %v11665_v39 = vld [vmem:[%s13812_s9 + $0x740] sm:$0xff]  }
0x1118   :  { %10760 = vmatprep.subr.bf16.mxu0 %v11625_v63  ;;  %10782 = vmatprep.subr.bf16.mxu1 %v11626_v57  ;;  %v11660_v31 = vld [vmem:[%s13812_s9 + $0x6b0] sm:$0xff]   ;;  %v11663_v43 = vld [vmem:[%s13812_s9 + $0x638] sm:$0xff]   ;;  %v11666_v24 = vld [vmem:[%s13812_s9 + $0x7c0] sm:$0xff]  }
0x1119   :  { %v11664_v38 = vld [vmem:[%s13812_s9 + $0x6b8] sm:$0xff]   ;;  %v11667_v25 = vld [vmem:[%s13812_s9 + $0x700] sm:$0xff]   ;;  %v11669_v61 = vld [vmem:[%s13812_s9 + $0x748] sm:$0xff]  }
0x111a   :  { %v11668_v48 = vld [vmem:[%s13812_s9 + $0x780] sm:$0xff]   ;;  %v11670_v33 = vld [vmem:[%s13812_s9 + $0x7c8] sm:$0xff]   ;;  %v11675_v46 = vld [vmem:[%s13812_s9 + $0x710] sm:$0xff]  }
0x111b   :  { %10761 = vmatpush3.bf16.msra.mxu0 %v11627_v13  ;;  %10783 = vmatpush3.bf16.msra.mxu1 %v11628_v18  ;;  %v11671_v20 = vld [vmem:[%s13812_s9 + $0x708] sm:$0xff]   ;;  %v11676_v34 = vld [vmem:[%s13812_s9 + $0x790] sm:$0xff]   ;;  %v11677_v53 = vld [vmem:[%s13812_s9 + $0x758] sm:$0xff]  }
0x111c   :  { %10762 = vmatprep.subr.bf16.mxu0 %v11629_v1  ;;  %10784 = vmatprep.subr.bf16.mxu1 %v11630_v2  ;;  %v11672_v42 = vld [vmem:[%s13812_s9 + $0x788] sm:$0xff]   ;;  %v11678_v0 = vld [vmem:[%s13812_s9 + $0x7d8] sm:$0xff]   ;;  %v11681_v58 = vld [vmem:[%s13812_s9 + $0x760] sm:$0xff]  }
0x111d   :  { %v11679_v63 = vld [vmem:[%s13812_s9 + $0x718] sm:$0xff]   ;;  %v11682_v52 = vld [vmem:[%s13812_s9 + $0x7e0] sm:$0xff]   ;;  %v11687_v13 = vld [vmem:[%s13812_s9 + $0x728] sm:$0xff]  }
0x111e   :  { %v11680_v57 = vld [vmem:[%s13812_s9 + $0x798] sm:$0xff]   ;;  %v11683_v59 = vld [vmem:[%s13812_s9 + $0x720] sm:$0xff]   ;;  %v11688_v18 = vld [vmem:[%s13812_s9 + $0x7a8] sm:$0xff]  }
0x111f   :  { %10763 = vmatpush3.bf16.msra.mxu0 %v11631_v9  ;;  %10785 = vmatpush3.bf16.msra.mxu1 %v11632_v10  ;;  %v11684_v62 = vld [vmem:[%s13812_s9 + $0x7a0] sm:$0xff]   ;;  %v11689_v1 = vld [vmem:[%s13812_s9 + $0x770] sm:$0xff]  }
0x1120   :  { %10792 = vmatprep.subr.bf16.mxu0 %v11633_v14  ;;  %10814 = vmatprep.subr.bf16.mxu1 %v11634_v15  ;;  %v11690_v2 = vld [vmem:[%s13812_s9 + $0x7f0] sm:$0xff]   ;;  %v11693_v14 = vld [vmem:[%s13812_s9 + $0x778] sm:$0xff]  }
0x1121   :  { %v11691_v9 = vld [vmem:[%s13812_s9 + $0x730] sm:$0xff]   ;;  %v11694_v15 = vld [vmem:[%s13812_s9 + $0x7f8] sm:$0xff]  }
0x1122   :  { %9126 = vmatmul.mubr.bf16.vlgmr.msra.gmra.mrb[116].mxu0 %v13454_v60  ;;  %9167 = vmatmul.mubr.bf16.vlgmr.msra.gmra.mrb[116].mxu1 %v13456_v44  ;;  %v11641_v60 = vld [vmem:[%s13812_s9 + $0x650] sm:$0xff]  }
0x1123   :  { %10793 = vmatpush3.bf16.msra.mxu0 %v11635_v49  ;;  %9207 = vmatprep.mubr.bf16.mxu0 %v13494_v4  ;;  %v11642_v44 = vld [vmem:[%s13812_s9 + $0x6d0] sm:$0xff]   ;;  %v11649_v4 = vld [vmem:[%s13812_s9 + $0x660] sm:$0xff]   ;;  %v11695_v49 = vld [vmem:[%s13812_s9 + $0x738] sm:$0xff]  }
0x1124   :  { %10815 = vmatpush3.bf16.msra.mxu1 %v11636_v16  ;;  %9248 = vmatprep.mubr.bf16.mxu1 %v13496_v23  ;;  %v11650_v23 = vld [vmem:[%s13812_s9 + $0x6e0] sm:$0xff]   ;;  %v11692_v10 = vld [vmem:[%s13812_s9 + $0x7b0] sm:$0xff]   ;;  %v11696_v16 = vld [vmem:[%s13812_s9 + $0x7b8] sm:$0xff]  }
0x1125   :  { %10794 = vmatprep.subr.bf16.mxu0 %v11637_v17  ;;  %10816 = vmatprep.subr.bf16.mxu1 %v11638_v50 }
0x1127   :  { %10795 = vmatpush3.bf16.msra.mxu0 %v11639_v54  ;;  %v10213_v54 = vld [vmem:[%s13813_s10 + $0x1] ss:$0 sm:$0xff] }
0x1128   :  { %10817 = vmatpush3.bf16.msra.mxu1 %v11640_v28  ;;  %10796 = vmatprep.subr.bf16.mxu0 %v11641_v60 }
0x1129   :  { %10818 = vmatprep.subr.bf16.mxu1 %v11642_v44 }
0x112b   :  { %10797 = vmatpush3.bf16.msra.mxu0 %v11643_v55 }
0x112c   :  { %10819 = vmatpush3.bf16.msra.mxu1 %v11644_v51  ;;  %10798 = vmatprep.subr.bf16.mxu0 %v11645_v19 }
0x112d   :  { %10820 = vmatprep.subr.bf16.mxu1 %v11646_v21 }
0x112f   :  { %10799 = vmatpush3.bf16.msra.mxu0 %v11647_v45 }
0x1130   :  { %10821 = vmatpush3.bf16.msra.mxu1 %v11648_v22  ;;  %10800 = vmatprep.subr.bf16.mxu0 %v11649_v4 }
0x1131   :  { %10822 = vmatprep.subr.bf16.mxu1 %v11650_v23 }
0x1133   :  { %10801 = vmatpush3.bf16.msra.mxu0 %v11651_v26 }
0x1134   :  { %10823 = vmatpush3.bf16.msra.mxu1 %v11652_v27  ;;  %10802 = vmatprep.subr.bf16.mxu0 %v11653_v3 }
0x1135   :  { %10824 = vmatprep.subr.bf16.mxu1 %v11654_v29 }
0x1137   :  { %10803 = vmatpush3.bf16.msra.mxu0 %v11655_v40 }
0x1138   :  { %10825 = vmatpush3.bf16.msra.mxu1 %v11656_v30  ;;  %10804 = vmatprep.subr.bf16.mxu0 %v11657_v41 }
0x1139   :  { %10826 = vmatprep.subr.bf16.mxu1 %v11658_v11 }
0x113b   :  { %10805 = vmatpush3.bf16.msra.mxu0 %v11659_v32 }
0x113c   :  { %10827 = vmatpush3.bf16.msra.mxu1 %v11660_v31  ;;  %10806 = vmatprep.subr.bf16.mxu0 %v11661_v35 }
0x113d   :  { %10828 = vmatprep.subr.bf16.mxu1 %v11662_v36 }
0x113f   :  { %10807 = vmatpush3.bf16.msra.mxu0 %v11663_v43 }
0x1140   :  { %10829 = vmatpush3.bf16.msra.mxu1 %v11664_v38  ;;  %10836 = vmatprep.subr.bf16.mxu0 %v11665_v39 }
0x1141   :  { %10858 = vmatprep.subr.bf16.mxu1 %v11666_v24 }
0x1142   :  { %9208 = vmatmul.mubr.bf16.vlgmr.msra.gmra.mrb[120].mxu0 %v13490_v37  ;;  %v11673_v37 = vld [vmem:[%s13812_s9 + $0x750] sm:$0xff]  }
0x1143   :  { %9249 = vmatmul.mubr.bf16.vlgmr.msra.gmra.mrb[120].mxu1 %v13492_v56  ;;  %10837 = vmatpush3.bf16.msra.mxu0 %v11667_v25  ;;  %v11674_v56 = vld [vmem:[%s13812_s9 + $0x7d0] sm:$0xff]  }
0x1144   :  { %9289 = vmatprep.mubr.bf16.mxu0 %v13526_v6  ;;  %10859 = vmatpush3.bf16.msra.mxu1 %v11668_v48  ;;  %v11685_v6 = vld [vmem:[%s13812_s9 + $0x768] sm:$0xff]  }
0x1145   :  { %9330 = vmatprep.mubr.bf16.mxu1 %v13528_v7  ;;  %10838 = vmatprep.subr.bf16.mxu0 %v11669_v61  ;;  %v11686_v7 = vld [vmem:[%s13812_s9 + $0x7e8] sm:$0xff]  }
0x1146   :  { %10860 = vmatprep.subr.bf16.mxu1 %v11670_v33 }
0x1147   :  { %10839 = vmatpush3.bf16.msra.mxu0 %v11671_v20 }
0x1148   :  { %10861 = vmatpush3.bf16.msra.mxu1 %v11672_v42  ;;  %10840 = vmatprep.subr.bf16.mxu0 %v11673_v37 }
0x1149   :  { %10862 = vmatprep.subr.bf16.mxu1 %v11674_v56 }
0x114b   :  { %10841 = vmatpush3.bf16.msra.mxu0 %v11675_v46 }
0x114c   :  { %10863 = vmatpush3.bf16.msra.mxu1 %v11676_v34  ;;  %10842 = vmatprep.subr.bf16.mxu0 %v11677_v53 }
0x114d   :  { %10864 = vmatprep.subr.bf16.mxu1 %v11678_v0 }
0x114f   :  { %10843 = vmatpush3.bf16.msra.mxu0 %v11679_v63 }
0x1150   :  { %10865 = vmatpush3.bf16.msra.mxu1 %v11680_v57  ;;  %10844 = vmatprep.subr.bf16.mxu0 %v11681_v58 }
0x1151   :  { %10866 = vmatprep.subr.bf16.mxu1 %v11682_v52 }
0x1153   :  { %10845 = vmatpush3.bf16.msra.mxu0 %v11683_v59 }
0x1154   :  { %10867 = vmatpush3.bf16.msra.mxu1 %v11684_v62  ;;  %10846 = vmatprep.subr.bf16.mxu0 %v11685_v6 }
0x1155   :  { %10868 = vmatprep.subr.bf16.mxu1 %v11686_v7 }
0x1157   :  { %10847 = vmatpush3.bf16.msra.mxu0 %v11687_v13 }
0x1158   :  { %10869 = vmatpush3.bf16.msra.mxu1 %v11688_v18  ;;  %10848 = vmatprep.subr.bf16.mxu0 %v11689_v1 }
0x1159   :  { %10870 = vmatprep.subr.bf16.mxu1 %v11690_v2 }
0x115b   :  { %10849 = vmatpush3.bf16.msra.mxu0 %v11691_v9 }
0x115c   :  { %10871 = vmatpush3.bf16.msra.mxu1 %v11692_v10  ;;  %10850 = vmatprep.subr.bf16.mxu0 %v11693_v14 }
0x115d   :  { %10872 = vmatprep.subr.bf16.mxu1 %v11694_v15 }
0x115f   :  { %10851 = vmatpush3.bf16.msra.mxu0 %v11695_v49 }
0x1160   :  { %10873 = vmatpush3.bf16.msra.mxu1 %v11696_v16 }
0x1162   :  { %9290 = vmatmul.mubr.bf16.vlgmr.msra.gmra.mrb[124].mxu0 %v13522_v47 }
0x1163   :  { %9331 = vmatmul.mubr.bf16.vlgmr.msra.gmra.mrb[124].mxu1 %v13524_v5 }
0x11d5   :  { %v10720_v17 = vpop.f32.mrb[112].mxu0  ;;  %v10742_v50 = vpop.f32.mrb[112].mxu1 }
0x11d6   :  { %v10721_v28 = vpop.f32.mrb[113].mxu0  ;;  %v10743_v60 = vpop.f32.mrb[113].mxu1 }
0x11d7   :  { %v10722_v44 = vadd.f32 %v10721_v28, %v10720_v17  ;;  %v10744_v55 = vadd.f32 %v10743_v60, %v10742_v50  ;;  %v10723_v51 = vpop.f32.mrb[114].mxu0  ;;  %v10745_v19 = vpop.f32.mrb[114].mxu1 }
0x11d8   :  { %v10724_v21 = vpop.f32.mrb[115].mxu0  ;;  %v10746_v45 = vpop.f32.mrb[115].mxu1 }
0x11d9   :  { %v9046_v22 = vadd.f32 %v10722_v44, %v10213_v54  ;;  %v10725_v4 = vadd.f32 %v10724_v21, %v10723_v51  ;;  %v10747_v23 = vadd.f32 %v10746_v45, %v10745_v19 }
0x11db   :  { %v9087_v47 = vadd.f32 %v10744_v55, %v9046_v22  ;;  %v9049_v26 = vadd.f32 %v10725_v4, %v10213_v54 }
0x11dd   :  { %v9090_v5 = vadd.f32 %v10747_v23, %v9049_v26 }
0x11f5   :  { %v10764_v27 = vpop.f32.mrb[116].mxu0  ;;  %v10786_v3 = vpop.f32.mrb[116].mxu1 }
0x11f6   :  { %v10765_v29 = vpop.f32.mrb[117].mxu0  ;;  %v10787_v40 = vpop.f32.mrb[117].mxu1 }
0x11f7   :  { %v10766_v30 = vadd.f32 %v10765_v29, %v10764_v27  ;;  %v10788_v41 = vadd.f32 %v10787_v40, %v10786_v3  ;;  %v10767_v11 = vpop.f32.mrb[118].mxu0  ;;  %v10789_v32 = vpop.f32.mrb[118].mxu1  ;;  %v9389_v3 = vld [vmem:[%s13816_s13 + $0x10] sm:$0xff]  ;;  %v9390_v29 = vld [vmem:[%s13816_s13 + $0x18] sm:$0xff] }
0x11f8   :  { %v10768_v31 = vpop.f32.mrb[119].mxu0  ;;  %v10790_v35 = vpop.f32.mrb[119].mxu1  ;;  %v11424_v40 = vpack.c.bf16 %v9390_v29, %v9389_v3 }
0x11f9   :  { %v9128_v36 = vadd.f32 %v10766_v30, %v9087_v47  ;;  %v10769_v43 = vadd.f32 %v10768_v31, %v10767_v11  ;;  %v10791_v38 = vadd.f32 %v10790_v35, %v10789_v32  ;;  %v9481_v30 = vld [vmem:[%s13818_s15] sm:$0xff] }
0x11fb   :  { %v9169_v39 = vadd.f32 %v10788_v41, %v9128_v36  ;;  %v9131_v24 = vadd.f32 %v10769_v43, %v9090_v5  ;;  %v9388_v5 = vld [vmem:[%s13816_s13 + $0x8] sm:$0xff] }
0x11fc   :  { %v9482_v41 = vld [vmem:[%s13818_s15 + $0x8] sm:$0xff] }
0x11fd   :  { %v9172_v25 = vadd.f32 %v10791_v38, %v9131_v24  ;;  %v11428_v11 = vpack.c.bf16 %v9482_v41, %v9481_v30  ;;  %v10344_v24 = vld [vmem:[%s13814_s11 + $0x1] ss:$0 sm:$0xff] }
0x11ff   :  { %11429 = vmatprep.subr.bf16.mxu1 %v11428_v11 }
0x1200   :  { %11431 = vmatpush3.bf16.msra.mxu1 %v11428_v11 }
0x1215   :  { %v10808_v48 = vpop.f32.mrb[120].mxu0 }
0x1216   :  { %v10830_v61 = vpop.f32.mrb[120].mxu1  ;;  %v10809_v33 = vpop.f32.mrb[121].mxu0 }
0x1217   :  { %v10810_v20 = vadd.f32 %v10809_v33, %v10808_v48  ;;  %v10831_v42 = vpop.f32.mrb[121].mxu1  ;;  %v10811_v37 = vpop.f32.mrb[122].mxu0 }
0x1218   :  { %v10832_v56 = vadd.f32 %v10831_v42, %v10830_v61  ;;  %v10833_v46 = vpop.f32.mrb[122].mxu1  ;;  %v10812_v34 = vpop.f32.mrb[123].mxu0  ;;  %v10345_v61 = vld [vmem:[%s13815_s12 + $0x1] ss:$0 sm:$0xff] }
0x1219   :  { %v9210_v53 = vadd.f32 %v10810_v20, %v9169_v39  ;;  %v10813_v0 = vadd.f32 %v10812_v34, %v10811_v37  ;;  %v10834_v63 = vpop.f32.mrb[123].mxu1 }
0x121a   :  { %v10835_v57 = vadd.f32 %v10834_v63, %v10833_v46  ;;  %v10346_v46 = vld [vmem:[%s13817_s14] ss:$0 sm:$0xff]  ;;  %s11779_s14 = scalar_lea.vmem %s9580_s30, 256 }
0x121b   :  { %v9251_v58 = vadd.f32 %v10832_v56, %v9210_v53  ;;  %v9213_v52 = vadd.f32 %v10813_v0, %v9172_v25  ;;  %p11780_p0 = scmp.ne.s32.totalorder %s9580_s30, %s11779_s14  ;;  %p11785_p2 = scmp.lt.s32.totalorder %s11779_s14, %s11779_s14 }
0x121d   :  { %v9254_v59 = vadd.f32 %v10835_v57, %v9213_v52  ;;  %v10349_v52 = vld [vmem:[%s13819_s16] ss:$0 sm:$0xff]  ;;  %p11786_p3 = por %p11785_p2, %p11784_p1 }
0x121f   :  { %p11787_p4 = pnand %p11786_p3, %p11780_p0 }
0x1235   :  { %v10852_v62 = vpop.f32.mrb[124].mxu0 }
0x1236   :  { %v10874_v6 = vpop.f32.mrb[124].mxu1  ;;  %v10853_v7 = vpop.f32.mrb[125].mxu0 }
0x1237   :  { %v10854_v13 = vadd.f32 %v10853_v7, %v10852_v62  ;;  %v10875_v18 = vpop.f32.mrb[125].mxu1  ;;  %v10855_v1 = vpop.f32.mrb[126].mxu0 }
0x1238   :  { %v10876_v2 = vadd.f32 %v10875_v18, %v10874_v6  ;;  %v10877_v9 = vpop.f32.mrb[126].mxu1  ;;  %v10856_v10 = vpop.f32.mrb[127].mxu0 }
0x1239   :  { %v9292_v14 = vadd.f32 %v10854_v13, %v9251_v58  ;;  %v10857_v15 = vadd.f32 %v10856_v10, %v10855_v1  ;;  %v10878_v49 = vpop.f32.mrb[127].mxu1 }
0x123a   :  { %v10879_v16 = vadd.f32 %v10878_v49, %v10877_v9 }
0x123b   :  { %v9333_v17 = vadd.f32 %v10876_v2, %v9292_v14  ;;  %v9295_v50 = vadd.f32 %v10857_v15, %v9254_v59 }
0x123d   :  { %v9336_v54 = vadd.f32 %v10879_v16, %v9295_v50  ;;  %v9339_v28 = vadd.f32 %v9333_v17, %v13226_v8 }
0x123f   :  { %v9345_v60 = vsel %vm108_vm1, %v9339_v28, 0.0  ;;  %v9340_v44 = vadd.f32 %v9336_v54, %v13228_v12  ;;  %v9387_v12 = vld [vmem:[%s13816_s13] sm:$0xff] }
0x1240   :  { %9346 = vadd.xlane.f32.xlu1 %v9345_v60  ;;  %v11420_v27 = vpack.c.bf16 %v9388_v5, %v9387_v12 }
0x1241   :  { %v9348_v55 = vsel %vm108_vm1, %v9340_v44, 0.0 }
0x1242   :  { %9349 = vadd.xlane.f32.xlu0 %v9348_v55  ;;  %11421 = vmatprep.subr.bf16.mxu0 %v11420_v27 }
0x1243   :  { %11423 = vmatpush3.bf16.msra.mxu0 %v11420_v27 }
0x1244   :  { %11425 = vmatprep.subr.bf16.mxu0 %v11424_v40 }
0x1247   :  { %11427 = vmatpush3.bf16.msra.mxu0 %v11424_v40 }
0x12cd   :  { %v9347_v51 = vpop.xlane.xlu1 %9346 }
0x12ce   :  { %v9351_v19 = vmul.f32 0.03125, %v9347_v51 }
0x12cf   :  { %v9350_v21 = vpop.xlane.xlu0 %9349 }
0x12d0   :  { %v9353_v45 = vsub.f32 %v9339_v28, %v9351_v19  ;;  %v9352_v22 = vmul.f32 0.03125, %v9350_v21 }
0x12d2   :  { %v9354_v4 = vsub.f32 %v9340_v44, %v9352_v22  ;;  %v9355_v23 = vmul.f32 %v9353_v45, %v9353_v45 }
0x12d4   :  { %v9357_v47 = vsel %vm108_vm1, %v9355_v23, 0.0  ;;  %v9356_v26 = vmul.f32 %v9354_v4, %v9354_v4 }
0x12d5   :  { %9358 = vadd.xlane.f32.xlu1 %v9357_v47 }
0x12d6   :  { %v9360_v8 = vsel %vm108_vm1, %v9356_v26, 0.0 }
0x12d7   :  { %9361 = vadd.xlane.f32.xlu0 %v9360_v8 }
0x1362   :  { %v9359_v32 = vpop.xlane.xlu1 %9358 }
0x1363   :  { %v9363_v31 = vmul.f32 0.03125, %v9359_v32 }
0x1364   :  { %v9362_v35 = vpop.xlane.xlu0 %9361 }
0x1365   :  { %v9365_v36 = vadd.f32 1e-05, %v9363_v31  ;;  %v9364_v43 = vmul.f32 0.03125, %v9362_v35 }
0x1367   :  { %11773 = vrsqrt.f32 %v9365_v36  ;;  %v9366_v38 = vadd.f32 1e-05, %v9364_v43 }
0x1369   :  { %11775 = vrsqrt.f32 %v9366_v38 }
0x1371   :  { %v11774_v39 = vpop.eup %11773 }
0x1372   :  { %v9369_v25 = vmul.f32 %v11774_v39, %v9353_v45 }
0x1373   :  { %v11776_v48 = vpop.eup %11775 }
0x1374   :  { %v9370_v33 = vmul.f32 %v11776_v48, %v9354_v4  ;;  %v9377_v20 = vmul.f32 %v10344_v24, %v9369_v25 }
0x1376   :  { %v9378_v42 = vmul.f32 %v10344_v24, %v9370_v33  ;;  %v9385_v37 = vadd.f32 %v10345_v61, %v9377_v20 }
0x1378   :  { %v9386_v56 = vadd.f32 %v10345_v61, %v9378_v42  ;;  %11314 = vmatprep.mubr.msk.f32.mxu0 %vm108_vm1, %v9385_v37 }
0x137a   :  { %11315 = vmatmul.mubr.msk.f32.vlgmr.msra.gmra.mrb[128].mxu0 %vm108_vm1, %v9386_v56 }
0x144d   :  { %v11316_v34 = vpop.f32.mrb[128].mxu0 }
0x144e   :  { %v9476_v53 = vadd.f32 %v11316_v34, %v10346_v46  ;;  %v9470_v0 = vpop.f32.mrb[129].mxu0 }
0x144f   :  { %v9471_v63 = vadd.f32 %v10346_v46, %v9470_v0 }
0x1450   :  { %v9480_v58 = vmax.f32 %v9476_v53, 0.0 }
0x1451   :  { %v9479_v57 = vmax.f32 %v9471_v63, 0.0 }
0x1453   :  { %11321 = vmatprep.mubr.msk.f32.mxu1 %vm9490_vm3, %v9479_v57 }
0x1454   :  { %11322 = vmatmul.mubr.msk.f32.vlgmr.msra.gmra.mrb[128].mxu1 %vm9490_vm3, %v9480_v58 }
0x1527   :  { %v11323_v59 = vpop.f32.mrb[128].mxu1 }
0x1528   :  { %v9569_v62 = vadd.f32 %v11323_v59, %v10349_v52  ;;  %v9563_v6 = vpop.f32.mrb[129].mxu1 }
0x1529   :  { %v9564_v7 = vadd.f32 %v10349_v52, %v9563_v6 }
0x152a   :  { %9573 = vst.msk [vmem:[#allocation2 + $0x8] sm:$0xff] %vm9490_vm3, %v9569_v62 }
0x152b   :  { %9572 = vst.msk [vmem:[#allocation2] sm:$0xff] %vm9490_vm3, %v9564_v7 }
0x152c   :  { %11790 = shalt.err (!%p11787_p4)
}
0x152d   :  { %s11791_s16 = scalar_lea.hbm %s13820_s17, 256 }
0x152e   :  { %p11792_p5 = scmp.ne.s32.totalorder %s13820_s17, %s11791_s16  ;;  %p11795_p6 = scmp.lt.u32.totalorder %s11791_s16, %s13820_s17 }
0x1530   :  { %p11797_p7 = pnand %p11795_p6, %p11792_p5 }
0x1532   :  { %11800 = shalt.err (!%p11797_p7)
}
0x1533   :  { %s11810_s9 = smov 128   ;;  %s11811_s10 = smov 8  }
0x1534   :  { %9585 = dma.vmem_to_hbm [thread:$0]  %s9580_s30, 256, %s13820_s17, [#allocation3], %s11810_s9, %s11810_s9, %s11811_s10  }
0x1535   :  { %11801 = dma.done.wait [#allocation3], 256  }
0x1536   :  { %11802 = vsyncadd [#allocation3], 4294967040 }
0x1537   :  { %9589 = vsyncpa [#allocation3], 1 }

</bundles_post_ra>
